<compile_context>
chip_gen: v7x
topology: tpu7x:2x2x1
jax: 0.10.0
libtpu: 0.0.40
codegen_flags: <defaults>
</compile_context>

<pallas_src>
import functools

import jax
import jax.numpy as jnp
from jax.experimental import pallas as pl
from jax.experimental.pallas import tpu as pltpu


# ----------------------------------------------------------------------------
# Fused Pallas kernel: one image per grid step
# ----------------------------------------------------------------------------
def _silu_f32(y):
    # y * sigmoid(y) in f32; exp on the EUP, reciprocal instead of a divide.
    return y * pl.reciprocal(1.0 + jnp.exp(-y), approx=False)


def _bottleneck_kernel(x_ref, w1_ref, b1_ref, w2_ref, b2_ref, o_ref,
                       pad_ref, patch_ref, *, H, W, hid, use_add):
    """Fused: 1x1 conv+BN+SiLU -> 3x3 conv+BN+SiLU -> (+x)  for one image.

    x_ref  : (1, H*W, Cin)   f32
    w1_ref : (Cin, hid)      bf16   (BN scale folded in)
    b1_ref : (1, hid)        f32
    w2_ref : (9*hid, Cout)   bf16   (BN scale folded in, tap-major layout)
    b2_ref : (1, Cout)       f32
    o_ref  : (1, H*W, Cout)  f32
    pad_ref   : VMEM (H+2, W+2, hid) f32  -- zero-padded conv1 output
    patch_ref : VMEM (H, W, 9*hid)   f32  -- im2col patches for the 3x3 conv
    """
    x = x_ref[0]                                            # (H*W, Cin) f32

    # --- conv1: 1x1 conv (scale folded) + bias + SiLU -------------------------
    y1 = jnp.dot(x.astype(jnp.bfloat16), w1_ref[...],
                 preferred_element_type=jnp.float32)        # (H*W, hid)
    y1 = _silu_f32(y1 + b1_ref[...])

    # --- zero-pad conv1 output entirely inside VMEM ---------------------------
    pad_ref[...] = jnp.zeros_like(pad_ref)
    pad_ref[1:H + 1, 1:W + 1, :] = y1.reshape(H, W, hid)

    # --- im2col: 9 shifted taps gathered into one (H, W, 9*hid) block ---------
    t = 0
    for dy in range(3):
        for dx in range(3):
            patch_ref[:, :, t * hid:(t + 1) * hid] = pad_ref[dy:dy + H,
                                                             dx:dx + W, :]
            t += 1

    patches = patch_ref[...].reshape(H * W, 9 * hid).astype(jnp.bfloat16)

    # --- conv2: single MXU pass with K = 9*hid, then bias + SiLU --------------
    y2 = jnp.dot(patches, w2_ref[...],
                 preferred_element_type=jnp.float32)        # (H*W, Cout)
    y2 = _silu_f32(y2 + b2_ref[...])

    # --- residual (shortcut and Cin == Cout): reuse the already-loaded x ------
    if use_add:
        y2 = y2 + x

    o_ref[0] = y2


# ----------------------------------------------------------------------------
# Wrapper
# ----------------------------------------------------------------------------
def bottleneck_pallas(x, p, shortcut=True):
    """x: (N, H, W, Cin) f32 -> (N, H, W, Cout) f32."""
    N, H, W, Cin = x.shape
    hid = p["w1"].shape[1]
    Cout = p["w2"].shape[3]
    use_add = bool(shortcut) and (Cin == Cout)

    # Free row-major reshape; the kernel works on a (H*W, C) slab per image.
    x2 = x.reshape(N, H * W, Cin)

    w1 = p["w1"].astype(jnp.bfloat16)                       # (Cin, hid)
    b1 = p["b1"].reshape(1, hid).astype(jnp.float32)
    w2 = p["w2"].reshape(9 * hid, Cout).astype(jnp.bfloat16)  # tap-major
    b2 = p["b2"].reshape(1, Cout).astype(jnp.float32)

    kernel = functools.partial(_bottleneck_kernel,
                               H=H, W=W, hid=hid, use_add=use_add)

    # TODO(synk): for production spatial sizes, add an H-row tile axis to the
    # grid (with a 2-row halo for the 3x3) so the pipeline has many parallel
    # steps and per-step VMEM stays bounded (esp. on v7x's 64 MiB VMEM).
    out = pl.pallas_call(
        kernel,
        out_shape=jax.ShapeDtypeStruct((N, H * W, Cout), jnp.float32),
        grid=(N,),
        in_specs=[
            pl.BlockSpec((1, H * W, Cin), lambda n: (n, 0, 0)),
            pl.BlockSpec((Cin, hid), lambda n: (0, 0)),
            pl.BlockSpec((1, hid), lambda n: (0, 0)),
            pl.BlockSpec((9 * hid, Cout), lambda n: (0, 0)),
            pl.BlockSpec((1, Cout), lambda n: (0, 0)),
        ],
        out_specs=pl.BlockSpec((1, H * W, Cout), lambda n: (n, 0, 0)),
        scratch_shapes=[
            pltpu.VMEM((H + 2, W + 2, hid), jnp.float32),
            pltpu.VMEM((H, W, 9 * hid), jnp.float32),
        ],
        compiler_params=pltpu.CompilerParams(
            dimension_semantics=("parallel",)),
    )(x2, w1, b1, w2, b2)

    return out.reshape(N, H, W, Cout)


# ----------------------------------------------------------------------------
# Parameter construction (deterministic, synthetic), BN folded (inference mode)
# ----------------------------------------------------------------------------
def _fold_bn(key, c):
    kg, kb, km, kv = jax.random.split(key, 4)
    gamma = 1.0 + 0.1 * jax.random.normal(kg, (c,), jnp.float32)
    beta = 0.05 * jax.random.normal(kb, (c,), jnp.float32)
    mean = 0.1 * jax.random.normal(km, (c,), jnp.float32)
    var = 1.0 + 0.1 * jnp.abs(jax.random.normal(kv, (c,), jnp.float32))
    scale = gamma / jnp.sqrt(var + 1e-5)
    bias = beta - mean * scale
    return scale, bias


def make_bottleneck_params(key, in_c, out_c, expansion=0.5):
    # TODO(synk): training-mode BatchNorm (batch statistics) is not implemented;
    # BN is folded in inference mode (scale into weights, bias kept separate).
    hid = int(out_c * expansion)
    ks = jax.random.split(key, 4)
    w1 = jax.random.normal(ks[0], (in_c, hid), jnp.float32) / jnp.sqrt(in_c)
    w2 = jax.random.normal(ks[1], (3, 3, hid, out_c), jnp.float32) / jnp.sqrt(
        9.0 * hid)
    s1, b1 = _fold_bn(ks[2], hid)
    s2, b2 = _fold_bn(ks[3], out_c)
    return dict(
        w1=w1 * s1[None, :],                 # BN scale folded into 1x1 weight
        b1=b1,
        w2=w2 * s2[None, None, None, :],     # BN scale folded into 3x3 weight
        b2=b2,
    )


# ----------------------------------------------------------------------------
# Pure-JAX reference (same folded bf16 weights, f32 accumulation/epilogue)
# ----------------------------------------------------------------------------
def bottleneck_ref(x, p, shortcut=True):
    N, H, W, Cin = x.shape
    hid = p["w1"].shape[1]
    Cout = p["w2"].shape[3]
    use_add = bool(shortcut) and (Cin == Cout)

    w1 = p["w1"].astype(jnp.bfloat16).reshape(1, 1, Cin, hid)
    w2 = p["w2"].astype(jnp.bfloat16)

    y = jax.lax.conv_general_dilated(
        x.astype(jnp.bfloat16), w1, (1, 1), [(0, 0), (0, 0)],
        dimension_numbers=("NHWC", "HWIO", "NHWC"),
        preferred_element_type=jnp.float32)
    y = y + p["b1"]
    y = y * jax.nn.sigmoid(y)

    z = jax.lax.conv_general_dilated(
        y.astype(jnp.bfloat16), w2, (1, 1), [(1, 1), (1, 1)],
        dimension_numbers=("NHWC", "HWIO", "NHWC"),
        preferred_element_type=jnp.float32)
    z = z + p["b2"]
    z = z * jax.nn.sigmoid(z)

    if use_add:
        z = z + x
    return z


# ----------------------------------------------------------------------------
if __name__ == "__main__":
    # TODO(synk): depthwise=True (DWConv) and groups>1 (channel permute) paths
    # are not implemented; the module defaults use BaseConv with groups=1.
    N, H, W = 2, 16, 16
    in_channels = out_channels = 32      # hidden = 16; shortcut active (Cin==Cout)

    key = jax.random.PRNGKey(0)
    kx, kp = jax.random.split(key)
    x = jax.random.normal(kx, (N, H, W, in_channels), jnp.float32)
    params = make_bottleneck_params(kp, in_channels, out_channels)

    out = jax.block_until_ready(bottleneck_pallas(x, params, shortcut=True))
    ref = jax.block_until_ready(bottleneck_ref(x, params, shortcut=True))

    assert out.shape == (N, H, W, out_channels)
    max_err = float(jnp.max(jnp.abs(out - ref)))
    assert jnp.allclose(out, ref, rtol=2e-3, atol=2e-3), max_err

    print("KERNEL_OK")
</pallas_src>

<mosaic_0001>
module attributes {stable_mosaic.version = 11 : i64} {
  func.func @_bottleneck_kernel(%arg0: i32, %arg1: memref<1x256x32xf32, #tpu.memory_space<vmem>>, %arg2: memref<32x16xbf16, #tpu.memory_space<vmem>>, %arg3: memref<1x16xf32, #tpu.memory_space<vmem>>, %arg4: memref<144x32xbf16, #tpu.memory_space<vmem>>, %arg5: memref<1x32xf32, #tpu.memory_space<vmem>>, %arg6: memref<1x256x32xf32, #tpu.memory_space<vmem>>, %arg7: memref<18x18x16xf32, #tpu.memory_space<vmem>>, %arg8: memref<16x16x144xf32, #tpu.memory_space<vmem>>) attributes {dimension_semantics = [#tpu.dimension_semantics<parallel>], iteration_bounds = array<i64: 2>, scalar_prefetch = 0 : i64, scratch_operands = 2 : i64, tpu.core_type = #tpu.core_type<tc>, window_params = [{transform_indices = @transform_0, window_bounds = array<i64: 1, 256, 32>}, {pipeline_mode = #tpu.pipeline_mode<synchronous>, transform_indices = @transform_1, window_bounds = array<i64: 32, 16>}, {pipeline_mode = #tpu.pipeline_mode<synchronous>, transform_indices = @transform_2, window_bounds = array<i64: 1, 16>}, {pipeline_mode = #tpu.pipeline_mode<synchronous>, transform_indices = @transform_3, window_bounds = array<i64: 144, 32>}, {pipeline_mode = #tpu.pipeline_mode<synchronous>, transform_indices = @transform_4, window_bounds = array<i64: 1, 32>}, {transform_indices = @transform_5, window_bounds = array<i64: 1, 256, 32>}]} {
    %c0 = arith.constant 0 : index
    %c0_0 = arith.constant 0 : index
    %c0_1 = arith.constant 0 : index
    %0 = vector.load %arg1[%c0, %c0_0, %c0_1] : memref<1x256x32xf32, #tpu.memory_space<vmem>>, vector<1x256x32xf32>
    %1 = vector.shape_cast %0 : vector<1x256x32xf32> to vector<256x32xf32>
    %2 = arith.truncf %1 : vector<256x32xf32> to vector<256x32xbf16>
    %c0_2 = arith.constant 0 : index
    %c0_3 = arith.constant 0 : index
    %3 = vector.load %arg2[%c0_2, %c0_3] : memref<32x16xbf16, #tpu.memory_space<vmem>>, vector<32x16xbf16>
    %cst = arith.constant dense<0.000000e+00> : vector<256x16xf32>
    %4 = tpu.matmul %2, %3, %cst {dimension_numbers = #tpu.dot_dimension_numbers<[1], [0], [0], [1], [0, 0, 1, 1], [], []>} : vector<256x32xbf16>, vector<32x16xbf16>, vector<256x16xf32> -> vector<256x16xf32>
    %c0_4 = arith.constant 0 : index
    %c0_5 = arith.constant 0 : index
    %5 = vector.load %arg3[%c0_4, %c0_5] : memref<1x16xf32, #tpu.memory_space<vmem>>, vector<1x16xf32>
    %6 = vector.broadcast %5 : vector<1x16xf32> to vector<256x16xf32>
    %7 = arith.addf %4, %6 : vector<256x16xf32>
    %cst_6 = arith.constant 0.000000e+00 : f32
    %8 = vector.broadcast %cst_6 : f32 to vector<256x16xf32>
    %9 = arith.subf %8, %7 : vector<256x16xf32>
    %10 = math.exp %9 : vector<256x16xf32>
    %cst_7 = arith.constant 1.000000e+00 : f32
    %11 = vector.broadcast %cst_7 : f32 to vector<256x16xf32>
    %12 = arith.addf %11, %10 : vector<256x16xf32>
    %13 = tpu.reciprocal %12 : vector<256x16xf32> -> vector<256x16xf32>
    %14 = arith.mulf %7, %13 : vector<256x16xf32>
    %cst_8 = arith.constant 0.000000e+00 : f32
    %15 = vector.broadcast %cst_8 : f32 to vector<18x18x16xf32>
    %c0_9 = arith.constant 0 : index
    %c0_10 = arith.constant 0 : index
    %c0_11 = arith.constant 0 : index
    %16 = vector.load %arg7[%c0_9, %c0_10, %c0_11] : memref<18x18x16xf32, #tpu.memory_space<vmem>>, vector<18x18x16xf32>
    tpu.vector_store %arg7[%c0_9, %c0_10, %c0_11], %15 {strides = array<i32>} : memref<18x18x16xf32, #tpu.memory_space<vmem>>, vector<18x18x16xf32>,
    %17 = vector.shape_cast %14 : vector<256x16xf32> to vector<16x16x16xf32>
    %c1 = arith.constant 1 : index
    %c1_12 = arith.constant 1 : index
    %c0_13 = arith.constant 0 : index
    %18 = vector.load %arg7[%c1, %c1_12, %c0_13] : memref<18x18x16xf32, #tpu.memory_space<vmem>>, vector<16x16x16xf32>
    tpu.vector_store %arg7[%c1, %c1_12, %c0_13], %17 {strides = array<i32>} : memref<18x18x16xf32, #tpu.memory_space<vmem>>, vector<16x16x16xf32>,
    %c0_14 = arith.constant 0 : index
    %c0_15 = arith.constant 0 : index
    %c0_16 = arith.constant 0 : index
    %19 = vector.load %arg7[%c0_14, %c0_15, %c0_16] : memref<18x18x16xf32, #tpu.memory_space<vmem>>, vector<16x16x16xf32>
    %c0_17 = arith.constant 0 : index
    %c0_18 = arith.constant 0 : index
    %c0_19 = arith.constant 0 : index
    %20 = vector.load %arg8[%c0_17, %c0_18, %c0_19] : memref<16x16x144xf32, #tpu.memory_space<vmem>>, vector<16x16x16xf32>
    tpu.vector_store %arg8[%c0_17, %c0_18, %c0_19], %19 {strides = array<i32>} : memref<16x16x144xf32, #tpu.memory_space<vmem>>, vector<16x16x16xf32>,
    %c0_20 = arith.constant 0 : index
    %c1_21 = arith.constant 1 : index
    %c0_22 = arith.constant 0 : index
    %21 = vector.load %arg7[%c0_20, %c1_21, %c0_22] : memref<18x18x16xf32, #tpu.memory_space<vmem>>, vector<16x16x16xf32>
    %c0_23 = arith.constant 0 : index
    %c0_24 = arith.constant 0 : index
    %c16 = arith.constant 16 : index
    %22 = vector.load %arg8[%c0_23, %c0_24, %c16] : memref<16x16x144xf32, #tpu.memory_space<vmem>>, vector<16x16x16xf32>
    tpu.vector_store %arg8[%c0_23, %c0_24, %c16], %21 {strides = array<i32>} : memref<16x16x144xf32, #tpu.memory_space<vmem>>, vector<16x16x16xf32>,
    %c0_25 = arith.constant 0 : index
    %c2 = arith.constant 2 : index
    %c0_26 = arith.constant 0 : index
    %23 = vector.load %arg7[%c0_25, %c2, %c0_26] : memref<18x18x16xf32, #tpu.memory_space<vmem>>, vector<16x16x16xf32>
    %c0_27 = arith.constant 0 : index
    %c0_28 = arith.constant 0 : index
    %c32 = arith.constant 32 : index
    %24 = vector.load %arg8[%c0_27, %c0_28, %c32] : memref<16x16x144xf32, #tpu.memory_space<vmem>>, vector<16x16x16xf32>
    tpu.vector_store %arg8[%c0_27, %c0_28, %c32], %23 {strides = array<i32>} : memref<16x16x144xf32, #tpu.memory_space<vmem>>, vector<16x16x16xf32>,
    %c1_29 = arith.constant 1 : index
    %c0_30 = arith.constant 0 : index
    %c0_31 = arith.constant 0 : index
    %25 = vector.load %arg7[%c1_29, %c0_30, %c0_31] : memref<18x18x16xf32, #tpu.memory_space<vmem>>, vector<16x16x16xf32>
    %c0_32 = arith.constant 0 : index
    %c0_33 = arith.constant 0 : index
    %c48 = arith.constant 48 : index
    %26 = vector.load %arg8[%c0_32, %c0_33, %c48] : memref<16x16x144xf32, #tpu.memory_space<vmem>>, vector<16x16x16xf32>
    tpu.vector_store %arg8[%c0_32, %c0_33, %c48], %25 {strides = array<i32>} : memref<16x16x144xf32, #tpu.memory_space<vmem>>, vector<16x16x16xf32>,
    %c1_34 = arith.constant 1 : index
    %c1_35 = arith.constant 1 : index
    %c0_36 = arith.constant 0 : index
    %27 = vector.load %arg7[%c1_34, %c1_35, %c0_36] : memref<18x18x16xf32, #tpu.memory_space<vmem>>, vector<16x16x16xf32>
    %c0_37 = arith.constant 0 : index
    %c0_38 = arith.constant 0 : index
    %c64 = arith.constant 64 : index
    %28 = vector.load %arg8[%c0_37, %c0_38, %c64] : memref<16x16x144xf32, #tpu.memory_space<vmem>>, vector<16x16x16xf32>
    tpu.vector_store %arg8[%c0_37, %c0_38, %c64], %27 {strides = array<i32>} : memref<16x16x144xf32, #tpu.memory_space<vmem>>, vector<16x16x16xf32>,
    %c1_39 = arith.constant 1 : index
    %c2_40 = arith.constant 2 : index
    %c0_41 = arith.constant 0 : index
    %29 = vector.load %arg7[%c1_39, %c2_40, %c0_41] : memref<18x18x16xf32, #tpu.memory_space<vmem>>, vector<16x16x16xf32>
    %c0_42 = arith.constant 0 : index
    %c0_43 = arith.constant 0 : index
    %c80 = arith.constant 80 : index
    %30 = vector.load %arg8[%c0_42, %c0_43, %c80] : memref<16x16x144xf32, #tpu.memory_space<vmem>>, vector<16x16x16xf32>
    tpu.vector_store %arg8[%c0_42, %c0_43, %c80], %29 {strides = array<i32>} : memref<16x16x144xf32, #tpu.memory_space<vmem>>, vector<16x16x16xf32>,
    %c2_44 = arith.constant 2 : index
    %c0_45 = arith.constant 0 : index
    %c0_46 = arith.constant 0 : index
    %31 = vector.load %arg7[%c2_44, %c0_45, %c0_46] : memref<18x18x16xf32, #tpu.memory_space<vmem>>, vector<16x16x16xf32>
    %c0_47 = arith.constant 0 : index
    %c0_48 = arith.constant 0 : index
    %c96 = arith.constant 96 : index
    %32 = vector.load %arg8[%c0_47, %c0_48, %c96] : memref<16x16x144xf32, #tpu.memory_space<vmem>>, vector<16x16x16xf32>
    tpu.vector_store %arg8[%c0_47, %c0_48, %c96], %31 {strides = array<i32>} : memref<16x16x144xf32, #tpu.memory_space<vmem>>, vector<16x16x16xf32>,
    %c2_49 = arith.constant 2 : index
    %c1_50 = arith.constant 1 : index
    %c0_51 = arith.constant 0 : index
    %33 = vector.load %arg7[%c2_49, %c1_50, %c0_51] : memref<18x18x16xf32, #tpu.memory_space<vmem>>, vector<16x16x16xf32>
    %c0_52 = arith.constant 0 : index
    %c0_53 = arith.constant 0 : index
    %c112 = arith.constant 112 : index
    %34 = vector.load %arg8[%c0_52, %c0_53, %c112] : memref<16x16x144xf32, #tpu.memory_space<vmem>>, vector<16x16x16xf32>
    tpu.vector_store %arg8[%c0_52, %c0_53, %c112], %33 {strides = array<i32>} : memref<16x16x144xf32, #tpu.memory_space<vmem>>, vector<16x16x16xf32>,
    %c2_54 = arith.constant 2 : index
    %c2_55 = arith.constant 2 : index
    %c0_56 = arith.constant 0 : index
    %35 = vector.load %arg7[%c2_54, %c2_55, %c0_56] : memref<18x18x16xf32, #tpu.memory_space<vmem>>, vector<16x16x16xf32>
    %c0_57 = arith.constant 0 : index
    %c0_58 = arith.constant 0 : index
    %c128 = arith.constant 128 : index
    %36 = vector.load %arg8[%c0_57, %c0_58, %c128] : memref<16x16x144xf32, #tpu.memory_space<vmem>>, vector<16x16x16xf32>
    tpu.vector_store %arg8[%c0_57, %c0_58, %c128], %35 {strides = array<i32>} : memref<16x16x144xf32, #tpu.memory_space<vmem>>, vector<16x16x16xf32>,
    %c0_59 = arith.constant 0 : index
    %c0_60 = arith.constant 0 : index
    %c0_61 = arith.constant 0 : index
    %37 = vector.load %arg8[%c0_59, %c0_60, %c0_61] : memref<16x16x144xf32, #tpu.memory_space<vmem>>, vector<16x16x144xf32>
    %38 = vector.shape_cast %37 : vector<16x16x144xf32> to vector<256x144xf32>
    %39 = arith.truncf %38 : vector<256x144xf32> to vector<256x144xbf16>
    %c0_62 = arith.constant 0 : index
    %c0_63 = arith.constant 0 : index
    %40 = vector.load %arg4[%c0_62, %c0_63] : memref<144x32xbf16, #tpu.memory_space<vmem>>, vector<144x32xbf16>
    %cst_64 = arith.constant dense<0.000000e+00> : vector<256x32xf32>
    %41 = tpu.matmul %39, %40, %cst_64 {dimension_numbers = #tpu.dot_dimension_numbers<[1], [0], [0], [1], [0, 0, 1, 1], [], []>} : vector<256x144xbf16>, vector<144x32xbf16>, vector<256x32xf32> -> vector<256x32xf32>
    %c0_65 = arith.constant 0 : index
    %c0_66 = arith.constant 0 : index
    %42 = vector.load %arg5[%c0_65, %c0_66] : memref<1x32xf32, #tpu.memory_space<vmem>>, vector<1x32xf32>
    %43 = vector.broadcast %42 : vector<1x32xf32> to vector<256x32xf32>
    %44 = arith.addf %41, %43 : vector<256x32xf32>
    %cst_67 = arith.constant 0.000000e+00 : f32
    %45 = vector.broadcast %cst_67 : f32 to vector<256x32xf32>
    %46 = arith.subf %45, %44 : vector<256x32xf32>
    %47 = math.exp %46 : vector<256x32xf32>
    %cst_68 = arith.constant 1.000000e+00 : f32
    %48 = vector.broadcast %cst_68 : f32 to vector<256x32xf32>
    %49 = arith.addf %48, %47 : vector<256x32xf32>
    %50 = tpu.reciprocal %49 : vector<256x32xf32> -> vector<256x32xf32>
    %51 = arith.mulf %44, %50 : vector<256x32xf32>
    %52 = arith.addf %51, %1 : vector<256x32xf32>
    %c0_69 = arith.constant 0 : index
    %c0_70 = arith.constant 0 : index
    %c0_71 = arith.constant 0 : index
    %53 = vector.load %arg6[%c0_69, %c0_70, %c0_71] : memref<1x256x32xf32, #tpu.memory_space<vmem>>, vector<1x256x32xf32>
    %54 = vector.shape_cast %53 : vector<1x256x32xf32> to vector<256x32xf32>
    %55 = vector.shape_cast %52 : vector<256x32xf32> to vector<1x256x32xf32>
    tpu.vector_store %arg6[%c0_69, %c0_70, %c0_71], %55 {strides = array<i32>} : memref<1x256x32xf32, #tpu.memory_space<vmem>>, vector<1x256x32xf32>,
    return
  }
  func.func @transform_0(%arg0: i32) -> (i32, i32, i32) {
    %c0_i32 = arith.constant 0 : i32
    %c0_i32_0 = arith.constant 0 : i32
    %c0_i32_1 = arith.constant 0 : i32
    return %arg0, %c0_i32, %c0_i32_0 : i32, i32, i32
  }
  func.func @transform_1(%arg0: i32) -> (i32, i32) {
    %c0_i32 = arith.constant 0 : i32
    %c0_i32_0 = arith.constant 0 : i32
    %c0_i32_1 = arith.constant 0 : i32
    return %c0_i32, %c0_i32_0 : i32, i32
  }
  func.func @transform_2(%arg0: i32) -> (i32, i32) {
    %c0_i32 = arith.constant 0 : i32
    %c0_i32_0 = arith.constant 0 : i32
    %c0_i32_1 = arith.constant 0 : i32
    return %c0_i32, %c0_i32_0 : i32, i32
  }
  func.func @transform_3(%arg0: i32) -> (i32, i32) {
    %c0_i32 = arith.constant 0 : i32
    %c0_i32_0 = arith.constant 0 : i32
    %c0_i32_1 = arith.constant 0 : i32
    return %c0_i32, %c0_i32_0 : i32, i32
  }
  func.func @transform_4(%arg0: i32) -> (i32, i32) {
    %c0_i32 = arith.constant 0 : i32
    %c0_i32_0 = arith.constant 0 : i32
    %c0_i32_1 = arith.constant 0 : i32
    return %c0_i32, %c0_i32_0 : i32, i32
  }
  func.func @transform_5(%arg0: i32) -> (i32, i32, i32) {
    %c0_i32 = arith.constant 0 : i32
    %c0_i32_0 = arith.constant 0 : i32
    %c0_i32_1 = arith.constant 0 : i32
    return %arg0, %c0_i32, %c0_i32_0 : i32, i32, i32
  }
}

</mosaic_0001>

<bundles_post_ra>
// kernel: tpu_custom_call.1
= control target key start
LH: loop header
LB: loop body
LE: loop exit
PB: predicated region body
PF: predicated region fallthrough
CT: control target
= control target key end

     0   :  { %s3458_s18 = smov 0   ;;  %s4960_s0 = inlined_call_operand.vmem [shape: f32[2,256,32], index: 0, kind: input, shape index: {}]   ;;  %s4961_s1 = inlined_call_operand.vmem [shape: bf16[32,16], index: 1, kind: input, shape index: {}]   ;;  %s4962_s2 = inlined_call_operand.vmem [shape: f32[1,16], index: 2, kind: input, shape index: {}]   ;;  %s4963_s3 = inlined_call_operand.vmem [shape: bf16[144,32], index: 3, kind: input, shape index: {}]   ;;  %s4964_s4 = inlined_call_operand.vmem [shape: f32[1,32], index: 4, kind: input, shape index: {}]   ;;  %s4965_s5 = inlined_call_operand.vmem [shape: f32[2,256,32], index: 5, kind: output, shape index: {}]  }
   0x1 LB: > { %s2963_s19 = sadd.s32 4294967295, %s3417_s18   ;;  %p2967_p0 = scmp.ge.s32.totalorder %s3417_s18, 1  ;;  %s3417_s18 = sphi %s3458_s18, %s15_s18  }
   0x2   : > { %p187_p1 = scmp.lt.s32.totalorder %s3417_s18, 3 }
   0x4   : > { %p188_p2 = pnand %p2967_p0, %p187_p1 }
   0x5   : > { %v3110_v0 = vld [vmem:[%s4961_s1] sm:$0xff] (!%p188_p2)   ;;  %p215_p3 = scmp.lt.s32.totalorder (!%p188_p2), %s2963_s19, 1  ;;  %v3111_v1 = vld [vmem:[%s4961_s1 + $0x8] sm:$0xff] (!%p188_p2)   ;;  %vm297_vm0 = vcmask (!%p188_p2), 261120   ;;  %vm699_vm1 = vcmask (!%p188_p2), 130048   ;;  %v3419_v38 = vmov (!%p188_p2), 0.0  }
   0x6   : > { %191 = sbr.rel (%p188_p2) target bundleno = 1087 (0x43f), region = 40  ;;  %3039 = vmatprep.subr.bf16.mxu0 (!%p188_p2), %v3110_v0  ;;  %707 = vst.msk [vmem:[#allocation2 + $0x30] sm:$0xff] (!%p188_p2), %vm699_vm1, %v3419_v38  ;;  %708 = vst.msk [vmem:[#allocation2 + $0x38] sm:$0xff] (!%p188_p2), %vm699_vm1, %v3419_v38  ;;  %vm702_vm2 = vcmask (!%p188_p2), 123904   ;;  %s3420_s28 = smov (!%p188_p2), 16   ;;  %vm1012_vm3 = vcmask (!%p188_p2), 261248  }
   0x7   : > { %3040 = vmatpush3.bf16.msra.mxu0 (!%p188_p2), %v3110_v0  ;;  %700 = vst.msk [vmem:[#allocation2] sm:$0xff] (!%p188_p2), %vm699_vm1, %v3419_v38  ;;  %701 = vst.msk [vmem:[#allocation2 + $0x8] sm:$0xff] (!%p188_p2), %vm699_vm1, %v3419_v38  ;;  %s3421_s29 = smov (!%p188_p2), 32   ;;  %v3591_v55 = vld [vmem:[%s4962_s2] ss:$0 sm:$0xff] (!%p188_p2)  ;;  %vm1205_vm4 = vcmask (!%p188_p2), 392448  }
   0x8   : > { %3041 = vmatprep.subr.bf16.mxu0 (!%p188_p2), %v3111_v1  ;;  %704 = vst.msk [vmem:[#allocation2 + $0x18] sm:$0xff] (!%p188_p2), %vm699_vm1, %v3419_v38  ;;  %705 = vst.msk [vmem:[#allocation2 + $0x20] sm:$0xff] (!%p188_p2), %vm699_vm1, %v3419_v38  ;;  %s3422_s7 = smov (!%p188_p2), 96   ;;  %s3423_s8 = smov (!%p188_p2), 112   ;;  %vm1398_vm5 = vcmask (!%p188_p2), 523648   ;;  %vm1591_vm6 = vcmask (!%p188_p2), 654848  }
   0x9   : > { %710 = vst.msk [vmem:[#allocation2 + $0x48] sm:$0xff] (!%p188_p2), %vm699_vm1, %v3419_v38  ;;  %711 = vst.msk [vmem:[#allocation2 + $0x50] sm:$0xff] (!%p188_p2), %vm699_vm1, %v3419_v38  ;;  %s3425_s11 = smov (!%p188_p2), 48   ;;  %s3426_s14 = smov (!%p188_p2), 64   ;;  %vm1784_vm7 = vcmask (!%p188_p2), 786048   ;;  %vm1978_vm8 = vcmask (!%p188_p2), 917248  }
   0xa   : > { %713 = vst.msk [vmem:[#allocation2 + $0x60] sm:$0xff] (!%p188_p2), %vm699_vm1, %v3419_v38  ;;  %714 = vst.msk [vmem:[#allocation2 + $0x68] sm:$0xff] (!%p188_p2), %vm699_vm1, %v3419_v38  ;;  %s3427_s23 = smov (!%p188_p2), 80   ;;  %vm2171_vm9 = vcmask (!%p188_p2), 1048448  }
   0xb   : > { %3042 = vmatpush3.bf16.msra.mxu0 (!%p188_p2), %v3111_v1  ;;  %716 = vst.msk [vmem:[#allocation2 + $0x78] sm:$0xff] (!%p188_p2), %vm699_vm1, %v3419_v38  ;;  %717 = vst.msk [vmem:[#allocation2 + $0x80] sm:$0xff] (!%p188_p2), %vm699_vm1, %v3419_v38 }
   0xc   : > { %719 = vst.msk [vmem:[#allocation2 + $0x90] sm:$0xff] (!%p188_p2), %vm699_vm1, %v3419_v38  ;;  %720 = vst.msk [vmem:[#allocation2 + $0x98] sm:$0xff] (!%p188_p2), %vm699_vm1, %v3419_v38 }
   0xd   : > { %s4967_s19 = smov (!%p215_p3, %s2963_s19), 1  ;;  %722 = vst.msk [vmem:[#allocation2 + $0xa8] sm:$0xff] %vm699_vm1, %v3419_v38  ;;  %723 = vst.msk [vmem:[#allocation2 + $0xb0] sm:$0xff] %vm699_vm1, %v3419_v38 }
   0xe   : > { %s3019_s24 = sshll.u32 %s4967_s19, 8  ;;  %725 = vst.msk [vmem:[#allocation2 + $0xc0] sm:$0xff] %vm699_vm1, %v3419_v38  ;;  %726 = vst.msk [vmem:[#allocation2 + $0xc8] sm:$0xff] %vm699_vm1, %v3419_v38  ;;  %v852_v45 = vld [vmem:[#allocation2 + $0x1] sm:$0xff] }
   0xf   : > { %s3480_s27 = scalar_lea.vmem %s4960_s0, %s3019_s24  ;;  %728 = vst.msk [vmem:[#allocation2 + $0xd8] sm:$0xff] %vm699_vm1, %v3419_v38  ;;  %729 = vst.msk [vmem:[#allocation2 + $0xe0] sm:$0xff] %vm699_vm1, %v3419_v38  ;;  %916 = vrot.lane.b32.xlu0 %v852_v45, %s3420_s28  ;;  %v1045_v47 = vld [vmem:[#allocation2 + $0x2] sm:$0xff] }
  0x10   : > { %v226_v2 = vld [vmem:[%s3480_s27] sm:$0xff]  ;;  %v227_v3 = vld [vmem:[%s3480_s27 + $0x8] sm:$0xff]  ;;  %v228_v4 = vld [vmem:[%s3480_s27 + $0x10] sm:$0xff]  ;;  %731 = vst.msk [vmem:[#allocation2 + $0xf0] sm:$0xff] %vm699_vm1, %v3419_v38 }
  0x11   : > { %v258_v5 = vpack.c.bf16 %v227_v3, %v226_v2  ;;  %v229_v6 = vld [vmem:[%s3480_s27 + $0x18] sm:$0xff]  ;;  %v230_v7 = vld [vmem:[%s3480_s27 + $0x20] sm:$0xff]  ;;  %v231_v8 = vld [vmem:[%s3480_s27 + $0x28] sm:$0xff]  ;;  %732 = vst.msk [vmem:[#allocation2 + $0xf8] sm:$0xff] %vm699_vm1, %v3419_v38 }
  0x12   : > { %v259_v9 = vpack.c.bf16 %v229_v6, %v228_v4  ;;  %v260_v10 = vpack.c.bf16 %v231_v8, %v230_v7  ;;  %v232_v11 = vld [vmem:[%s3480_s27 + $0x30] sm:$0xff]  ;;  %v233_v12 = vld [vmem:[%s3480_s27 + $0x38] sm:$0xff]  ;;  %v234_v13 = vld [vmem:[%s3480_s27 + $0x40] sm:$0xff]  ;;  %734 = vst.msk [vmem:[#allocation2 + $0x108] sm:$0xff] %vm699_vm1, %v3419_v38 }
  0x13   : > { %3043 = vmatprep.mubr.msk.bf16.mxu0 %vm297_vm0, %v258_v5  ;;  %v235_v14 = vld [vmem:[%s3480_s27 + $0x48] sm:$0xff]  ;;  %v261_v15 = vpack.c.bf16 %v233_v12, %v232_v11  ;;  %v236_v17 = vld [vmem:[%s3480_s27 + $0x50] sm:$0xff]  ;;  %v237_v18 = vld [vmem:[%s3480_s27 + $0x58] sm:$0xff]  ;;  %735 = vst.msk [vmem:[#allocation2 + $0x110] sm:$0xff] %vm699_vm1, %v3419_v38 }
  0x14   : > { %3044 = vmatmul.mubr.msk.bf16.vlgmr.msra.gmra.mrb[0].mxu0 %vm297_vm0, %v259_v9  ;;  %v262_v16 = vpack.c.bf16 %v235_v14, %v234_v13  ;;  %v238_v19 = vld [vmem:[%s3480_s27 + $0x60] sm:$0xff]  ;;  %v239_v20 = vld [vmem:[%s3480_s27 + $0x68] sm:$0xff]  ;;  %v263_v21 = vpack.c.bf16 %v237_v18, %v236_v17  ;;  %v240_v23 = vld [vmem:[%s3480_s27 + $0x70] sm:$0xff]  ;;  %737 = vst.msk [vmem:[#allocation2 + $0x120] sm:$0xff] %vm699_vm1, %v3419_v38 }
  0x15   : > { %3047 = vmatprep.mubr.msk.bf16.mxu0 %vm297_vm0, %v260_v10  ;;  %v264_v22 = vpack.c.bf16 %v239_v20, %v238_v19  ;;  %v241_v24 = vld [vmem:[%s3480_s27 + $0x78] sm:$0xff]  ;;  %v242_v25 = vld [vmem:[%s3480_s27 + $0x80] sm:$0xff]  ;;  %v243_v26 = vld [vmem:[%s3480_s27 + $0x88] sm:$0xff]  ;;  %738 = vst.msk [vmem:[#allocation2 + $0x128] sm:$0xff] %vm699_vm1, %v3419_v38 }
  0x16   : > { %v265_v27 = vpack.c.bf16 %v241_v24, %v240_v23  ;;  %v266_v28 = vpack.c.bf16 %v243_v26, %v242_v25  ;;  %v244_v29 = vld [vmem:[%s3480_s27 + $0x90] sm:$0xff]  ;;  %v245_v30 = vld [vmem:[%s3480_s27 + $0x98] sm:$0xff]  ;;  %v246_v31 = vld [vmem:[%s3480_s27 + $0xa0] sm:$0xff]  ;;  %740 = vst.msk [vmem:[#allocation2 + $0x138] sm:$0xff] %vm699_vm1, %v3419_v38 }
  0x17   : > { %v247_v32 = vld [vmem:[%s3480_s27 + $0xa8] sm:$0xff]  ;;  %v267_v33 = vpack.c.bf16 %v245_v30, %v244_v29  ;;  %v248_v35 = vld [vmem:[%s3480_s27 + $0xb0] sm:$0xff]  ;;  %v249_v36 = vld [vmem:[%s3480_s27 + $0xb8] sm:$0xff]  ;;  %741 = vst.msk [vmem:[#allocation2 + $0x140] sm:$0xff] %vm699_vm1, %v3419_v38 }
  0x18   : > { %v268_v34 = vpack.c.bf16 %v247_v32, %v246_v31  ;;  %v269_v37 = vpack.c.bf16 %v249_v36, %v248_v35  ;;  %743 = vst.msk [vmem:[#allocation2 + $0x150] sm:$0xff] %vm699_vm1, %v3419_v38  ;;  %744 = vst.msk [vmem:[#allocation2 + $0x158] sm:$0xff] %vm699_vm1, %v3419_v38  ;;  %v250_v39 = vld [vmem:[%s3480_s27 + $0xc0] sm:$0xff]  ;;  %v251_v40 = vld [vmem:[%s3480_s27 + $0xc8] sm:$0xff] }
  0x19   : > { %746 = vst.msk [vmem:[#allocation2 + $0x168] sm:$0xff] %vm699_vm1, %v3419_v38  ;;  %747 = vst.msk [vmem:[#allocation2 + $0x170] sm:$0xff] %vm699_vm1, %v3419_v38  ;;  %v270_v41 = vpack.c.bf16 %v251_v40, %v250_v39  ;;  %v252_v42 = vld [vmem:[%s3480_s27 + $0xd0] sm:$0xff]  ;;  %v253_v43 = vld [vmem:[%s3480_s27 + $0xd8] sm:$0xff] }
  0x1a   : > { %749 = vst.msk [vmem:[#allocation2 + $0x180] sm:$0xff] %vm699_vm1, %v3419_v38  ;;  %750 = vst.msk [vmem:[#allocation2 + $0x188] sm:$0xff] %vm699_vm1, %v3419_v38  ;;  %v271_v44 = vpack.c.bf16 %v253_v43, %v252_v42  ;;  %v254_v49 = vld [vmem:[%s3480_s27 + $0xe0] sm:$0xff]  ;;  %v255_v50 = vld [vmem:[%s3480_s27 + $0xe8] sm:$0xff] }
  0x1b   : > { %752 = vst.msk [vmem:[#allocation2 + $0x198] sm:$0xff] %vm699_vm1, %v3419_v38  ;;  %753 = vst.msk [vmem:[#allocation2 + $0x1a0] sm:$0xff] %vm699_vm1, %v3419_v38  ;;  %v272_v51 = vpack.c.bf16 %v255_v50, %v254_v49  ;;  %v256_v52 = vld [vmem:[%s3480_s27 + $0xf0] sm:$0xff]  ;;  %v257_v53 = vld [vmem:[%s3480_s27 + $0xf8] sm:$0xff] }
  0x1c   : > { %3048 = vmatmul.mubr.msk.bf16.gmra.mrb[4].mxu0 %vm297_vm0, %v261_v15  ;;  %709 = vst.msk [vmem:[#allocation2 + $0x40] sm:$0x3] %vm702_vm2, %v3419_v38  ;;  %703 = vst.msk [vmem:[#allocation2 + $0x10] sm:$0x3] %vm702_vm2, %v3419_v38  ;;  %v273_v54 = vpack.c.bf16 %v257_v53, %v256_v52 }
  0x1d   : > { %3051 = vmatprep.mubr.msk.bf16.mxu0 %vm297_vm0, %v262_v16  ;;  %706 = vst.msk [vmem:[#allocation2 + $0x28] sm:$0x3] %vm702_vm2, %v3419_v38  ;;  %712 = vst.msk [vmem:[#allocation2 + $0x58] sm:$0x3] %vm702_vm2, %v3419_v38 }
  0x1e   : > { %715 = vst.msk [vmem:[#allocation2 + $0x70] sm:$0x3] %vm702_vm2, %v3419_v38  ;;  %718 = vst.msk [vmem:[#allocation2 + $0x88] sm:$0x3] %vm702_vm2, %v3419_v38 }
  0x1f   : > { %721 = vst.msk [vmem:[#allocation2 + $0xa0] sm:$0x3] %vm702_vm2, %v3419_v38  ;;  %724 = vst.msk [vmem:[#allocation2 + $0xb8] sm:$0x3] %vm702_vm2, %v3419_v38 }
  0x20   : > { %727 = vst.msk [vmem:[#allocation2 + $0xd0] sm:$0x3] %vm702_vm2, %v3419_v38  ;;  %730 = vst.msk [vmem:[#allocation2 + $0xe8] sm:$0x3] %vm702_vm2, %v3419_v38 }
  0x21   : > { %733 = vst.msk [vmem:[#allocation2 + $0x100] sm:$0x3] %vm702_vm2, %v3419_v38  ;;  %736 = vst.msk [vmem:[#allocation2 + $0x118] sm:$0x3] %vm702_vm2, %v3419_v38 }
  0x22   : > { %739 = vst.msk [vmem:[#allocation2 + $0x130] sm:$0x3] %vm702_vm2, %v3419_v38  ;;  %742 = vst.msk [vmem:[#allocation2 + $0x148] sm:$0x3] %vm702_vm2, %v3419_v38 }
  0x23   : > { %745 = vst.msk [vmem:[#allocation2 + $0x160] sm:$0x3] %vm702_vm2, %v3419_v38  ;;  %748 = vst.msk [vmem:[#allocation2 + $0x178] sm:$0x3] %vm702_vm2, %v3419_v38  ;;  %v853_v46 = vld [vmem:[#allocation2 + $0x9] sm:$0xff] }
  0x24   : > { %3052 = vmatmul.mubr.msk.bf16.gmra.mrb[8].mxu0 %vm297_vm0, %v263_v21  ;;  %751 = vst.msk [vmem:[#allocation2 + $0x190] sm:$0x3] %vm702_vm2, %v3419_v38  ;;  %754 = vst.msk [vmem:[#allocation2 + $0x1a8] sm:$0x3] %vm702_vm2, %v3419_v38  ;;  %918 = vrot.lane.b32.xlu0 %v853_v46, %s3420_s28  ;;  %v1046_v48 = vld [vmem:[#allocation2 + $0xa] sm:$0xff] }
  0x25   : > { %3055 = vmatprep.mubr.msk.bf16.mxu0 %vm297_vm0, %v264_v22  ;;  %1111 = vrot.lane.b32.xlu1 %v1046_v48, %s3421_s29  ;;  %v788_v22 = vld [vmem:[#allocation2] sm:$0xff] }
  0x26   : > { %820 = vst.msk [vmem:[#allocation3] sm:$0xff] %vm699_vm1, %v788_v22 }
  0x28   : > { %1109 = vrot.lane.b32.xlu0 %v1045_v47, %s3421_s29 }
  0x2c   : > { %3056 = vmatmul.mubr.msk.bf16.gmra.mrb[12].mxu0 %vm297_vm0, %v265_v27 }
  0x2d   : > { %3059 = vmatprep.mubr.msk.bf16.mxu0 %vm297_vm0, %v266_v28 }
  0x34   : > { %3060 = vmatmul.mubr.msk.bf16.gmra.mrb[16].mxu0 %vm297_vm0, %v267_v33 }
  0x35   : > { %3063 = vmatprep.mubr.msk.bf16.mxu0 %vm297_vm0, %v268_v34  ;;  %v789_v34 = vld [vmem:[#allocation2 + $0x8] sm:$0xff] }
  0x36   : > { %821 = vst.msk [vmem:[#allocation3 + $0x10] sm:$0xff] %vm699_vm1, %v789_v34 }
  0x3c   : > { %3064 = vmatmul.mubr.msk.bf16.gmra.mrb[20].mxu0 %vm297_vm0, %v269_v37 }
  0x3d   : > { %3067 = vmatprep.mubr.msk.bf16.mxu0 %vm297_vm0, %v270_v41 }
  0x44   : > { %3068 = vmatmul.mubr.msk.bf16.gmra.mrb[24].mxu0 %vm297_vm0, %v271_v44 }
  0x45   : > { %3071 = vmatprep.mubr.msk.bf16.mxu0 %vm297_vm0, %v272_v51 }
  0x4c   : > { %3072 = vmatmul.mubr.msk.bf16.gmra.mrb[28].mxu0 %vm297_vm0, %v273_v54 }
  0x81   : > { %v917_v24 = vpop.permute.xlu0 %916 }
  0x82   : > { %1013 = vst.msk [vmem:[#allocation3] sm:$0xff] %vm1012_vm3, %v917_v24 }
  0x96   : > { %v919_v40 = vpop.permute.xlu0 %918 }
  0x97   : > { %1014 = vst.msk [vmem:[#allocation3 + $0x10] sm:$0xff] %vm1012_vm3, %v919_v40  ;;  %v1112_v54 = vpop.permute.xlu1 %1111 }
  0x98   : > { %1207 = vst.msk [vmem:[#allocation3 + $0x10] sm:$0xff] %vm1205_vm4, %v1112_v54 }
  0x9a   : > { %v1110_v51 = vpop.permute.xlu0 %1109 }
  0x9b   : > { %1206 = vst.msk [vmem:[#allocation3] sm:$0xff] %vm1205_vm4, %v1110_v51 }
  0xe7   : > { %v3045_v56 = vpop.f32.mrb[0].mxu0 }
  0xe8   : > { %v3594_v57 = vadd.f32 %v3045_v56, %v3591_v55  ;;  %v380_v58 = vpop.f32.mrb[1].mxu0 }
  0xe9   : > { %v3597_v59 = vadd.f32 %v3591_v55, %v380_v58  ;;  %v3046_v60 = vpop.f32.mrb[2].mxu0 }
  0xea   : > { %v509_v61 = vsub.f32 0.0, %v3594_v57  ;;  %v3601_v62 = vadd.f32 %v3046_v60, %v3591_v55  ;;  %v383_v63 = vpop.f32.mrb[3].mxu0 }
  0xeb   : > { %v507_v0 = vsub.f32 0.0, %v3597_v59  ;;  %v3605_v1 = vadd.f32 %v3591_v55, %v383_v63 }
  0xec   : > { %v543_v2 = vmul.f32 1.442695, %v509_v61  ;;  %v510_v3 = vsub.f32 0.0, %v3601_v62 }
  0xed   : > { %v539_v4 = vmul.f32 1.442695, %v507_v0  ;;  %v508_v5 = vsub.f32 0.0, %v3605_v1 }
  0xee   : > { %3121 = vpow2.f32 %v543_v2  ;;  %v545_v6 = vmul.f32 1.442695, %v510_v3 }
  0xef   : > { %3123 = vpow2.f32 %v539_v4  ;;  %v541_v7 = vmul.f32 1.442695, %v508_v5  ;;  %v3049_v8 = vpop.f32.mrb[4].mxu0 }
  0xf0   : > { %3125 = vpow2.f32 %v545_v6  ;;  %v3610_v9 = vadd.f32 %v3049_v8, %v3591_v55  ;;  %v396_v10 = vpop.f32.mrb[5].mxu0 }
  0xf1   : > { %3127 = vpow2.f32 %v541_v7  ;;  %v3613_v11 = vadd.f32 %v3591_v55, %v396_v10  ;;  %v3050_v12 = vpop.f32.mrb[6].mxu0 }
  0xf2   : > { %v513_v13 = vsub.f32 0.0, %v3610_v9  ;;  %v3617_v14 = vadd.f32 %v3050_v12, %v3591_v55  ;;  %v399_v15 = vpop.f32.mrb[7].mxu0 }
  0xf3   : > { %v511_v16 = vsub.f32 0.0, %v3613_v11  ;;  %v3621_v17 = vadd.f32 %v3591_v55, %v399_v15 }
  0xf4   : > { %v551_v18 = vmul.f32 1.442695, %v513_v13  ;;  %v514_v19 = vsub.f32 0.0, %v3617_v14 }
  0xf5   : > { %v547_v20 = vmul.f32 1.442695, %v511_v16  ;;  %v512_v21 = vsub.f32 0.0, %v3621_v17 }
  0xf6   : > { %3129 = vpow2.f32 %v551_v18  ;;  %v553_v23 = vmul.f32 1.442695, %v514_v19 }
  0xf7   : > { %3131 = vpow2.f32 %v547_v20  ;;  %v549_v25 = vmul.f32 1.442695, %v512_v21  ;;  %v3053_v26 = vpop.f32.mrb[8].mxu0 }
  0xf8   : > { %v3122_v27 = vpop.eup %3121  ;;  %3133 = vpow2.f32 %v553_v23  ;;  %v3628_v28 = vadd.f32 %v3053_v26, %v3591_v55  ;;  %v412_v29 = vpop.f32.mrb[9].mxu0 }
  0xf9   : > { %v3124_v30 = vpop.eup %3123  ;;  %v605_v31 = vadd.f32 1.0, %v3122_v27  ;;  %3135 = vpow2.f32 %v549_v25  ;;  %v3631_v32 = vadd.f32 %v3591_v55, %v412_v29  ;;  %v3054_v33 = vpop.f32.mrb[10].mxu0 }
  0xfa   : > { %v3126_v35 = vpop.eup %3125  ;;  %v603_v36 = vadd.f32 1.0, %v3124_v30  ;;  %v517_v37 = vsub.f32 0.0, %v3628_v28  ;;  %v3635_v38 = vadd.f32 %v3054_v33, %v3591_v55  ;;  %v415_v39 = vpop.f32.mrb[11].mxu0 }
  0xfb   : > { %v3128_v41 = vpop.eup %3127  ;;  %3137 = vrcp.f32 %v605_v31  ;;  %v606_v42 = vadd.f32 1.0, %v3126_v35  ;;  %v515_v43 = vsub.f32 0.0, %v3631_v32  ;;  %v3640_v44 = vadd.f32 %v3591_v55, %v415_v39 }
  0xfc   : > { %3139 = vrcp.f32 %v603_v36  ;;  %v604_v45 = vadd.f32 1.0, %v3128_v41  ;;  %v559_v46 = vmul.f32 1.442695, %v517_v37  ;;  %v518_v47 = vsub.f32 0.0, %v3635_v38 }
  0xfd   : > { %3141 = vrcp.f32 %v606_v42  ;;  %v555_v48 = vmul.f32 1.442695, %v515_v43  ;;  %v516_v49 = vsub.f32 0.0, %v3640_v44 }
  0xfe   : > { %3143 = vrcp.f32 %v604_v45  ;;  %v561_v50 = vmul.f32 1.442695, %v518_v47 }
  0xff   : > { %3145 = vpow2.f32 %v559_v46  ;;  %v557_v52 = vmul.f32 1.442695, %v516_v49  ;;  %v3057_v53 = vpop.f32.mrb[12].mxu0 }
 0x100   : > { %v3130_v56 = vpop.eup %3129  ;;  %3147 = vpow2.f32 %v555_v48  ;;  %v3647_v58 = vadd.f32 %v3057_v53, %v3591_v55  ;;  %v428_v60 = vpop.f32.mrb[13].mxu0 }
 0x101   : > { %v3132_v61 = vpop.eup %3131  ;;  %v609_v63 = vadd.f32 1.0, %v3130_v56  ;;  %3149 = vpow2.f32 %v561_v50  ;;  %v3651_v0 = vadd.f32 %v3591_v55, %v428_v60  ;;  %v3058_v2 = vpop.f32.mrb[14].mxu0 }
 0x102   : > { %v3134_v3 = vpop.eup %3133  ;;  %v607_v4 = vadd.f32 1.0, %v3132_v61  ;;  %3151 = vpow2.f32 %v557_v52  ;;  %v521_v5 = vsub.f32 0.0, %v3647_v58  ;;  %v3655_v6 = vadd.f32 %v3058_v2, %v3591_v55  ;;  %v431_v7 = vpop.f32.mrb[15].mxu0 }
 0x103   : > { %v3136_v8 = vpop.eup %3135  ;;  %3153 = vrcp.f32 %v609_v63  ;;  %v610_v10 = vadd.f32 1.0, %v3134_v3  ;;  %v519_v12 = vsub.f32 0.0, %v3651_v0  ;;  %v3659_v13 = vadd.f32 %v3591_v55, %v431_v7 }
 0x104   : > { %3155 = vrcp.f32 %v607_v4  ;;  %v608_v15 = vadd.f32 1.0, %v3136_v8  ;;  %v567_v16 = vmul.f32 1.442695, %v521_v5  ;;  %v522_v18 = vsub.f32 0.0, %v3655_v6 }
 0x105   : > { %v3138_v19 = vpop.eup %3137  ;;  %3157 = vrcp.f32 %v610_v10  ;;  %v563_v20 = vmul.f32 1.442695, %v519_v12  ;;  %v520_v21 = vsub.f32 0.0, %v3659_v13 }
 0x106   : > { %v3140_v22 = vpop.eup %3139  ;;  %v669_v23 = vmul.f32 %v3138_v19, %v3594_v57  ;;  %3159 = vrcp.f32 %v608_v15  ;;  %v569_v24 = vmul.f32 1.442695, %v522_v18 }
 0x107   : > { %v3142_v25 = vpop.eup %3141  ;;  %v667_v26 = vmul.f32 %v3140_v22, %v3597_v59  ;;  %3161 = vpow2.f32 %v567_v16  ;;  %v565_v27 = vmul.f32 1.442695, %v520_v21  ;;  %v3061_v29 = vpop.f32.mrb[16].mxu0 }
 0x108   : > { %v3144_v30 = vpop.eup %3143  ;;  %758 = vst.msk [vmem:[#allocation2 + $0x31] sm:$0xff] %vm699_vm1, %v669_v23  ;;  %v670_v31 = vmul.f32 %v3142_v25, %v3601_v62  ;;  %3163 = vpow2.f32 %v563_v20  ;;  %v3668_v33 = vadd.f32 %v3061_v29, %v3591_v55  ;;  %v444_v34 = vpop.f32.mrb[17].mxu0 }
 0x109   : > { %v3146_v35 = vpop.eup %3145  ;;  %756 = vst.msk [vmem:[#allocation2 + $0x19] sm:$0xff] %vm699_vm1, %v667_v26  ;;  %v668_v57 = vmul.f32 %v3144_v30, %v3605_v1  ;;  %3165 = vpow2.f32 %v569_v24  ;;  %v3673_v59 = vadd.f32 %v3591_v55, %v444_v34  ;;  %v3062_v36 = vpop.f32.mrb[18].mxu0 }
 0x10a   : > { %v3148_v37 = vpop.eup %3147  ;;  %759 = vst.msk [vmem:[#allocation2 + $0x39] sm:$0xff] %vm699_vm1, %v670_v31  ;;  %v613_v39 = vadd.f32 1.0, %v3146_v35  ;;  %3167 = vpow2.f32 %v565_v27  ;;  %v525_v62 = vsub.f32 0.0, %v3668_v33  ;;  %v3678_v40 = vadd.f32 %v3062_v36, %v3591_v55  ;;  %v447_v41 = vpop.f32.mrb[19].mxu0 }
 0x10b   : > { %v3150_v42 = vpop.eup %3149  ;;  %757 = vst.msk [vmem:[#allocation2 + $0x21] sm:$0xff] %vm699_vm1, %v668_v57  ;;  %v611_v1 = vadd.f32 1.0, %v3148_v37  ;;  %v523_v43 = vsub.f32 0.0, %v3673_v59  ;;  %v3683_v45 = vadd.f32 %v3591_v55, %v447_v41  ;;  %v3424_v35 = vmov 0   ;;  %v3112_v57 = vld [vmem:[%s4963_s3] sm:$0xff]  }
 0x10c   : > { %v3152_v46 = vpop.eup %3151  ;;  %3169 = vrcp.f32 %v613_v39  ;;  %v614_v47 = vadd.f32 1.0, %v3150_v42  ;;  %v575_v48 = vmul.f32 1.442695, %v525_v62  ;;  %v526_v49 = vsub.f32 0.0, %v3678_v40  ;;  %2491 = vmatprep.subr.bf16.mxu0 %v3424_v35  ;;  %3075 = vmatprep.subr.bf16.mxu1 %v3424_v35 }
 0x10d   : > { %v3154_v50 = vpop.eup %3153  ;;  %3171 = vrcp.f32 %v611_v1  ;;  %v612_v51 = vadd.f32 1.0, %v3152_v46  ;;  %v571_v52 = vmul.f32 1.442695, %v523_v43  ;;  %v524_v53 = vsub.f32 0.0, %v3683_v45  ;;  %2492 = vmatpush1.bf16.msra.mxu0 %v3112_v57  ;;  %3084 = vmatpush1.bf16.msra.mxu1 %v3112_v57 }
 0x10e   : > { %v3156_v54 = vpop.eup %3155  ;;  %v673_v56 = vmul.f32 %v3154_v50, %v3610_v9  ;;  %3173 = vrcp.f32 %v614_v47  ;;  %v577_v60 = vmul.f32 1.442695, %v526_v49  ;;  %2493 = vmatprep.subr.bf16.mxu0 %v3424_v35  ;;  %3076 = vmatprep.subr.bf16.mxu1 %v3424_v35  ;;  %v3113_v50 = vld [vmem:[%s4963_s3 + $0x8] sm:$0xff]  }
 0x10f   : > { %v3158_v61 = vpop.eup %3157  ;;  %v671_v63 = vmul.f32 %v3156_v54, %v3613_v11  ;;  %v3689_v2 = vld [vmem:[#allocation2 + $0x31] sm:$0xff]  ;;  %3175 = vrcp.f32 %v612_v51  ;;  %v573_v4 = vmul.f32 1.442695, %v524_v53 }
 0x110   : > { %v3691_v3 = vld [vmem:[#allocation2 + $0x30] sm:$0xff]  ;;  %v3160_v5 = vpop.eup %3159  ;;  %762 = vst.msk [vmem:[#allocation2 + $0x61] sm:$0xff] %vm699_vm1, %v673_v56  ;;  %v674_v7 = vmul.f32 %v3158_v61, %v3617_v14  ;;  %924 = vrot.lane.b32.xlu0 %v3689_v2, %s3420_s28  ;;  %v3697_v9 = vld [vmem:[#allocation2 + $0x19] sm:$0xff]  ;;  %3177 = vpow2.f32 %v575_v48 }
 0x111   : > { %v3699_v8 = vld [vmem:[#allocation2 + $0x18] sm:$0xff]  ;;  %824 = vst.msk [vmem:[#allocation3 + $0x40] sm:$0xff] %vm699_vm1, %v3691_v3  ;;  %v3162_v11 = vpop.eup %3161  ;;  %760 = vst.msk [vmem:[#allocation2 + $0x49] sm:$0xff] %vm699_vm1, %v671_v63  ;;  %v672_v10 = vmul.f32 %v3160_v5, %v3621_v17  ;;  %920 = vrot.lane.b32.xlu1 %v3697_v9, %s3420_s28  ;;  %3179 = vpow2.f32 %v571_v52  ;;  %2494 = vmatpush1.bf16.msra.mxu0 %v3113_v50 }
 0x112   : > { %v3707_v14 = vld [vmem:[#allocation2 + $0x38] sm:$0xff]  ;;  %822 = vst.msk [vmem:[#allocation3 + $0x20] sm:$0xff] %vm699_vm1, %v3699_v8  ;;  %v3164_v15 = vpop.eup %3163  ;;  %763 = vst.msk [vmem:[#allocation2 + $0x69] sm:$0xff] %vm699_vm1, %v674_v7  ;;  %v617_v17 = vadd.f32 1.0, %v3162_v11  ;;  %3181 = vpow2.f32 %v577_v60  ;;  %v3723_v20 = vld [vmem:[#allocation2 + $0x20] sm:$0xff]  ;;  %v3065_v60 = vpop.f32.mrb[20].mxu0  ;;  %3085 = vmatpush1.bf16.msra.mxu1 %v3113_v50  ;;  %2495 = vmatprep.subr.bf16.mxu0 %v3424_v35 }
 0x113   : > { %v3709_v12 = vld [vmem:[#allocation2 + $0x32] sm:$0xff]  ;;  %v3714_v16 = vld [vmem:[#allocation2 + $0x3a] sm:$0xff]  ;;  %825 = vst.msk [vmem:[#allocation3 + $0x50] sm:$0xff] %vm699_vm1, %v3707_v14  ;;  %v3166_v18 = vpop.eup %3165  ;;  %761 = vst.msk [vmem:[#allocation2 + $0x51] sm:$0xff] %vm699_vm1, %v672_v10  ;;  %v615_v19 = vadd.f32 1.0, %v3164_v15  ;;  %3183 = vpow2.f32 %v573_v4  ;;  %3077 = vmatprep.subr.bf16.mxu1 %v3424_v35  ;;  %v460_v11 = vpop.f32.mrb[21].mxu0 }
 0x114   : > { %2236 = vst.msk [vmem:[#allocation3 + $0x8] sm:$0xff] %vm699_vm1, %v3709_v12  ;;  %2237 = vst.msk [vmem:[#allocation3 + $0x18] sm:$0xff] %vm699_vm1, %v3714_v16  ;;  %v3168_v21 = vpop.eup %3167  ;;  %1882 = vrot.lane.b32.xlu0 %v3691_v3, %s3422_s7  ;;  %v3727_v22 = vld [vmem:[#allocation2 + $0x39] sm:$0xff]  ;;  %3185 = vrcp.f32 %v617_v17  ;;  %v618_v23 = vadd.f32 1.0, %v3166_v18  ;;  %v3066_v17 = vpop.f32.mrb[22].mxu0  ;;  %v3117_v50 = vld [vmem:[%s4963_s3 + $0x28] sm:$0xff]  }
 0x115   : > { %823 = vst.msk [vmem:[#allocation3 + $0x30] sm:$0xff] %vm699_vm1, %v3723_v20  ;;  %926 = vrot.lane.b32.xlu1 %v3727_v22, %s3420_s28  ;;  %3187 = vrcp.f32 %v615_v19  ;;  %v616_v24 = vadd.f32 1.0, %v3168_v21  ;;  %v3820_v21 = vadd.f32 %v3066_v17, %v3591_v55 }
 0x116   : > { %v3170_v25 = vpop.eup %3169  ;;  %3189 = vrcp.f32 %v618_v23 }
 0x117   : > { %v3172_v26 = vpop.eup %3171  ;;  %v677_v27 = vmul.f32 %v3170_v25, %v3628_v28  ;;  %3191 = vrcp.f32 %v616_v24  ;;  %v3734_v29 = vld [vmem:[#allocation2 + $0x60] sm:$0xff] }
 0x118   : > { %v3174_v30 = vpop.eup %3173  ;;  %v675_v31 = vmul.f32 %v3172_v26, %v3631_v32  ;;  %2075 = vrot.lane.b32.xlu0 %v3689_v2, %s3423_s8  ;;  %v3739_v34 = vld [vmem:[#allocation2 + $0x48] sm:$0xff]  ;;  %828 = vst.msk [vmem:[#allocation3 + $0x80] sm:$0xff] %vm699_vm1, %v3734_v29  ;;  %v3115_v26 = vld [vmem:[%s4963_s3 + $0x18] sm:$0xff]  }
 0x119   : > { %v3176_v28 = vpop.eup %3175  ;;  %766 = vst.msk [vmem:[#allocation2 + $0x91] sm:$0xff] %vm699_vm1, %v677_v27  ;;  %v678_v32 = vmul.f32 %v3174_v30, %v3635_v38  ;;  %1884 = vrot.lane.b32.xlu1 %v3707_v14, %s3422_s7  ;;  %826 = vst.msk [vmem:[#allocation3 + $0x60] sm:$0xff] %vm699_vm1, %v3739_v34  ;;  %v3753_v37 = vld [vmem:[#allocation2 + $0x68] sm:$0xff] }
 0x11a   : > { %v3178_v39 = vpop.eup %3177  ;;  %764 = vst.msk [vmem:[#allocation2 + $0x79] sm:$0xff] %vm699_vm1, %v675_v31  ;;  %v676_v62 = vmul.f32 %v3176_v28, %v3640_v44  ;;  %v3758_v42 = vld [vmem:[#allocation2 + $0x50] sm:$0xff]  ;;  %829 = vst.msk [vmem:[#allocation3 + $0x90] sm:$0xff] %vm699_vm1, %v3753_v37  ;;  %v3770_v47 = vld [vmem:[#allocation2 + $0x62] sm:$0xff] }
 0x11b   : > { %v2269_v36 = vld [vmem:[#allocation3 + $0x8] sm:$0xff]  ;;  %v2271_v41 = vld [vmem:[#allocation3 + $0x18] sm:$0xff]  ;;  %v3180_v38 = vpop.eup %3179  ;;  %767 = vst.msk [vmem:[#allocation2 + $0x99] sm:$0xff] %vm699_vm1, %v678_v32  ;;  %v621_v43 = vadd.f32 1.0, %v3178_v39  ;;  %827 = vst.msk [vmem:[#allocation3 + $0x70] sm:$0xff] %vm699_vm1, %v3758_v42 }
 0x11c   : > { %v2333_v1 = vpack.c.bf16 %v2271_v41, %v2269_v36  ;;  %v3766_v46 = vld [vmem:[#allocation2 + $0x4a] sm:$0xff]  ;;  %v3768_v44 = vld [vmem:[#allocation2 + $0x52] sm:$0xff]  ;;  %v3182_v48 = vpop.eup %3181  ;;  %765 = vst.msk [vmem:[#allocation2 + $0x81] sm:$0xff] %vm699_vm1, %v676_v62  ;;  %1306 = vrot.lane.b32.xlu0 %v3691_v3, %s3425_s11  ;;  %v619_v49 = vadd.f32 1.0, %v3180_v38  ;;  %2240 = vst.msk [vmem:[#allocation3 + $0x48] sm:$0xff] %vm699_vm1, %v3770_v47  ;;  %v3791_v3 = vadd.f32 %v3065_v60, %v3591_v55 }
 0x11d   : > { %2238 = vst.msk [vmem:[#allocation3 + $0x28] sm:$0xff] %vm699_vm1, %v3766_v46  ;;  %2239 = vst.msk [vmem:[#allocation3 + $0x38] sm:$0xff] %vm699_vm1, %v3768_v44  ;;  %v2209_v51 = vld [vmem:[#allocation2 + $0x6a] sm:$0xff]  ;;  %v3184_v52 = vpop.eup %3183  ;;  %2077 = vrot.lane.b32.xlu1 %v3727_v22, %s3423_s8  ;;  %3193 = vrcp.f32 %v621_v43  ;;  %v622_v53 = vadd.f32 1.0, %v3182_v48  ;;  %v3116_v39 = vld [vmem:[%s4963_s3 + $0x20] sm:$0xff]  }
 0x11e   : > { %3001 = vmatprep.mubr.msk.bf16.mxu0 %vm699_vm1, %v2333_v1  ;;  %2241 = vst.msk [vmem:[#allocation3 + $0x58] sm:$0xff] %vm699_vm1, %v2209_v51  ;;  %v3186_v54 = vpop.eup %3185  ;;  %3195 = vrcp.f32 %v619_v49  ;;  %v620_v56 = vadd.f32 1.0, %v3184_v52 }
 0x11f   : > { %v3188_v61 = vpop.eup %3187  ;;  %v681_v63 = vmul.f32 %v3186_v54, %v3647_v58  ;;  %3197 = vrcp.f32 %v622_v53  ;;  %v3114_v58 = vld [vmem:[%s4963_s3 + $0x10] sm:$0xff]  }
 0x120   : > { %v3190_v4 = vpop.eup %3189  ;;  %1499 = vrot.lane.b32.xlu0 %v3689_v2, %s3426_s14  ;;  %v679_v5 = vmul.f32 %v3188_v61, %v3651_v0  ;;  %v3798_v7 = vld [vmem:[#allocation2 + $0x90] sm:$0xff]  ;;  %3199 = vrcp.f32 %v620_v56  ;;  %v529_v2 = vsub.f32 0.0, %v3791_v3  ;;  %v3809_v0 = vadd.f32 %v3591_v55, %v460_v11  ;;  %2496 = vmatpush1.bf16.msra.mxu0 %v3114_v58  ;;  %v855_v56 = vld [vmem:[#allocation2 + $0x21] sm:$0xff] }
 0x121   : > { %v3192_v10 = vpop.eup %3191  ;;  %1308 = vrot.lane.b32.xlu1 %v3707_v14, %s3425_s11  ;;  %770 = vst.msk [vmem:[#allocation2 + $0xc1] sm:$0xff] %vm699_vm1, %v681_v63  ;;  %v682_v15 = vmul.f32 %v3190_v4, %v3655_v6  ;;  %832 = vst.msk [vmem:[#allocation3 + $0xc0] sm:$0xff] %vm699_vm1, %v3798_v7  ;;  %v3813_v18 = vld [vmem:[#allocation2 + $0x78] sm:$0xff]  ;;  %v463_v6 = vpop.f32.mrb[23].mxu0  ;;  %3086 = vmatpush1.bf16.msra.mxu1 %v3114_v58  ;;  %v3118_v61 = vld [vmem:[%s4963_s3 + $0x30] sm:$0xff]  }
 0x122   : > { %768 = vst.msk [vmem:[#allocation2 + $0xa9] sm:$0xff] %vm699_vm1, %v679_v5  ;;  %v680_v19 = vmul.f32 %v3192_v10, %v3659_v13  ;;  %v3817_v14 = vld [vmem:[#allocation2 + $0x98] sm:$0xff]  ;;  %830 = vst.msk [vmem:[#allocation3 + $0xa0] sm:$0xff] %vm699_vm1, %v3813_v18  ;;  %v583_v23 = vmul.f32 1.442695, %v529_v2  ;;  %v527_v24 = vsub.f32 0.0, %v3809_v0  ;;  %v3827_v25 = vadd.f32 %v3591_v55, %v463_v6  ;;  %2497 = vmatprep.subr.bf16.mxu0 %v3424_v35 }
 0x123   : > { %771 = vst.msk [vmem:[#allocation2 + $0xc9] sm:$0xff] %vm699_vm1, %v682_v15  ;;  %833 = vst.msk [vmem:[#allocation3 + $0xd0] sm:$0xff] %vm699_vm1, %v3817_v14  ;;  %3078 = vmatprep.subr.bf16.mxu1 %v3424_v35  ;;  %v530_v13 = vsub.f32 0.0, %v3820_v21  ;;  %v3843_v57 = vld [vmem:[#allocation2 + $0x80] sm:$0xff] }
 0x124   : > { %1302 = vrot.lane.b32.xlu0 %v3699_v8, %s3425_s11  ;;  %769 = vst.msk [vmem:[#allocation2 + $0xb1] sm:$0xff] %vm699_vm1, %v680_v19  ;;  %3201 = vpow2.f32 %v583_v23  ;;  %v579_v27 = vmul.f32 1.442695, %v527_v24  ;;  %v528_v30 = vsub.f32 0.0, %v3827_v25  ;;  %2498 = vmatpush1.bf16.msra.mxu0 %v3115_v26  ;;  %831 = vst.msk [vmem:[#allocation3 + $0xb0] sm:$0xff] %vm699_vm1, %v3843_v57  ;;  %v3905_v52 = vld [vmem:[#allocation2 + $0x82] sm:$0xff] }
 0x125   : > { %1501 = vrot.lane.b32.xlu1 %v3727_v22, %s3426_s14  ;;  %v585_v31 = vmul.f32 1.442695, %v530_v13  ;;  %3087 = vmatpush1.bf16.msra.mxu1 %v3115_v26  ;;  %2243 = vst.msk [vmem:[#allocation3 + $0x78] sm:$0xff] %vm699_vm1, %v3905_v52  ;;  %v2213_v54 = vld [vmem:[#allocation2 + $0x9a] sm:$0xff] }
 0x126   : > { %3203 = vpow2.f32 %v579_v27  ;;  %v581_v28 = vmul.f32 1.442695, %v528_v30  ;;  %2499 = vmatprep.subr.bf16.mxu0 %v3424_v35  ;;  %3079 = vmatprep.subr.bf16.mxu1 %v3424_v35  ;;  %2245 = vst.msk [vmem:[#allocation3 + $0x98] sm:$0xff] %vm699_vm1, %v2213_v54  ;;  %v1624_v10 = vld [vmem:[#allocation2 + $0x1a] sm:$0xff] }
 0x127   : > { %v3194_v8 = vpop.eup %3193  ;;  %3205 = vpow2.f32 %v585_v31  ;;  %v3119_v23 = vld [vmem:[%s4963_s3 + $0x38] sm:$0xff]  }
 0x128   : > { %v3196_v22 = vpop.eup %3195  ;;  %1495 = vrot.lane.b32.xlu0 %v3697_v9, %s3426_s14  ;;  %v685_v32 = vmul.f32 %v3194_v8, %v3668_v33  ;;  %v3852_v36 = vld [vmem:[#allocation2 + $0xc0] sm:$0xff]  ;;  %3207 = vpow2.f32 %v581_v28  ;;  %2500 = vmatpush1.bf16.msra.mxu0 %v3116_v39 }
 0x129   : > { %v3198_v62 = vpop.eup %3197  ;;  %1694 = vrot.lane.b32.xlu1 %v3714_v16, %s3427_s23  ;;  %v683_v41 = vmul.f32 %v3196_v22, %v3673_v59  ;;  %v3860_v38 = vld [vmem:[#allocation2 + $0xa8] sm:$0xff]  ;;  %836 = vst.msk [vmem:[#allocation3 + $0x100] sm:$0xff] %vm699_vm1, %v3852_v36  ;;  %v3864_v33 = vld [vmem:[#allocation2 + $0x7a] sm:$0xff]  ;;  %3088 = vmatpush1.bf16.msra.mxu1 %v3116_v39 }
 0x12a   : > { %v3200_v9 = vpop.eup %3199  ;;  %774 = vst.msk [vmem:[#allocation2 + $0xf1] sm:$0xff] %vm699_vm1, %v685_v32  ;;  %v686_v1 = vmul.f32 %v3198_v62, %v3678_v40  ;;  %v3868_v43 = vld [vmem:[#allocation2 + $0xc8] sm:$0xff]  ;;  %834 = vst.msk [vmem:[#allocation3 + $0xe0] sm:$0xff] %vm699_vm1, %v3860_v38  ;;  %2501 = vmatprep.subr.bf16.mxu0 %v3424_v35  ;;  %3080 = vmatprep.subr.bf16.mxu1 %v3424_v35 }
 0x12b   : > { %2242 = vst.msk [vmem:[#allocation3 + $0x68] sm:$0xff] %vm699_vm1, %v3864_v33  ;;  %v3874_v59 = vld [vmem:[#allocation2 + $0xaa] sm:$0xff]  ;;  %v3876_v48 = vld [vmem:[#allocation2 + $0xb2] sm:$0xff]  ;;  %772 = vst.msk [vmem:[#allocation2 + $0xd9] sm:$0xff] %vm699_vm1, %v683_v41  ;;  %v684_v49 = vmul.f32 %v3200_v9, %v3683_v45 }
 0x12c   : > { %837 = vst.msk [vmem:[#allocation3 + $0x110] sm:$0xff] %vm699_vm1, %v3868_v43  ;;  %1692 = vrot.lane.b32.xlu0 %v3709_v12, %s3427_s23  ;;  %2246 = vst.msk [vmem:[#allocation3 + $0xa8] sm:$0xff] %vm699_vm1, %v3874_v59  ;;  %v3891_v40 = vld [vmem:[#allocation2 + $0xc2] sm:$0xff]  ;;  %v3893_v45 = vld [vmem:[#allocation2 + $0xb0] sm:$0xff]  ;;  %2502 = vmatpush1.bf16.msra.mxu0 %v3117_v50 }
 0x12d   : > { %2247 = vst.msk [vmem:[#allocation3 + $0xb8] sm:$0xff] %vm699_vm1, %v3876_v48  ;;  %775 = vst.msk [vmem:[#allocation2 + $0xf9] sm:$0xff] %vm699_vm1, %v686_v1  ;;  %1119 = vrot.lane.b32.xlu1 %v3714_v16, %s3421_s29  ;;  %v2217_v51 = vld [vmem:[#allocation2 + $0xca] sm:$0xff]  ;;  %3089 = vmatpush1.bf16.msra.mxu1 %v3117_v50  ;;  %v2212_v16 = vld [vmem:[#allocation2 + $0x92] sm:$0xff] }
 0x12e   : > { %773 = vst.msk [vmem:[#allocation2 + $0xe1] sm:$0xff] %vm699_vm1, %v684_v49  ;;  %835 = vst.msk [vmem:[#allocation3 + $0xf0] sm:$0xff] %vm699_vm1, %v3893_v45  ;;  %v3202_v53 = vpop.eup %3201  ;;  %2503 = vmatprep.subr.bf16.mxu0 %v3424_v35  ;;  %3081 = vmatprep.subr.bf16.mxu1 %v3424_v35  ;;  %v860_v8 = vld [vmem:[#allocation2 + $0x61] sm:$0xff]  ;;  %v858_v41 = vld [vmem:[#allocation2 + $0x49] sm:$0xff] }
 0x12f   : > { %2248 = vst.msk [vmem:[#allocation3 + $0xc8] sm:$0xff] %vm699_vm1, %v3891_v40  ;;  %2249 = vst.msk [vmem:[#allocation3 + $0xd8] sm:$0xff] %vm699_vm1, %v2217_v51  ;;  %v625_v60 = vadd.f32 1.0, %v3202_v53  ;;  %v1625_v22 = vld [vmem:[#allocation2 + $0x22] sm:$0xff] }
 0x130   : > { %1117 = vrot.lane.b32.xlu0 %v3709_v12, %s3421_s29  ;;  %2244 = vst.msk [vmem:[#allocation3 + $0x88] sm:$0xff] %vm699_vm1, %v2212_v16  ;;  %v3204_v63 = vpop.eup %3203  ;;  %2504 = vmatpush1.bf16.msra.mxu0 %v3118_v61 }
 0x131   : > { %922 = vrot.lane.b32.xlu1 %v855_v56, %s3420_s28  ;;  %v3920_v4 = vld [vmem:[#allocation2 + $0xf0] sm:$0xff]  ;;  %v3206_v5 = vpop.eup %3205  ;;  %3209 = vrcp.f32 %v625_v60  ;;  %v623_v11 = vadd.f32 1.0, %v3204_v63  ;;  %3090 = vmatpush1.bf16.msra.mxu1 %v3118_v61  ;;  %v3069_v60 = vpop.f32.mrb[24].mxu0 }
 0x132   : > { %v3922_v12 = vld [vmem:[#allocation2 + $0xd8] sm:$0xff]  ;;  %840 = vst.msk [vmem:[#allocation3 + $0x140] sm:$0xff] %vm699_vm1, %v3920_v4  ;;  %v3208_v58 = vpop.eup %3207  ;;  %v626_v17 = vadd.f32 1.0, %v3206_v5  ;;  %2505 = vmatprep.subr.bf16.mxu0 %v3424_v35  ;;  %3082 = vmatprep.subr.bf16.mxu1 %v3424_v35  ;;  %v485_v61 = vadd.f32 %v3069_v60, %v3591_v55  ;;  %v476_v63 = vpop.f32.mrb[25].mxu0 }
 0x133   : > { %v2289_v15 = vld [vmem:[#allocation3 + $0xa8] sm:$0xff]  ;;  %838 = vst.msk [vmem:[#allocation3 + $0x120] sm:$0xff] %vm699_vm1, %v3922_v12  ;;  %3211 = vrcp.f32 %v623_v11  ;;  %v624_v6 = vadd.f32 1.0, %v3208_v58  ;;  %v477_v5 = vadd.f32 %v3591_v55, %v476_v63  ;;  %v3070_v11 = vpop.f32.mrb[26].mxu0 }
 0x134   : > { %v2291_v2 = vld [vmem:[#allocation3 + $0xb8] sm:$0xff]  ;;  %1688 = vrot.lane.b32.xlu0 %v1624_v10, %s3427_s23  ;;  %v3934_v24 = vld [vmem:[#allocation2 + $0xf8] sm:$0xff]  ;;  %3213 = vrcp.f32 %v626_v17  ;;  %2506 = vmatpush1.bf16.msra.mxu0 %v3119_v23  ;;  %v533_v58 = vsub.f32 0.0, %v485_v61 }
 0x135   : > { %v2343_v19 = vpack.c.bf16 %v2291_v2, %v2289_v15  ;;  %v3936_v13 = vld [vmem:[#allocation2 + $0xfa] sm:$0xff]  ;;  %1304 = vrot.lane.b32.xlu1 %v3723_v20, %s3425_s11  ;;  %v3940_v26 = vld [vmem:[#allocation2 + $0xf2] sm:$0xff]  ;;  %841 = vst.msk [vmem:[#allocation3 + $0x150] sm:$0xff] %vm699_vm1, %v3934_v24  ;;  %3215 = vrcp.f32 %v624_v6  ;;  %v3951_v31 = vld [vmem:[#allocation2 + $0xe2] sm:$0xff]  ;;  %2507 = vmatprep.subr.bf16.mxu0 %v3424_v35  ;;  %v479_v15 = vpop.f32.mrb[27].mxu0  ;;  %v531_v2 = vsub.f32 0.0, %v477_v5 }
 0x136   : > { %v3942_v27 = vld [vmem:[#allocation2 + $0xe0] sm:$0xff]  ;;  %2253 = vst.msk [vmem:[#allocation3 + $0x118] sm:$0xff] %vm699_vm1, %v3936_v13  ;;  %2252 = vst.msk [vmem:[#allocation3 + $0x108] sm:$0xff] %vm699_vm1, %v3940_v26  ;;  %3091 = vmatpush1.bf16.msra.mxu1 %v3119_v23  ;;  %v480_v17 = vadd.f32 %v3591_v55, %v479_v15 }
 0x137   : > { %3006 = vmatprep.mubr.msk.bf16.mxu1 %vm699_vm1, %v2343_v19  ;;  %v3949_v30 = vld [vmem:[#allocation2 + $0xda] sm:$0xff]  ;;  %839 = vst.msk [vmem:[#allocation3 + $0x130] sm:$0xff] %vm699_vm1, %v3942_v27  ;;  %2251 = vst.msk [vmem:[#allocation3 + $0xf8] sm:$0xff] %vm699_vm1, %v3951_v31  ;;  %3083 = vmatprep.subr.bf16.mxu1 %v3424_v35  ;;  %v591_v19 = vmul.f32 1.442695, %v533_v58 }
 0x138   : > { %2250 = vst.msk [vmem:[#allocation3 + $0xe8] sm:$0xff] %vm699_vm1, %v3949_v30  ;;  %1113 = vrot.lane.b32.xlu0 %v1624_v10, %s3421_s29  ;;  %v3120_v20 = vld [vmem:[%s4963_s3 + $0x40] sm:$0xff]   ;;  %v488_v10 = vadd.f32 %v3070_v11, %v3591_v55  ;;  %v587_v6 = vmul.f32 1.442695, %v531_v2  ;;  %v532_v23 = vsub.f32 0.0, %v480_v17  ;;  %v1634_v55 = vld [vmem:[#allocation2 + $0x92] sm:$0xff] }
 0x139   : > { %1497 = vrot.lane.b32.xlu1 %v855_v56, %s3426_s14  ;;  %2508 = vmatpush1.bf16.msra.mxu0 %v3120_v20  ;;  %v864_v56 = vld [vmem:[#allocation2 + $0x91] sm:$0xff]  ;;  %3217 = vpow2.f32 %v591_v19 }
 0x13a   : > { %3092 = vmatpush1.bf16.msra.mxu1 %v3120_v20  ;;  %3219 = vpow2.f32 %v587_v6 }
 0x13b   : > { %v3210_v28 = vpop.eup %3209 }
 0x13c   : > { %932 = vrot.lane.b32.xlu0 %v860_v8, %s3420_s28  ;;  %v689_v32 = vmul.f32 %v3210_v28, %v3791_v3  ;;  %v861_v3 = vld [vmem:[#allocation2 + $0x69] sm:$0xff]  ;;  %v862_v8 = vld [vmem:[#allocation2 + $0x79] sm:$0xff]  ;;  %v589_v28 = vmul.f32 1.442695, %v532_v23 }
 0x13d   : > { %1690 = vrot.lane.b32.xlu1 %v1625_v22, %s3427_s23  ;;  %v3212_v39 = vpop.eup %3211 }
 0x13e   : > { %v3214_v62 = vpop.eup %3213  ;;  %778 = vst.msk [vmem:[#allocation2 + $0x121] sm:$0xff] %vm699_vm1, %v689_v32  ;;  %v687_v35 = vmul.f32 %v3212_v39, %v3809_v0  ;;  %v859_v0 = vld [vmem:[#allocation2 + $0x51] sm:$0xff]  ;;  %v1635_v32 = vld [vmem:[#allocation2 + $0x9a] sm:$0xff] }
 0x13f   : > { %v3216_v9 = vpop.eup %3215  ;;  %v690_v1 = vmul.f32 %v3214_v62, %v3820_v21 }
 0x140   : > { %928 = vrot.lane.b32.xlu0 %v858_v41, %s3420_s28  ;;  %776 = vst.msk [vmem:[#allocation2 + $0x109] sm:$0xff] %vm699_vm1, %v687_v35  ;;  %v688_v49 = vmul.f32 %v3216_v9, %v3827_v25 }
 0x141   : > { %1115 = vrot.lane.b32.xlu1 %v1625_v22, %s3421_s29  ;;  %779 = vst.msk [vmem:[#allocation2 + $0x129] sm:$0xff] %vm699_vm1, %v690_v1  ;;  %v1055_v1 = vld [vmem:[#allocation2 + $0x7a] sm:$0xff] }
 0x142   : > { %777 = vst.msk [vmem:[#allocation2 + $0x111] sm:$0xff] %vm699_vm1, %v688_v49 }
 0x143   : > { %v3218_v22 = vpop.eup %3217 }
 0x144   : > { %1886 = vrot.lane.b32.xlu0 %v3739_v34, %s3422_s7  ;;  %v3220_v39 = vpop.eup %3219  ;;  %v629_v62 = vadd.f32 1.0, %v3218_v22 }
 0x145   : > { %934 = vrot.lane.b32.xlu1 %v861_v3, %s3420_s28  ;;  %v3985_v21 = vld [vmem:[#allocation2 + $0x120] sm:$0xff]  ;;  %v627_v35 = vadd.f32 1.0, %v3220_v39 }
 0x146   : > { %844 = vst.msk [vmem:[#allocation3 + $0x180] sm:$0xff] %vm699_vm1, %v3985_v21  ;;  %v868_v3 = vld [vmem:[#allocation2 + $0xc1] sm:$0xff] }
 0x147   : > { %v3991_v25 = vld [vmem:[#allocation2 + $0x108] sm:$0xff] }
 0x148   : > { %2079 = vrot.lane.b32.xlu0 %v858_v41, %s3423_s8  ;;  %v3987_v50 = vld [vmem:[#allocation2 + $0x128] sm:$0xff]  ;;  %842 = vst.msk [vmem:[#allocation3 + $0x160] sm:$0xff] %vm699_vm1, %v3991_v25 }
 0x149   : > { %930 = vrot.lane.b32.xlu1 %v859_v0, %s3420_s28  ;;  %845 = vst.msk [vmem:[#allocation3 + $0x190] sm:$0xff] %vm699_vm1, %v3987_v50  ;;  %v3999_v51 = vld [vmem:[#allocation2 + $0x12a] sm:$0xff]  ;;  %v4001_v53 = vld [vmem:[#allocation2 + $0x122] sm:$0xff]  ;;  %v4009_v54 = vld [vmem:[#allocation2 + $0x112] sm:$0xff] }
 0x14a   : > { %v4005_v16 = vld [vmem:[#allocation2 + $0x110] sm:$0xff]  ;;  %2256 = vst.msk [vmem:[#allocation3 + $0x148] sm:$0xff] %vm699_vm1, %v4001_v53  ;;  %2257 = vst.msk [vmem:[#allocation3 + $0x158] sm:$0xff] %vm699_vm1, %v3999_v51 }
 0x14b   : > { %2255 = vst.msk [vmem:[#allocation3 + $0x138] sm:$0xff] %vm699_vm1, %v4009_v54  ;;  %843 = vst.msk [vmem:[#allocation3 + $0x170] sm:$0xff] %vm699_vm1, %v4005_v16 }
 0x14c   : > { %1310 = vrot.lane.b32.xlu0 %v3739_v34, %s3425_s11  ;;  %v4007_v34 = vld [vmem:[#allocation2 + $0x10a] sm:$0xff] }
 0x14d   : > { %1888 = vrot.lane.b32.xlu1 %v3758_v42, %s3422_s7  ;;  %2254 = vst.msk [vmem:[#allocation3 + $0x128] sm:$0xff] %vm699_vm1, %v4007_v34 }
 0x150   : > { %1503 = vrot.lane.b32.xlu0 %v858_v41, %s3426_s14 }
 0x151   : > { %2081 = vrot.lane.b32.xlu1 %v859_v0, %s3423_s8 }
 0x154   : > { %940 = vrot.lane.b32.xlu0 %v864_v56, %s3420_s28 }
 0x155   : > { %1312 = vrot.lane.b32.xlu1 %v3758_v42, %s3425_s11  ;;  %v865_v42 = vld [vmem:[#allocation2 + $0x99] sm:$0xff] }
 0x158   : > { %1322 = vrot.lane.b32.xlu0 %v3798_v7, %s3425_s11  ;;  %v534_v7 = vsub.f32 0.0, %v488_v10 }
 0x159   : > { %1505 = vrot.lane.b32.xlu1 %v859_v0, %s3426_s14  ;;  %v863_v0 = vld [vmem:[#allocation2 + $0x81] sm:$0xff] }
 0x15a   : > { %v593_v20 = vmul.f32 1.442695, %v534_v7 }
 0x15c   : > { %1515 = vrot.lane.b32.xlu0 %v864_v56, %s3426_s14  ;;  %3221 = vpow2.f32 %v593_v20  ;;  %v1056_v56 = vld [vmem:[#allocation2 + $0x82] sm:$0xff] }
 0x15d   : > { %942 = vrot.lane.b32.xlu1 %v865_v42, %s3420_s28  ;;  %3223 = vpow2.f32 %v589_v28 }
 0x15e   : > { %3225 = vrcp.f32 %v629_v62  ;;  %v1639_v62 = vld [vmem:[#allocation2 + $0xca] sm:$0xff] }
 0x15f   : > { %3227 = vrcp.f32 %v627_v35 }
 0x160   : > { %936 = vrot.lane.b32.xlu0 %v862_v8, %s3420_s28 }
 0x161   : > { %1324 = vrot.lane.b32.xlu1 %v3817_v14, %s3425_s11 }
 0x164   : > { %1708 = vrot.lane.b32.xlu0 %v1634_v55, %s3427_s23 }
 0x165   : > { %1517 = vrot.lane.b32.xlu1 %v865_v42, %s3426_s14  ;;  %v869_v42 = vld [vmem:[#allocation2 + $0xc9] sm:$0xff] }
 0x166   : > { %v3222_v41 = vpop.eup %3221 }
 0x167   : > { %v3224_v9 = vpop.eup %3223  ;;  %v630_v14 = vadd.f32 1.0, %v3222_v41  ;;  %v3073_v41 = vpop.f32.mrb[28].mxu0 }
 0x168   : > { %1133 = vrot.lane.b32.xlu0 %v1634_v55, %s3421_s29  ;;  %v628_v49 = vadd.f32 1.0, %v3224_v9  ;;  %v3226_v60 = vpop.eup %3225  ;;  %v3377_v9 = vld [vmem:[%s4962_s2] ss:$0 sm:$0xff] }
 0x169   : > { %1710 = vrot.lane.b32.xlu1 %v1635_v32, %s3427_s23  ;;  %3229 = vrcp.f32 %v630_v14  ;;  %v3228_v63 = vpop.eup %3227  ;;  %v693_v11 = vmul.f32 %v3226_v60, %v485_v61 }
 0x16a   : > { %3231 = vrcp.f32 %v628_v49  ;;  %v691_v15 = vmul.f32 %v3228_v63, %v477_v5  ;;  %v492_v49 = vpop.f32.mrb[29].mxu0 }
 0x16b   : > { %782 = vst.msk [vmem:[#allocation2 + $0x151] sm:$0xff] %vm699_vm1, %v693_v11 }
 0x16c   : > { %1129 = vrot.lane.b32.xlu0 %v1055_v1, %s3421_s29  ;;  %780 = vst.msk [vmem:[#allocation2 + $0x139] sm:$0xff] %vm699_vm1, %v691_v15  ;;  %v4112_v1 = vadd.f32 %v3377_v9, %v3073_v41 }
 0x16d   : > { %1135 = vrot.lane.b32.xlu1 %v1635_v32, %s3421_s29 }
 0x170   : > { %948 = vrot.lane.b32.xlu0 %v868_v3, %s3420_s28 }
 0x171   : > { %938 = vrot.lane.b32.xlu1 %v863_v0, %s3420_s28  ;;  %v4119_v0 = vadd.f32 %v3377_v9, %v492_v49 }
 0x172   : > { %v816_v22 = vld [vmem:[#allocation2 + $0x150] sm:$0xff] }
 0x173   : > { %v3230_v58 = vpop.eup %3229  ;;  %v4066_v6 = vld [vmem:[#allocation2 + $0x138] sm:$0xff]  ;;  %848 = vst.msk [vmem:[#allocation3 + $0x1c0] sm:$0xff] %vm699_vm1, %v816_v22  ;;  %v535_v15 = vsub.f32 0.0, %v4119_v0 }
 0x174   : > { %1906 = vrot.lane.b32.xlu0 %v3852_v36, %s3422_s7  ;;  %v3232_v2 = vpop.eup %3231  ;;  %v694_v19 = vmul.f32 %v3230_v58, %v488_v10  ;;  %v866_v10 = vld [vmem:[#allocation2 + $0xa9] sm:$0xff]  ;;  %846 = vst.msk [vmem:[#allocation3 + $0x1a0] sm:$0xff] %vm699_vm1, %v4066_v6 }
 0x175   : > { %1131 = vrot.lane.b32.xlu1 %v1056_v56, %s3421_s29  ;;  %v692_v7 = vmul.f32 %v3232_v2, %v480_v17  ;;  %v3074_v56 = vpop.f32.mrb[30].mxu0 }
 0x176   : > { %783 = vst.msk [vmem:[#allocation2 + $0x159] sm:$0xff] %vm699_vm1, %v694_v19  ;;  %v4122_v60 = vadd.f32 %v3377_v9, %v3074_v56  ;;  %v495_v63 = vpop.f32.mrb[31].mxu0  ;;  %v867_v19 = vld [vmem:[#allocation2 + $0xb1] sm:$0xff] }
 0x177   : > { %781 = vst.msk [vmem:[#allocation2 + $0x141] sm:$0xff] %vm699_vm1, %v692_v7  ;;  %v4127_v2 = vadd.f32 %v3377_v9, %v495_v63  ;;  %v595_v7 = vmul.f32 1.442695, %v535_v15 }
 0x178   : > { %2099 = vrot.lane.b32.xlu0 %v868_v3, %s3423_s8 }
 0x179   : > { %950 = vrot.lane.b32.xlu1 %v869_v42, %s3420_s28 }
 0x17c   : > { %1330 = vrot.lane.b32.xlu0 %v3852_v36, %s3425_s11 }
 0x17d   : > { %1908 = vrot.lane.b32.xlu1 %v3868_v43, %s3422_s7  ;;  %v4062_v17 = vld [vmem:[#allocation2 + $0x158] sm:$0xff] }
 0x17e   : > { %849 = vst.msk [vmem:[#allocation3 + $0x1d0] sm:$0xff] %vm699_vm1, %v4062_v17  ;;  %v4072_v36 = vld [vmem:[#allocation2 + $0x140] sm:$0xff]  ;;  %v4082_v28 = vld [vmem:[#allocation2 + $0x152] sm:$0xff] }
 0x17f   : > { %v4074_v23 = vld [vmem:[#allocation2 + $0x13a] sm:$0xff]  ;;  %v4080_v8 = vld [vmem:[#allocation2 + $0x142] sm:$0xff]  ;;  %847 = vst.msk [vmem:[#allocation3 + $0x1b0] sm:$0xff] %vm699_vm1, %v4072_v36  ;;  %2260 = vst.msk [vmem:[#allocation3 + $0x188] sm:$0xff] %vm699_vm1, %v4082_v28 }
 0x180   : > { %1523 = vrot.lane.b32.xlu0 %v868_v3, %s3426_s14  ;;  %v4084_v55 = vld [vmem:[#allocation2 + $0x15a] sm:$0xff]  ;;  %2258 = vst.msk [vmem:[#allocation3 + $0x168] sm:$0xff] %vm699_vm1, %v4074_v23  ;;  %2259 = vst.msk [vmem:[#allocation3 + $0x178] sm:$0xff] %vm699_vm1, %v4080_v8  ;;  %v537_v3 = vsub.f32 0.0, %v4112_v1 }
 0x181   : > { %2101 = vrot.lane.b32.xlu1 %v869_v42, %s3423_s8  ;;  %2261 = vst.msk [vmem:[#allocation3 + $0x198] sm:$0xff] %vm699_vm1, %v4084_v55 }
 0x182   : > { %v925_v61 = vpop.permute.xlu0 %924  ;;  %v599_v58 = vmul.f32 1.442695, %v537_v3 }
 0x183   : > { %1017 = vst.msk [vmem:[#allocation3 + $0x40] sm:$0xff] %vm1012_vm3, %v925_v61  ;;  %v921_v5 = vpop.permute.xlu1 %920  ;;  %v536_v61 = vsub.f32 0.0, %v4127_v2 }
 0x184   : > { %1015 = vst.msk [vmem:[#allocation3 + $0x20] sm:$0xff] %vm1012_vm3, %v921_v5  ;;  %944 = vrot.lane.b32.xlu0 %v866_v10, %s3420_s28  ;;  %3233 = vpow2.f32 %v599_v58 }
 0x185   : > { %1332 = vrot.lane.b32.xlu1 %v3868_v43, %s3425_s11  ;;  %3235 = vpow2.f32 %v595_v7  ;;  %v597_v22 = vmul.f32 1.442695, %v536_v61 }
 0x186   : > { %v4078_v20 = vpop.permute.xlu0 %1882 }
 0x187   : > { %v927_v43 = vpop.permute.xlu1 %926 }
 0x188   : > { %1018 = vst.msk [vmem:[#allocation3 + $0x50] sm:$0xff] %vm1012_vm3, %v927_v43  ;;  %1902 = vrot.lane.b32.xlu0 %v3860_v38, %s3422_s7 }
 0x189   : > { %1525 = vrot.lane.b32.xlu1 %v869_v42, %s3426_s14 }
 0x18a   : > { %v4101_v32 = vpop.permute.xlu0 %2075 }
 0x18b   : > { %v4103_v39 = vpop.permute.xlu1 %1884 }
 0x18c   : > { %2095 = vrot.lane.b32.xlu0 %v866_v10, %s3423_s8 }
 0x18d   : > { %1718 = vrot.lane.b32.xlu1 %v1639_v62, %s3427_s23 }
 0x18e   : > { %v4107_v35 = vpop.permute.xlu0 %1306  ;;  %v3234_v9 = vpop.eup %3233 }
 0x18f   : > { %v4114_v14 = vpop.permute.xlu1 %2077  ;;  %v633_v56 = vadd.f32 1.0, %v3234_v9  ;;  %v3236_v63 = vpop.eup %3235 }
 0x190   : > { %1326 = vrot.lane.b32.xlu0 %v3860_v38, %s3425_s11  ;;  %v538_v38 = vsub.f32 0.0, %v4122_v60  ;;  %v631_v15 = vadd.f32 1.0, %v3236_v63 }
 0x191   : > { %1143 = vrot.lane.b32.xlu1 %v1639_v62, %s3421_s29 }
 0x192   : > { %v4124_v11 = vpop.permute.xlu0 %1499  ;;  %v601_v5 = vmul.f32 1.442695, %v538_v38 }
 0x193   : > { %v4129_v42 = vpop.permute.xlu1 %1308 }
 0x194   : > { %1519 = vrot.lane.b32.xlu0 %v866_v10, %s3426_s14  ;;  %3237 = vpow2.f32 %v601_v5 }
 0x195   : > { %946 = vrot.lane.b32.xlu1 %v867_v19, %s3420_s28  ;;  %3239 = vpow2.f32 %v597_v22  ;;  %v872_v22 = vld [vmem:[#allocation2 + $0xf1] sm:$0xff] }
 0x196   : > { %v1303_v43 = vpop.permute.xlu0 %1302  ;;  %3241 = vrcp.f32 %v633_v56 }
 0x197   : > { %1399 = vst.msk [vmem:[#allocation3] sm:$0xff] %vm1398_vm5, %v1303_v43  ;;  %v4136_v62 = vpop.permute.xlu1 %1501  ;;  %3243 = vrcp.f32 %v631_v15 }
 0x198   : > { %1716 = vrot.lane.b32.xlu0 %v3891_v40, %s3427_s23 }
 0x199   : > { %1904 = vrot.lane.b32.xlu1 %v3893_v45, %s3422_s7 }
 0x19a   : > { %v1496_v10 = vpop.permute.xlu0 %1495 }
 0x19b   : > { %1592 = vst.msk [vmem:[#allocation3] sm:$0xff] %vm1591_vm6, %v1496_v10  ;;  %v4143_v41 = vpop.permute.xlu1 %1694 }
 0x19c   : > { %1141 = vrot.lane.b32.xlu0 %v3891_v40, %s3421_s29 }
 0x19d   : > { %2097 = vrot.lane.b32.xlu1 %v867_v19, %s3423_s8 }
 0x19e   : > { %v1693_v49 = vpop.permute.xlu0 %1692  ;;  %v3238_v58 = vpop.eup %3237 }
 0x19f   : > { %v1120_v3 = vpop.permute.xlu1 %1119  ;;  %v3240_v38 = vpop.eup %3239  ;;  %v634_v7 = vadd.f32 1.0, %v3238_v58 }
 0x1a0   : > { %1211 = vst.msk [vmem:[#allocation3 + $0x50] sm:$0xff] %vm1205_vm4, %v1120_v3  ;;  %1712 = vrot.lane.b32.xlu0 %v3874_v59, %s3427_s23  ;;  %v632_v5 = vadd.f32 1.0, %v3240_v38 }
 0x1a1   : > { %1328 = vrot.lane.b32.xlu1 %v3893_v45, %s3425_s11  ;;  %3245 = vrcp.f32 %v634_v7 }
 0x1a2   : > { %v1118_v40 = vpop.permute.xlu0 %1117  ;;  %3247 = vrcp.f32 %v632_v5 }
 0x1a3   : > { %1210 = vst.msk [vmem:[#allocation3 + $0x40] sm:$0xff] %vm1205_vm4, %v1118_v40  ;;  %v923_v61 = vpop.permute.xlu1 %922  ;;  %v870_v40 = vld [vmem:[#allocation2 + $0xd9] sm:$0xff] }
 0x1a4   : > { %1016 = vst.msk [vmem:[#allocation3 + $0x30] sm:$0xff] %vm1012_vm3, %v923_v61  ;;  %1137 = vrot.lane.b32.xlu0 %v3874_v59, %s3421_s29 }
 0x1a5   : > { %1521 = vrot.lane.b32.xlu1 %v867_v19, %s3426_s14  ;;  %v3242_v19 = vpop.eup %3241 }
 0x1a6   : > { %v1689_v45 = vpop.permute.xlu0 %1688  ;;  %v3244_v9 = vpop.eup %3243 }
 0x1a7   : > { %1785 = vst.msk [vmem:[#allocation3] sm:$0xff] %vm1784_vm7, %v1689_v45  ;;  %v1305_v43 = vpop.permute.xlu1 %1304 }
 0x1a8   : > { %1979 = vst.msk [vmem:[#allocation3] sm:$0xff] %vm1978_vm8, %v4078_v20  ;;  %956 = vrot.lane.b32.xlu0 %v872_v22, %s3420_s28  ;;  %v697_v20 = vmul.f32 %v3242_v19, %v4112_v1 }
 0x1a9   : > { %1400 = vst.msk [vmem:[#allocation3 + $0x10] sm:$0xff] %vm1398_vm5, %v1305_v43  ;;  %1714 = vrot.lane.b32.xlu1 %v3876_v48, %s3427_s23 }
 0x1aa   : > { %2172 = vst.msk [vmem:[#allocation3] sm:$0xff] %vm2171_vm9, %v4101_v32  ;;  %v1114_v59 = vpop.permute.xlu0 %1113 }
 0x1ab   : > { %1208 = vst.msk [vmem:[#allocation3 + $0x20] sm:$0xff] %vm1205_vm4, %v1114_v59  ;;  %v1498_v10 = vpop.permute.xlu1 %1497  ;;  %v3246_v32 = vpop.eup %3245 }
 0x1ac   : > { %1401 = vst.msk [vmem:[#allocation3 + $0x20] sm:$0xff] %vm1398_vm5, %v4107_v35  ;;  %1914 = vrot.lane.b32.xlu0 %v3920_v4, %s3422_s7  ;;  %v695_v35 = vmul.f32 %v3244_v9, %v4119_v0  ;;  %v3248_v56 = vpop.eup %3247  ;;  %v698_v1 = vmul.f32 %v3246_v32, %v4122_v60  ;;  %v2277_v32 = vld [vmem:[#allocation3 + $0x48] sm:$0xff] }
 0x1ad   : > { %1593 = vst.msk [vmem:[#allocation3 + $0x10] sm:$0xff] %vm1591_vm6, %v1498_v10  ;;  %1594 = vst.msk [vmem:[#allocation3 + $0x20] sm:$0xff] %vm1591_vm6, %v4124_v11  ;;  %1139 = vrot.lane.b32.xlu1 %v3876_v48, %s3421_s29  ;;  %v873_v11 = vld [vmem:[#allocation2 + $0xf9] sm:$0xff]  ;;  %v696_v48 = vmul.f32 %v3248_v56, %v4127_v2  ;;  %v2275_v2 = vld [vmem:[#allocation3 + $0x38] sm:$0xff] }
 0x1ae   : > { %1787 = vst.msk [vmem:[#allocation3 + $0x20] sm:$0xff] %vm1784_vm7, %v1693_v49  ;;  %v933_v3 = vpop.permute.xlu0 %932 }
 0x1af   : > { %786 = vst.msk [vmem:[#allocation2 + $0x181] sm:$0xff] %vm699_vm1, %v697_v20  ;;  %v1691_v63 = vpop.permute.xlu1 %1690  ;;  %784 = vst.msk [vmem:[#allocation2 + $0x169] sm:$0xff] %vm699_vm1, %v695_v35 }
 0x1b0   : > { %1021 = vst.msk [vmem:[#allocation3 + $0x80] sm:$0xff] %vm1012_vm3, %v933_v3  ;;  %2107 = vrot.lane.b32.xlu0 %v872_v22, %s3423_s8  ;;  %v2279_v3 = vld [vmem:[#allocation3 + $0x58] sm:$0xff] }
 0x1b1   : > { %1786 = vst.msk [vmem:[#allocation3 + $0x10] sm:$0xff] %vm1784_vm7, %v1691_v63  ;;  %958 = vrot.lane.b32.xlu1 %v873_v11, %s3420_s28 }
 0x1b2   : > { %1980 = vst.msk [vmem:[#allocation3 + $0x10] sm:$0xff] %vm1978_vm8, %v4103_v39  ;;  %v929_v0 = vpop.permute.xlu0 %928 }
 0x1b3   : > { %787 = vst.msk [vmem:[#allocation2 + $0x189] sm:$0xff] %vm699_vm1, %v698_v1  ;;  %785 = vst.msk [vmem:[#allocation2 + $0x171] sm:$0xff] %vm699_vm1, %v696_v48  ;;  %v1116_v60 = vpop.permute.xlu1 %1115  ;;  %v871_v1 = vld [vmem:[#allocation2 + $0xe1] sm:$0xff]  ;;  %v2337_v48 = vpack.c.bf16 %v2279_v3, %v2277_v32 }
 0x1b4   : > { %2173 = vst.msk [vmem:[#allocation3 + $0x10] sm:$0xff] %vm2171_vm9, %v4114_v14  ;;  %1338 = vrot.lane.b32.xlu0 %v3920_v4, %s3425_s11  ;;  %v2273_v4 = vld [vmem:[#allocation3 + $0x28] sm:$0xff] }
 0x1b5   : > { %1019 = vst.msk [vmem:[#allocation3 + $0x60] sm:$0xff] %vm1012_vm3, %v929_v0  ;;  %1916 = vrot.lane.b32.xlu1 %v3934_v24, %s3422_s7  ;;  %v2335_v7 = vpack.c.bf16 %v2275_v2, %v2273_v4 }
 0x1b6   : > { %1209 = vst.msk [vmem:[#allocation3 + $0x30] sm:$0xff] %vm1205_vm4, %v1116_v60  ;;  %v1887_v39 = vpop.permute.xlu0 %1886 }
 0x1b7   : > { %1402 = vst.msk [vmem:[#allocation3 + $0x30] sm:$0xff] %vm1398_vm5, %v4129_v42  ;;  %v935_v14 = vpop.permute.xlu1 %934  ;;  %v2268_v42 = vld [vmem:[#allocation3] sm:$0xff] }
 0x1b8   : > { %1595 = vst.msk [vmem:[#allocation3 + $0x30] sm:$0xff] %vm1591_vm6, %v4136_v62  ;;  %1531 = vrot.lane.b32.xlu0 %v872_v22, %s3426_s14  ;;  %v4210_v62 = vld [vmem:[#allocation2 + $0x168] sm:$0xff] }
 0x1b9   : > { %1788 = vst.msk [vmem:[#allocation3 + $0x30] sm:$0xff] %vm1784_vm7, %v4143_v41  ;;  %2109 = vrot.lane.b32.xlu1 %v873_v11, %s3423_s8 }
 0x1ba   : > { %1981 = vst.msk [vmem:[#allocation3 + $0x20] sm:$0xff] %vm1978_vm8, %v1887_v39  ;;  %v2080_v58 = vpop.permute.xlu0 %2079  ;;  %v4212_v38 = vld [vmem:[#allocation2 + $0x170] sm:$0xff]  ;;  %v4230_v45 = vld [vmem:[#allocation2 + $0x182] sm:$0xff] }
 0x1bb   : > { %1022 = vst.msk [vmem:[#allocation3 + $0x90] sm:$0xff] %vm1012_vm3, %v935_v14  ;;  %v2270_v49 = vld [vmem:[#allocation3 + $0x10] sm:$0xff]  ;;  %v931_v41 = vpop.permute.xlu1 %930  ;;  %v4215_v61 = vld [vmem:[#allocation2 + $0x16a] sm:$0xff]  ;;  %v4223_v5 = vld [vmem:[#allocation2 + $0x172] sm:$0xff] }
 0x1bc   : > { %v2332_v15 = vpack.c.bf16 %v2270_v49, %v2268_v42  ;;  %2174 = vst.msk [vmem:[#allocation3 + $0x20] sm:$0xff] %vm2171_vm9, %v2080_v58  ;;  %952 = vrot.lane.b32.xlu0 %v870_v40, %s3420_s28  ;;  %v4232_v43 = vld [vmem:[#allocation2 + $0x18a] sm:$0xff]  ;;  %v2031_v49 = vld [vmem:[#allocation2 + $0x121] sm:$0xff] }
 0x1bd   : > { %850 = vst.msk [vmem:[#allocation3 + $0x1e0] sm:$0xff] %vm699_vm1, %v4210_v62  ;;  %851 = vst.msk [vmem:[#allocation3 + $0x1f0] sm:$0xff] %vm699_vm1, %v4212_v38  ;;  %1340 = vrot.lane.b32.xlu1 %v3934_v24, %s3425_s11 }
 0x1be   : > { %1020 = vst.msk [vmem:[#allocation3 + $0x70] sm:$0xff] %vm1012_vm3, %v931_v41  ;;  %2524 = vmatmul.mubr.bf16.vlgmr.msra.gmra.mrb[32].mxu0 %v2332_v15  ;;  %v1311_v22 = vpop.permute.xlu0 %1310 }
 0x1bf   : > { %2262 = vst.msk [vmem:[#allocation3 + $0x1a8] sm:$0xff] %vm699_vm1, %v4215_v61  ;;  %3002 = vmatprep.mubr.msk.bf16.mxu0 %vm699_vm1, %v2335_v7  ;;  %2263 = vst.msk [vmem:[#allocation3 + $0x1b8] sm:$0xff] %vm699_vm1, %v4223_v5  ;;  %v1889_v59 = vpop.permute.xlu1 %1888 }
 0x1c0   : > { %2264 = vst.msk [vmem:[#allocation3 + $0x1c8] sm:$0xff] %vm699_vm1, %v4230_v45  ;;  %2265 = vst.msk [vmem:[#allocation3 + $0x1d8] sm:$0xff] %vm699_vm1, %v4232_v43  ;;  %1910 = vrot.lane.b32.xlu0 %v3922_v12, %s3422_s7 }
 0x1c1   : > { %1403 = vst.msk [vmem:[#allocation3 + $0x40] sm:$0xff] %vm1398_vm5, %v1311_v22  ;;  %1533 = vrot.lane.b32.xlu1 %v873_v11, %s3426_s14 }
 0x1c2   : > { %1982 = vst.msk [vmem:[#allocation3 + $0x30] sm:$0xff] %vm1978_vm8, %v1889_v59  ;;  %v1504_v24 = vpop.permute.xlu0 %1503 }
 0x1c3   : > { %1596 = vst.msk [vmem:[#allocation3 + $0x40] sm:$0xff] %vm1591_vm6, %v1504_v24  ;;  %v2082_v19 = vpop.permute.xlu1 %2081  ;;  %v2272_v56 = vld [vmem:[#allocation3 + $0x20] sm:$0xff] }
 0x1c4   : > { %2175 = vst.msk [vmem:[#allocation3 + $0x30] sm:$0xff] %vm2171_vm9, %v2082_v19  ;;  %2103 = vrot.lane.b32.xlu0 %v870_v40, %s3423_s8  ;;  %v874_v24 = vld [vmem:[#allocation2 + $0x109] sm:$0xff] }
 0x1c5   : > { %1726 = vrot.lane.b32.xlu1 %v3936_v13, %s3427_s23 }
 0x1c6   : > { %v941_v10 = vpop.permute.xlu0 %940 }
 0x1c7   : > { %1025 = vst.msk [vmem:[#allocation3 + $0xc0] sm:$0xff] %vm1012_vm3, %v941_v10  ;;  %v1313_v20 = vpop.permute.xlu1 %1312 }
 0x1c8   : > { %1404 = vst.msk [vmem:[#allocation3 + $0x50] sm:$0xff] %vm1398_vm5, %v1313_v20  ;;  %1334 = vrot.lane.b32.xlu0 %v3922_v12, %s3425_s11 }
 0x1c9   : > { %1151 = vrot.lane.b32.xlu1 %v3936_v13, %s3421_s29 }
 0x1ca   : > { %v1323_v9 = vpop.permute.xlu0 %1322 }
 0x1cb   : > { %v1506_v35 = vpop.permute.xlu1 %1505  ;;  %v2274_v63 = vld [vmem:[#allocation3 + $0x30] sm:$0xff] }
 0x1cc   : > { %1597 = vst.msk [vmem:[#allocation3 + $0x50] sm:$0xff] %vm1591_vm6, %v1506_v35  ;;  %1527 = vrot.lane.b32.xlu0 %v870_v40, %s3426_s14  ;;  %v2334_v11 = vpack.c.bf16 %v2274_v63, %v2272_v56  ;;  %v875_v56 = vld [vmem:[#allocation2 + $0x111] sm:$0xff] }
 0x1cd   : > { %954 = vrot.lane.b32.xlu1 %v871_v1, %s3420_s28 }
 0x1ce   : > { %v1516_v0 = vpop.permute.xlu0 %1515  ;;  %2532 = vmatmul.mubr.bf16.gmra.mrb[36].mxu0 %v2334_v11 }
 0x1cf   : > { %v943_v12 = vpop.permute.xlu1 %942  ;;  %3003 = vmatprep.mubr.msk.bf16.mxu0 %vm699_vm1, %v2337_v48 }
 0x1d0   : > { %1026 = vst.msk [vmem:[#allocation3 + $0xd0] sm:$0xff] %vm1012_vm3, %v943_v12  ;;  %1724 = vrot.lane.b32.xlu0 %v3940_v26, %s3427_s23 }
 0x1d1   : > { %1912 = vrot.lane.b32.xlu1 %v3942_v27, %s3422_s7 }
 0x1d2   : > { %v937_v13 = vpop.permute.xlu0 %936 }
 0x1d3   : > { %1023 = vst.msk [vmem:[#allocation3 + $0xa0] sm:$0xff] %vm1012_vm3, %v937_v13  ;;  %v1325_v60 = vpop.permute.xlu1 %1324  ;;  %v2293_v13 = vld [vmem:[#allocation3 + $0xc8] sm:$0xff] }
 0x1d4   : > { %1149 = vrot.lane.b32.xlu0 %v3940_v26, %s3421_s29 }
 0x1d5   : > { %2105 = vrot.lane.b32.xlu1 %v871_v1, %s3423_s8 }
 0x1d6   : > { %v1709_v39 = vpop.permute.xlu0 %1708 }
 0x1d7   : > { %v1518_v14 = vpop.permute.xlu1 %1517 }
 0x1d8   : > { %1720 = vrot.lane.b32.xlu0 %v3949_v30, %s3427_s23 }
 0x1d9   : > { %1336 = vrot.lane.b32.xlu1 %v3942_v27, %s3425_s11 }
 0x1da   : > { %v1134_v4 = vpop.permute.xlu0 %1133 }
 0x1db   : > { %1218 = vst.msk [vmem:[#allocation3 + $0xc0] sm:$0xff] %vm1205_vm4, %v1134_v4  ;;  %v1711_v2 = vpop.permute.xlu1 %1710 }
 0x1dc   : > { %1145 = vrot.lane.b32.xlu0 %v3949_v30, %s3421_s29 }
 0x1dd   : > { %1529 = vrot.lane.b32.xlu1 %v871_v1, %s3426_s14 }
 0x1de   : > { %v1130_v26 = vpop.permute.xlu0 %1129 }
 0x1df   : > { %1216 = vst.msk [vmem:[#allocation3 + $0xa0] sm:$0xff] %vm1205_vm4, %v1130_v26  ;;  %v1136_v42 = vpop.permute.xlu1 %1135 }
 0x1e0   : > { %1409 = vst.msk [vmem:[#allocation3 + $0xa0] sm:$0xff] %vm1398_vm5, %v1323_v9  ;;  %1922 = vrot.lane.b32.xlu0 %v3985_v21, %s3422_s7 }
 0x1e1   : > { %1219 = vst.msk [vmem:[#allocation3 + $0xd0] sm:$0xff] %vm1205_vm4, %v1136_v42  ;;  %1722 = vrot.lane.b32.xlu1 %v3951_v31, %s3427_s23 }
 0x1e2   : > { %1602 = vst.msk [vmem:[#allocation3 + $0xa0] sm:$0xff] %vm1591_vm6, %v1516_v0  ;;  %v949_v27 = vpop.permute.xlu0 %948 }
 0x1e3   : > { %1795 = vst.msk [vmem:[#allocation3 + $0xa0] sm:$0xff] %vm1784_vm7, %v1709_v39  ;;  %v939_v30 = vpop.permute.xlu1 %938  ;;  %v1842_v39 = vld [vmem:[#allocation2 + $0x150] sm:$0xff] }
 0x1e4   : > { %1029 = vst.msk [vmem:[#allocation3 + $0x100] sm:$0xff] %vm1012_vm3, %v949_v27  ;;  %1024 = vst.msk [vmem:[#allocation3 + $0xb0] sm:$0xff] %vm1012_vm3, %v939_v30  ;;  %2115 = vrot.lane.b32.xlu0 %v2031_v49, %s3423_s8  ;;  %v4376_v27 = vld [vmem:[#allocation2 + $0x151] sm:$0xff] }
 0x1e5   : > { %1147 = vrot.lane.b32.xlu1 %v3951_v31, %s3421_s29  ;;  %v2032_v31 = vld [vmem:[#allocation2 + $0x129] sm:$0xff] }
 0x1e6   : > { %v4291_v58 = vpop.permute.xlu0 %1906 }
 0x1e7   : > { %v1132_v15 = vpop.permute.xlu1 %1131 }
 0x1e8   : > { %1217 = vst.msk [vmem:[#allocation3 + $0xb0] sm:$0xff] %vm1205_vm4, %v1132_v15  ;;  %1346 = vrot.lane.b32.xlu0 %v3985_v21, %s3425_s11  ;;  %v4404_v15 = vld [vmem:[#allocation2 + $0x159] sm:$0xff] }
 0x1e9   : > { %1410 = vst.msk [vmem:[#allocation3 + $0xb0] sm:$0xff] %vm1398_vm5, %v1325_v60  ;;  %1924 = vrot.lane.b32.xlu1 %v3987_v50, %s3422_s7  ;;  %v2295_v60 = vld [vmem:[#allocation3 + $0xd8] sm:$0xff] }
 0x1ea   : > { %1603 = vst.msk [vmem:[#allocation3 + $0xb0] sm:$0xff] %vm1591_vm6, %v1518_v14  ;;  %v2100_v41 = vpop.permute.xlu0 %2099 }
 0x1eb   : > { %1796 = vst.msk [vmem:[#allocation3 + $0xb0] sm:$0xff] %vm1784_vm7, %v1711_v2  ;;  %v951_v40 = vpop.permute.xlu1 %950  ;;  %v2345_v2 = vpack.c.bf16 %v2295_v60, %v2293_v13 }
 0x1ec   : > { %1030 = vst.msk [vmem:[#allocation3 + $0x110] sm:$0xff] %vm1012_vm3, %v951_v40  ;;  %1539 = vrot.lane.b32.xlu0 %v2031_v49, %s3426_s14  ;;  %v2299_v40 = vld [vmem:[#allocation3 + $0xf8] sm:$0xff] }
 0x1ed   : > { %2117 = vrot.lane.b32.xlu1 %v2032_v31, %s3423_s8 }
 0x1ee   : > { %v4304_v7 = vpop.permute.xlu0 %1330 }
 0x1ef   : > { %v4306_v21 = vpop.permute.xlu1 %1908 }
 0x1f0   : > { %964 = vrot.lane.b32.xlu0 %v2031_v49, %s3420_s28 }
 0x1f1   : > { %1348 = vrot.lane.b32.xlu1 %v3987_v50, %s3425_s11 }
 0x1f2   : > { %v4311_v22 = vpop.permute.xlu0 %1523 }
 0x1f3   : > { %v4313_v59 = vpop.permute.xlu1 %2101 }
 0x1f4   : > { %960 = vrot.lane.b32.xlu0 %v874_v24, %s3420_s28 }
 0x1f5   : > { %1541 = vrot.lane.b32.xlu1 %v2032_v31, %s3426_s14 }
 0x1f6   : > { %v945_v19 = vpop.permute.xlu0 %944 }
 0x1f7   : > { %1027 = vst.msk [vmem:[#allocation3 + $0xe0] sm:$0xff] %vm1012_vm3, %v945_v19  ;;  %v4318_v10 = vpop.permute.xlu1 %1332 }
 0x1f8   : > { %1918 = vrot.lane.b32.xlu0 %v3991_v25, %s3422_s7 }
 0x1f9   : > { %1734 = vrot.lane.b32.xlu1 %v3999_v51, %s3427_s23 }
 0x1fa   : > { %v1903_v50 = vpop.permute.xlu0 %1902 }
 0x1fb   : > { %1989 = vst.msk [vmem:[#allocation3 + $0xa0] sm:$0xff] %vm1978_vm8, %v1903_v50  ;;  %v4325_v20 = vpop.permute.xlu1 %1525 }
 0x1fc   : > { %2111 = vrot.lane.b32.xlu0 %v874_v24, %s3423_s8 }
 0x1fd   : > { %966 = vrot.lane.b32.xlu1 %v2032_v31, %s3420_s28 }
 0x1fe   : > { %v2096_v9 = vpop.permute.xlu0 %2095 }
 0x1ff   : > { %2182 = vst.msk [vmem:[#allocation3 + $0xa0] sm:$0xff] %vm2171_vm9, %v2096_v9  ;;  %v4330_v32 = vpop.permute.xlu1 %1718 }
 0x200   : > { %1342 = vrot.lane.b32.xlu0 %v3991_v25, %s3425_s11 }
 0x201   : > { %1159 = vrot.lane.b32.xlu1 %v3999_v51, %s3421_s29 }
 0x202   : > { %v1327_v3 = vpop.permute.xlu0 %1326 }
 0x203   : > { %1411 = vst.msk [vmem:[#allocation3 + $0xc0] sm:$0xff] %vm1398_vm5, %v1327_v3  ;;  %v1144_v35 = vpop.permute.xlu1 %1143 }
 0x204   : > { %1223 = vst.msk [vmem:[#allocation3 + $0x110] sm:$0xff] %vm1205_vm4, %v1144_v35  ;;  %1535 = vrot.lane.b32.xlu0 %v874_v24, %s3426_s14  ;;  %v2033_v24 = vld [vmem:[#allocation2 + $0x139] sm:$0xff] }
 0x205   : > { %962 = vrot.lane.b32.xlu1 %v875_v56, %s3420_s28 }
 0x206   : > { %v1520_v63 = vpop.permute.xlu0 %1519  ;;  %v2288_v14 = vld [vmem:[#allocation3 + $0xa0] sm:$0xff] }
 0x207   : > { %1604 = vst.msk [vmem:[#allocation3 + $0xc0] sm:$0xff] %vm1591_vm6, %v1520_v63  ;;  %v947_v1 = vpop.permute.xlu1 %946 }
 0x208   : > { %1028 = vst.msk [vmem:[#allocation3 + $0xf0] sm:$0xff] %vm1012_vm3, %v947_v1  ;;  %1732 = vrot.lane.b32.xlu0 %v4001_v53, %s3427_s23 }
 0x209   : > { %1920 = vrot.lane.b32.xlu1 %v4005_v16, %s3422_s7 }
 0x20a   : > { %v1717_v25 = vpop.permute.xlu0 %1716 }
 0x20b   : > { %v1905_v51 = vpop.permute.xlu1 %1904 }
 0x20c   : > { %1990 = vst.msk [vmem:[#allocation3 + $0xb0] sm:$0xff] %vm1978_vm8, %v1905_v51  ;;  %1157 = vrot.lane.b32.xlu0 %v4001_v53, %s3421_s29 }
 0x20d   : > { %2113 = vrot.lane.b32.xlu1 %v875_v56, %s3423_s8 }
 0x20e   : > { %v1142_v11 = vpop.permute.xlu0 %1141 }
 0x20f   : > { %1222 = vst.msk [vmem:[#allocation3 + $0x100] sm:$0xff] %vm1205_vm4, %v1142_v11  ;;  %v2098_v48 = vpop.permute.xlu1 %2097 }
 0x210   : > { %2183 = vst.msk [vmem:[#allocation3 + $0xb0] sm:$0xff] %vm2171_vm9, %v2098_v48  ;;  %1728 = vrot.lane.b32.xlu0 %v4007_v34, %s3427_s23 }
 0x211   : > { %1344 = vrot.lane.b32.xlu1 %v4005_v16, %s3425_s11 }
 0x212   : > { %v1713_v0 = vpop.permute.xlu0 %1712 }
 0x213   : > { %1797 = vst.msk [vmem:[#allocation3 + $0xc0] sm:$0xff] %vm1784_vm7, %v1713_v0  ;;  %v1329_v12 = vpop.permute.xlu1 %1328 }
 0x214   : > { %1991 = vst.msk [vmem:[#allocation3 + $0xc0] sm:$0xff] %vm1978_vm8, %v4291_v58  ;;  %1153 = vrot.lane.b32.xlu0 %v4007_v34, %s3421_s29 }
 0x215   : > { %1412 = vst.msk [vmem:[#allocation3 + $0xd0] sm:$0xff] %vm1398_vm5, %v1329_v12  ;;  %1537 = vrot.lane.b32.xlu1 %v875_v56, %s3426_s14  ;;  %v2301_v12 = vld [vmem:[#allocation3 + $0x108] sm:$0xff] }
 0x216   : > { %2184 = vst.msk [vmem:[#allocation3 + $0xc0] sm:$0xff] %vm2171_vm9, %v2100_v41  ;;  %v1138_v53 = vpop.permute.xlu0 %1137  ;;  %v2297_v41 = vld [vmem:[#allocation3 + $0xe8] sm:$0xff] }
 0x217   : > { %1220 = vst.msk [vmem:[#allocation3 + $0xe0] sm:$0xff] %vm1205_vm4, %v1138_v53  ;;  %v1522_v16 = vpop.permute.xlu1 %1521  ;;  %v2290_v4 = vld [vmem:[#allocation3 + $0xb0] sm:$0xff]  ;;  %v2347_v19 = vpack.c.bf16 %v2299_v40, %v2297_v41  ;;  %v2303_v53 = vld [vmem:[#allocation3 + $0x118] sm:$0xff] }
 0x218   : > { %1413 = vst.msk [vmem:[#allocation3 + $0xe0] sm:$0xff] %vm1398_vm5, %v4304_v7  ;;  %1930 = vrot.lane.b32.xlu0 %v1842_v39, %s3422_s7  ;;  %v2342_v34 = vpack.c.bf16 %v2290_v4, %v2288_v14  ;;  %v2015_v4 = vld [vmem:[#allocation2 + $0x61] sm:$0xff] }
 0x219   : > { %1605 = vst.msk [vmem:[#allocation3 + $0xd0] sm:$0xff] %vm1591_vm6, %v1522_v16  ;;  %1606 = vst.msk [vmem:[#allocation3 + $0xe0] sm:$0xff] %vm1591_vm6, %v4311_v22  ;;  %1730 = vrot.lane.b32.xlu1 %v4009_v54, %s3427_s23 }
 0x21a   : > { %1799 = vst.msk [vmem:[#allocation3 + $0xe0] sm:$0xff] %vm1784_vm7, %v1717_v25  ;;  %v957_v26 = vpop.permute.xlu0 %956  ;;  %2564 = vmatmul.mubr.bf16.vlgmr.msra.gmra.mrb[0].mxu1 %v2342_v34 }
 0x21b   : > { %1033 = vst.msk [vmem:[#allocation3 + $0x140] sm:$0xff] %vm1012_vm3, %v957_v26  ;;  %3007 = vmatprep.mubr.msk.bf16.mxu1 %vm699_vm1, %v2345_v2  ;;  %v1715_v42 = vpop.permute.xlu1 %1714  ;;  %v4494_v26 = vld [vmem:[#allocation2 + $0x169] sm:$0xff] }
 0x21c   : > { %1798 = vst.msk [vmem:[#allocation3 + $0xd0] sm:$0xff] %vm1784_vm7, %v1715_v42  ;;  %2123 = vrot.lane.b32.xlu0 %v4376_v27, %s3423_s8 }
 0x21d   : > { %1992 = vst.msk [vmem:[#allocation3 + $0xd0] sm:$0xff] %vm1978_vm8, %v4306_v21  ;;  %1155 = vrot.lane.b32.xlu1 %v4009_v54, %s3421_s29  ;;  %v2292_v31 = vld [vmem:[#allocation3 + $0xc0] sm:$0xff] }
 0x21e   : > { %2185 = vst.msk [vmem:[#allocation3 + $0xd0] sm:$0xff] %vm2171_vm9, %v4313_v59  ;;  %v4387_v30 = vpop.permute.xlu0 %1914 }
 0x21f   : > { %v1140_v49 = vpop.permute.xlu1 %1139 }
 0x220   : > { %1221 = vst.msk [vmem:[#allocation3 + $0xf0] sm:$0xff] %vm1205_vm4, %v1140_v49  ;;  %1354 = vrot.lane.b32.xlu0 %v1842_v39, %s3425_s11  ;;  %v2305_v49 = vld [vmem:[#allocation3 + $0x128] sm:$0xff] }
 0x221   : > { %1414 = vst.msk [vmem:[#allocation3 + $0xf0] sm:$0xff] %vm1398_vm5, %v4318_v10  ;;  %1932 = vrot.lane.b32.xlu1 %v4062_v17, %s3422_s7 }
 0x222   : > { %1607 = vst.msk [vmem:[#allocation3 + $0xf0] sm:$0xff] %vm1591_vm6, %v4325_v20  ;;  %v4397_v54 = vpop.permute.xlu0 %2107 }
 0x223   : > { %1800 = vst.msk [vmem:[#allocation3 + $0xf0] sm:$0xff] %vm1784_vm7, %v4330_v32  ;;  %v959_v58 = vpop.permute.xlu1 %958  ;;  %v2034_v32 = vld [vmem:[#allocation2 + $0x141] sm:$0xff] }
 0x224   : > { %1034 = vst.msk [vmem:[#allocation3 + $0x150] sm:$0xff] %vm1012_vm3, %v959_v58  ;;  %1926 = vrot.lane.b32.xlu0 %v4066_v6, %s3422_s7 }
 0x225   : > { %2125 = vrot.lane.b32.xlu1 %v4404_v15, %s3423_s8  ;;  %v2294_v7 = vld [vmem:[#allocation3 + $0xd0] sm:$0xff] }
 0x226   : > { %v4408_v21 = vpop.permute.xlu0 %1338  ;;  %v2344_v22 = vpack.c.bf16 %v2294_v7, %v2292_v31 }
 0x227   : > { %v4410_v59 = vpop.permute.xlu1 %1916 }
 0x228   : > { %2119 = vrot.lane.b32.xlu0 %v2033_v24, %s3423_s8  ;;  %2572 = vmatmul.mubr.bf16.gmra.mrb[4].mxu1 %v2344_v22  ;;  %v4520_v22 = vld [vmem:[#allocation2 + $0x171] sm:$0xff] }
 0x229   : > { %1356 = vrot.lane.b32.xlu1 %v4062_v17, %s3425_s11  ;;  %3008 = vmatprep.mubr.msk.bf16.mxu1 %vm699_vm1, %v2347_v19  ;;  %v1244_v19 = vld [vmem:[#allocation2 + $0x60] sm:$0xff] }
 0x22a   : > { %v1532_v10 = vpop.permute.xlu0 %1531 }
 0x22b   : > { %v4416_v50 = vpop.permute.xlu1 %2109 }
 0x22c   : > { %1350 = vrot.lane.b32.xlu0 %v4066_v6, %s3425_s11 }
 0x22d   : > { %1928 = vrot.lane.b32.xlu1 %v4072_v36, %s3422_s7 }
 0x22e   : > { %v953_v20 = vpop.permute.xlu0 %952 }
 0x22f   : > { %1031 = vst.msk [vmem:[#allocation3 + $0x120] sm:$0xff] %vm1012_vm3, %v953_v20  ;;  %v4423_v9 = vpop.permute.xlu1 %1340 }
 0x230   : > { %1543 = vrot.lane.b32.xlu0 %v2033_v24, %s3426_s14 }
 0x231   : > { %2121 = vrot.lane.b32.xlu1 %v2034_v32, %s3423_s8 }
 0x232   : > { %v1911_v17 = vpop.permute.xlu0 %1910 }
 0x233   : > { %1993 = vst.msk [vmem:[#allocation3 + $0xe0] sm:$0xff] %vm1978_vm8, %v1911_v17  ;;  %v4428_v3 = vpop.permute.xlu1 %1533 }
 0x234   : > { %968 = vrot.lane.b32.xlu0 %v2033_v24, %s3420_s28 }
 0x235   : > { %1352 = vrot.lane.b32.xlu1 %v4072_v36, %s3425_s11 }
 0x236   : > { %v2104_v6 = vpop.permute.xlu0 %2103 }
 0x237   : > { %2186 = vst.msk [vmem:[#allocation3 + $0xe0] sm:$0xff] %vm2171_vm9, %v2104_v6  ;;  %v4434_v35 = vpop.permute.xlu1 %1726 }
 0x238   : > { %1736 = vrot.lane.b32.xlu0 %v4074_v23, %s3427_s23 }
 0x239   : > { %1545 = vrot.lane.b32.xlu1 %v2034_v32, %s3426_s14 }
 0x23a   : > { %v1335_v56 = vpop.permute.xlu0 %1334 }
 0x23b   : > { %1415 = vst.msk [vmem:[#allocation3 + $0x100] sm:$0xff] %vm1398_vm5, %v1335_v56  ;;  %v1152_v63 = vpop.permute.xlu1 %1151 }
 0x23c   : > { %1227 = vst.msk [vmem:[#allocation3 + $0x150] sm:$0xff] %vm1205_vm4, %v1152_v63  ;;  %1161 = vrot.lane.b32.xlu0 %v4074_v23, %s3421_s29 }
 0x23d   : > { %1738 = vrot.lane.b32.xlu1 %v4080_v8, %s3427_s23 }
 0x23e   : > { %v1528_v36 = vpop.permute.xlu0 %1527  ;;  %v2296_v60 = vld [vmem:[#allocation3 + $0xe0] sm:$0xff] }
 0x23f   : > { %1608 = vst.msk [vmem:[#allocation3 + $0x100] sm:$0xff] %vm1591_vm6, %v1528_v36  ;;  %v955_v1 = vpop.permute.xlu1 %954  ;;  %v4573_v36 = vld [vmem:[#allocation2 + $0x180] sm:$0xff] }
 0x240   : > { %1032 = vst.msk [vmem:[#allocation3 + $0x130] sm:$0xff] %vm1012_vm3, %v955_v1  ;;  %1547 = vrot.lane.b32.xlu0 %v4376_v27, %s3426_s14  ;;  %v2309_v1 = vld [vmem:[#allocation3 + $0x148] sm:$0xff] }
 0x241   : > { %970 = vrot.lane.b32.xlu1 %v2034_v32, %s3420_s28 }
 0x242   : > { %v1725_v25 = vpop.permute.xlu0 %1724 }
 0x243   : > { %v1913_v51 = vpop.permute.xlu1 %1912 }
 0x244   : > { %1994 = vst.msk [vmem:[#allocation3 + $0xf0] sm:$0xff] %vm1978_vm8, %v1913_v51  ;;  %1696 = vrot.lane.b32.xlu0 %v3766_v46, %s3427_s23 }
 0x245   : > { %1163 = vrot.lane.b32.xlu1 %v4080_v8, %s3421_s29 }
 0x246   : > { %v1150_v23 = vpop.permute.xlu0 %1149 }
 0x247   : > { %1226 = vst.msk [vmem:[#allocation3 + $0x140] sm:$0xff] %vm1205_vm4, %v1150_v23  ;;  %v2106_v11 = vpop.permute.xlu1 %2105  ;;  %v4585_v23 = vld [vmem:[#allocation2 + $0x79] sm:$0xff] }
 0x248   : > { %2187 = vst.msk [vmem:[#allocation3 + $0xf0] sm:$0xff] %vm2171_vm9, %v2106_v11  ;;  %1740 = vrot.lane.b32.xlu0 %v4082_v28, %s3427_s23 }
 0x249   : > { %1549 = vrot.lane.b32.xlu1 %v4404_v15, %s3426_s14 }
 0x24a   : > { %v1721_v48 = vpop.permute.xlu0 %1720 }
 0x24b   : > { %1801 = vst.msk [vmem:[#allocation3 + $0x100] sm:$0xff] %vm1784_vm7, %v1721_v48  ;;  %v1337_v0 = vpop.permute.xlu1 %1336 }
 0x24c   : > { %1995 = vst.msk [vmem:[#allocation3 + $0x100] sm:$0xff] %vm1978_vm8, %v4387_v30  ;;  %1890 = vrot.lane.b32.xlu0 %v3734_v29, %s3422_s7  ;;  %v2016_v30 = vld [vmem:[#allocation2 + $0x69] sm:$0xff] }
 0x24d   : > { %1416 = vst.msk [vmem:[#allocation3 + $0x110] sm:$0xff] %vm1398_vm5, %v1337_v0  ;;  %1698 = vrot.lane.b32.xlu1 %v3768_v44, %s3427_s23  ;;  %v2349_v44 = vpack.c.bf16 %v2303_v53, %v2301_v12 }
 0x24e   : > { %2188 = vst.msk [vmem:[#allocation3 + $0x100] sm:$0xff] %vm2171_vm9, %v4397_v54  ;;  %v1146_v8 = vpop.permute.xlu0 %1145  ;;  %v2307_v54 = vld [vmem:[#allocation3 + $0x138] sm:$0xff] }
 0x24f   : > { %1224 = vst.msk [vmem:[#allocation3 + $0x120] sm:$0xff] %vm1205_vm4, %v1146_v8  ;;  %v1530_v13 = vpop.permute.xlu1 %1529  ;;  %v2298_v16 = vld [vmem:[#allocation3 + $0xf0] sm:$0xff] }
 0x250   : > { %1417 = vst.msk [vmem:[#allocation3 + $0x120] sm:$0xff] %vm1398_vm5, %v4408_v21  ;;  %1934 = vrot.lane.b32.xlu0 %v4210_v62, %s3422_s7  ;;  %v2346_v29 = vpack.c.bf16 %v2298_v16, %v2296_v60  ;;  %v2351_v21 = vpack.c.bf16 %v2307_v54, %v2305_v49  ;;  %v4605_v60 = vld [vmem:[#allocation2 + $0x188] sm:$0xff] }
 0x251   : > { %1609 = vst.msk [vmem:[#allocation3 + $0x110] sm:$0xff] %vm1591_vm6, %v1530_v13  ;;  %1610 = vst.msk [vmem:[#allocation3 + $0x120] sm:$0xff] %vm1591_vm6, %v1532_v10  ;;  %1742 = vrot.lane.b32.xlu1 %v4084_v55, %s3427_s23  ;;  %v1052_v10 = vld [vmem:[#allocation2 + $0x52] sm:$0xff]  ;;  %v4600_v13 = vld [vmem:[#allocation2 + $0x181] sm:$0xff] }
 0x252   : > { %1803 = vst.msk [vmem:[#allocation3 + $0x120] sm:$0xff] %vm1784_vm7, %v1725_v25  ;;  %v4481_v39 = vpop.permute.xlu0 %1922  ;;  %2580 = vmatmul.mubr.bf16.gmra.mrb[8].mxu1 %v2346_v29  ;;  %v2311_v25 = vld [vmem:[#allocation3 + $0x158] sm:$0xff] }
 0x253   : > { %3009 = vmatprep.mubr.msk.bf16.mxu1 %vm699_vm1, %v2349_v44  ;;  %v1723_v14 = vpop.permute.xlu1 %1722  ;;  %v2353_v8 = vpack.c.bf16 %v2311_v25, %v2309_v1  ;;  %v1053_v49 = vld [vmem:[#allocation2 + $0x62] sm:$0xff] }
 0x254   : > { %1802 = vst.msk [vmem:[#allocation3 + $0x110] sm:$0xff] %vm1784_vm7, %v1723_v14  ;;  %2083 = vrot.lane.b32.xlu0 %v2015_v4, %s3423_s8 }
 0x255   : > { %1996 = vst.msk [vmem:[#allocation3 + $0x110] sm:$0xff] %vm1978_vm8, %v4410_v59  ;;  %1892 = vrot.lane.b32.xlu1 %v3753_v37, %s3422_s7  ;;  %v2300_v58 = vld [vmem:[#allocation3 + $0x100] sm:$0xff] }
 0x256   : > { %2189 = vst.msk [vmem:[#allocation3 + $0x110] sm:$0xff] %vm2171_vm9, %v4416_v50  ;;  %v4492_v34 = vpop.permute.xlu0 %2115 }
 0x257   : > { %v1148_v2 = vpop.permute.xlu1 %1147 }
 0x258   : > { %1225 = vst.msk [vmem:[#allocation3 + $0x130] sm:$0xff] %vm1205_vm4, %v1148_v2  ;;  %2127 = vrot.lane.b32.xlu0 %v4494_v26, %s3423_s8 }
 0x259   : > { %1418 = vst.msk [vmem:[#allocation3 + $0x130] sm:$0xff] %vm1398_vm5, %v4423_v9  ;;  %1936 = vrot.lane.b32.xlu1 %v4212_v38, %s3422_s7  ;;  %v1245_v9 = vld [vmem:[#allocation2 + $0x68] sm:$0xff] }
 0x25a   : > { %1611 = vst.msk [vmem:[#allocation3 + $0x130] sm:$0xff] %vm1591_vm6, %v4428_v3  ;;  %v4505_v37 = vpop.permute.xlu0 %1346 }
 0x25b   : > { %1804 = vst.msk [vmem:[#allocation3 + $0x130] sm:$0xff] %vm1784_vm7, %v4434_v35  ;;  %v4509_v42 = vpop.permute.xlu1 %1924 }
 0x25c   : > { %972 = vrot.lane.b32.xlu0 %v4376_v27, %s3420_s28 }
 0x25d   : > { %2085 = vrot.lane.b32.xlu1 %v2016_v30, %s3423_s8  ;;  %v2302_v41 = vld [vmem:[#allocation3 + $0x110] sm:$0xff] }
 0x25e   : > { %v4514_v40 = vpop.permute.xlu0 %1539  ;;  %v2348_v31 = vpack.c.bf16 %v2302_v41, %v2300_v58  ;;  %v4646_v41 = vld [vmem:[#allocation2 + $0x189] sm:$0xff] }
 0x25f   : > { %v4516_v7 = vpop.permute.xlu1 %2117 }
 0x260   : > { %1121 = vrot.lane.b32.xlu0 %v3766_v46, %s3421_s29  ;;  %2588 = vmatmul.mubr.bf16.gmra.mrb[12].mxu1 %v2348_v31  ;;  %v2315_v31 = vld [vmem:[#allocation3 + $0x178] sm:$0xff] }
 0x261   : > { %2129 = vrot.lane.b32.xlu1 %v4520_v22, %s3423_s8  ;;  %3010 = vmatprep.mubr.msk.bf16.mxu1 %vm699_vm1, %v2351_v21 }
 0x262   : > { %v965_v27 = vpop.permute.xlu0 %964 }
 0x263   : > { %1037 = vst.msk [vmem:[#allocation3 + $0x180] sm:$0xff] %vm1012_vm3, %v965_v27  ;;  %v4526_v59 = vpop.permute.xlu1 %1348 }
 0x264   : > { %1165 = vrot.lane.b32.xlu0 %v4082_v28, %s3421_s29 }
 0x265   : > { %974 = vrot.lane.b32.xlu1 %v4404_v15, %s3420_s28 }
 0x266   : > { %v961_v46 = vpop.permute.xlu0 %960 }
 0x267   : > { %1035 = vst.msk [vmem:[#allocation3 + $0x160] sm:$0xff] %vm1012_vm3, %v961_v46  ;;  %v4533_v24 = vpop.permute.xlu1 %1541 }
 0x268   : > { %1314 = vrot.lane.b32.xlu0 %v1244_v19, %s3425_s11 }
 0x269   : > { %1123 = vrot.lane.b32.xlu1 %v1052_v10, %s3421_s29 }
 0x26a   : > { %v1919_v50 = vpop.permute.xlu0 %1918 }
 0x26b   : > { %1997 = vst.msk [vmem:[#allocation3 + $0x120] sm:$0xff] %vm1978_vm8, %v1919_v50  ;;  %v4538_v20 = vpop.permute.xlu1 %1734 }
 0x26c   : > { %1358 = vrot.lane.b32.xlu0 %v4210_v62, %s3425_s11 }
 0x26d   : > { %1167 = vrot.lane.b32.xlu1 %v4084_v55, %s3421_s29 }
 0x26e   : > { %v2112_v28 = vpop.permute.xlu0 %2111 }
 0x26f   : > { %2190 = vst.msk [vmem:[#allocation3 + $0x120] sm:$0xff] %vm2171_vm9, %v2112_v28  ;;  %v967_v15 = vpop.permute.xlu1 %966 }
 0x270   : > { %1038 = vst.msk [vmem:[#allocation3 + $0x190] sm:$0xff] %vm1012_vm3, %v967_v15  ;;  %1507 = vrot.lane.b32.xlu0 %v2015_v4, %s3426_s14  ;;  %v4626_v4 = vld [vmem:[#allocation2 + $0x81] sm:$0xff] }
 0x271   : > { %1316 = vrot.lane.b32.xlu1 %v1245_v9, %s3425_s11 }
 0x272   : > { %v1343_v32 = vpop.permute.xlu0 %1342 }
 0x273   : > { %1419 = vst.msk [vmem:[#allocation3 + $0x140] sm:$0xff] %vm1398_vm5, %v1343_v32  ;;  %v1160_v17 = vpop.permute.xlu1 %1159 }
 0x274   : > { %1231 = vst.msk [vmem:[#allocation3 + $0x190] sm:$0xff] %vm1205_vm4, %v1160_v17  ;;  %1551 = vrot.lane.b32.xlu0 %v4494_v26, %s3426_s14 }
 0x275   : > { %1360 = vrot.lane.b32.xlu1 %v4212_v38, %s3425_s11 }
 0x276   : > { %v1536_v55 = vpop.permute.xlu0 %1535  ;;  %v2304_v11 = vld [vmem:[#allocation3 + $0x120] sm:$0xff] }
 0x277   : > { %1612 = vst.msk [vmem:[#allocation3 + $0x140] sm:$0xff] %vm1591_vm6, %v1536_v55  ;;  %v963_v62 = vpop.permute.xlu1 %962 }
 0x278   : > { %1036 = vst.msk [vmem:[#allocation3 + $0x170] sm:$0xff] %vm1012_vm3, %v963_v62  ;;  %1700 = vrot.lane.b32.xlu0 %v3770_v47, %s3427_s23  ;;  %v4568_v47 = vld [vmem:[#allocation2 + $0x6a] sm:$0xff] }
 0x279   : > { %1509 = vrot.lane.b32.xlu1 %v2016_v30, %s3426_s14 }
 0x27a   : > { %v1733_v3 = vpop.permute.xlu0 %1732 }
 0x27b   : > { %v1921_v6 = vpop.permute.xlu1 %1920 }
 0x27c   : > { %1998 = vst.msk [vmem:[#allocation3 + $0x130] sm:$0xff] %vm1978_vm8, %v1921_v6  ;;  %1744 = vrot.lane.b32.xlu0 %v4215_v61, %s3427_s23 }
 0x27d   : > { %1553 = vrot.lane.b32.xlu1 %v4520_v22, %s3426_s14 }
 0x27e   : > { %v1158_v38 = vpop.permute.xlu0 %1157 }
 0x27f   : > { %1230 = vst.msk [vmem:[#allocation3 + $0x180] sm:$0xff] %vm1205_vm4, %v1158_v38  ;;  %v2114_v35 = vpop.permute.xlu1 %2113 }
 0x280   : > { %2191 = vst.msk [vmem:[#allocation3 + $0x130] sm:$0xff] %vm2171_vm9, %v2114_v35  ;;  %1894 = vrot.lane.b32.xlu0 %v3813_v18, %s3422_s7 }
 0x281   : > { %1702 = vrot.lane.b32.xlu1 %v4568_v47, %s3427_s23 }
 0x282   : > { %v1729_v56 = vpop.permute.xlu0 %1728 }
 0x283   : > { %1805 = vst.msk [vmem:[#allocation3 + $0x140] sm:$0xff] %vm1784_vm7, %v1729_v56  ;;  %v1345_v63 = vpop.permute.xlu1 %1344  ;;  %v1247_v56 = vld [vmem:[#allocation2 + $0x80] sm:$0xff] }
 0x284   : > { %1999 = vst.msk [vmem:[#allocation3 + $0x140] sm:$0xff] %vm1978_vm8, %v4481_v39  ;;  %1938 = vrot.lane.b32.xlu0 %v4573_v36, %s3422_s7 }
 0x285   : > { %1420 = vst.msk [vmem:[#allocation3 + $0x150] sm:$0xff] %vm1398_vm5, %v1345_v63  ;;  %1746 = vrot.lane.b32.xlu1 %v4223_v5, %s3427_s23 }
 0x286   : > { %2192 = vst.msk [vmem:[#allocation3 + $0x140] sm:$0xff] %vm2171_vm9, %v4492_v34  ;;  %v1154_v18 = vpop.permute.xlu0 %1153 }
 0x287   : > { %1228 = vst.msk [vmem:[#allocation3 + $0x160] sm:$0xff] %vm1205_vm4, %v1154_v18  ;;  %v1538_v51 = vpop.permute.xlu1 %1537  ;;  %v2306_v48 = vld [vmem:[#allocation3 + $0x130] sm:$0xff] }
 0x288   : > { %1421 = vst.msk [vmem:[#allocation3 + $0x160] sm:$0xff] %vm1398_vm5, %v4505_v37  ;;  %2087 = vrot.lane.b32.xlu0 %v4585_v23, %s3423_s8  ;;  %v2350_v0 = vpack.c.bf16 %v2306_v48, %v2304_v11  ;;  %v2319_v11 = vld [vmem:[#allocation3 + $0x198] sm:$0xff] }
 0x289   : > { %1613 = vst.msk [vmem:[#allocation3 + $0x150] sm:$0xff] %vm1591_vm6, %v1538_v51  ;;  %1614 = vst.msk [vmem:[#allocation3 + $0x160] sm:$0xff] %vm1591_vm6, %v4514_v40  ;;  %1896 = vrot.lane.b32.xlu1 %v3843_v57, %s3422_s7  ;;  %v4614_v57 = vld [vmem:[%s4964_s4] ss:$0 sm:$0xff]  ;;  %v2313_v40 = vld [vmem:[#allocation3 + $0x168] sm:$0xff] }
 0x28a   : > { %1807 = vst.msk [vmem:[#allocation3 + $0x160] sm:$0xff] %vm1784_vm7, %v1733_v3  ;;  %v4597_v12 = vpop.permute.xlu0 %1930  ;;  %2596 = vmatmul.mubr.bf16.gmra.mrb[16].mxu1 %v2350_v0  ;;  %v2355_v19 = vpack.c.bf16 %v2315_v31, %v2313_v40  ;;  %v2321_v40 = vld [vmem:[#allocation3 + $0x1a8] sm:$0xff]  ;;  %v2323_v31 = vld [vmem:[#allocation3 + $0x1b8] sm:$0xff] }
 0x28b   : > { %3011 = vmatprep.mubr.msk.bf16.mxu1 %vm699_vm1, %v2353_v8  ;;  %v1731_v53 = vpop.permute.xlu1 %1730 }
 0x28c   : > { %1806 = vst.msk [vmem:[#allocation3 + $0x150] sm:$0xff] %vm1784_vm7, %v1731_v53  ;;  %2131 = vrot.lane.b32.xlu0 %v4600_v13, %s3423_s8 }
 0x28d   : > { %2000 = vst.msk [vmem:[#allocation3 + $0x150] sm:$0xff] %vm1978_vm8, %v4509_v42  ;;  %1940 = vrot.lane.b32.xlu1 %v4605_v60, %s3422_s7 }
 0x28e   : > { %2193 = vst.msk [vmem:[#allocation3 + $0x150] sm:$0xff] %vm2171_vm9, %v4516_v7  ;;  %v4618_v16 = vpop.permute.xlu0 %2123  ;;  %v2308_v7 = vld [vmem:[#allocation3 + $0x140] sm:$0xff] }
 0x28f   : > { %v1156_v44 = vpop.permute.xlu1 %1155 }
 0x290   : > { %1229 = vst.msk [vmem:[#allocation3 + $0x170] sm:$0xff] %vm1205_vm4, %v1156_v44  ;;  %976 = vrot.lane.b32.xlu0 %v4494_v26, %s3420_s28 }
 0x291   : > { %v2525_v29 = vpop.f32.mrb[32].mxu0  ;;  %1422 = vst.msk [vmem:[#allocation3 + $0x170] sm:$0xff] %vm1398_vm5, %v4526_v59  ;;  %2089 = vrot.lane.b32.xlu1 %v4626_v4, %s3423_s8 }
 0x292   : > { %v4621_v39 = vadd.f32 %v4614_v57, %v2525_v29  ;;  %v2527_v14 = vpop.f32.mrb[33].mxu0  ;;  %1615 = vst.msk [vmem:[#allocation3 + $0x170] sm:$0xff] %vm1591_vm6, %v4533_v24  ;;  %v4638_v42 = vpop.permute.xlu0 %1354 }
 0x293   : > { %v2528_v34 = vpop.f32.mrb[34].mxu0  ;;  %1808 = vst.msk [vmem:[#allocation3 + $0x170] sm:$0xff] %vm1784_vm7, %v4538_v20  ;;  %v4642_v30 = vpop.permute.xlu1 %1932  ;;  %v1246_v20 = vld [vmem:[#allocation2 + $0x78] sm:$0xff] }
 0x294   : > { %v2652_v2 = vsub.f32 0.0, %v4621_v39  ;;  %v4636_v37 = vadd.f32 %v4614_v57, %v2528_v34  ;;  %v2530_v26 = vpop.f32.mrb[35].mxu0  ;;  %1125 = vrot.lane.b32.xlu0 %v1053_v49, %s3421_s29  ;;  %v3379_v34 = vld [vmem:[%s3480_s27 + $0x8] sm:$0xff] }
 0x295   : > { %2133 = vrot.lane.b32.xlu1 %v4646_v41, %s3423_s8  ;;  %v2310_v21 = vld [vmem:[#allocation3 + $0x150] sm:$0xff] }
 0x296   : > { %v2684_v54 = vmul.f32 1.442695, %v2652_v2  ;;  %v2653_v58 = vsub.f32 0.0, %v4636_v37  ;;  %v1927_v59 = vpop.permute.xlu0 %1926  ;;  %v2352_v46 = vpack.c.bf16 %v2310_v21, %v2308_v7 }
 0x297   : > { %2001 = vst.msk [vmem:[#allocation3 + $0x160] sm:$0xff] %vm1978_vm8, %v1927_v59  ;;  %v4651_v24 = vpop.permute.xlu1 %2125 }
 0x298   : > { %3249 = vpow2.f32 %v2684_v54  ;;  %v2686_v27 = vmul.f32 1.442695, %v2653_v58  ;;  %1169 = vrot.lane.b32.xlu0 %v4215_v61, %s3421_s29  ;;  %2604 = vmatmul.mubr.bf16.gmra.mrb[20].mxu1 %v2352_v46  ;;  %v1848_v54 = vld [vmem:[#allocation2 + $0x198] sm:$0xff] }
 0x299   : > { %978 = vrot.lane.b32.xlu1 %v4520_v22, %s3420_s28  ;;  %3012 = vmatprep.mubr.msk.bf16.mxu1 %vm699_vm1, %v2355_v19  ;;  %v2019_v46 = vld [vmem:[#allocation2 + $0x91] sm:$0xff]  ;;  %v2234_v19 = vld [vmem:[#allocation2 + $0x19a] sm:$0xff] }
 0x29a   : > { %3251 = vpow2.f32 %v2686_v27  ;;  %v2120_v10 = vpop.permute.xlu0 %2119  ;;  %2266 = vst.msk [vmem:[#allocation3 + $0x1e8] sm:$0xff] %vm699_vm1, %v2234_v19 }
 0x29b   : > { %2194 = vst.msk [vmem:[#allocation3 + $0x160] sm:$0xff] %vm2171_vm9, %v2120_v10  ;;  %v4659_v50 = vpop.permute.xlu1 %1356  ;;  %v2235_v10 = vld [vmem:[#allocation2 + $0x1a2] sm:$0xff] }
 0x29c   : > { %1318 = vrot.lane.b32.xlu0 %v1246_v20, %s3425_s11  ;;  %2267 = vst.msk [vmem:[#allocation3 + $0x1f8] sm:$0xff] %vm699_vm1, %v2235_v10 }
 0x29d   : > { %1127 = vrot.lane.b32.xlu1 %v4568_v47, %s3421_s29 }
 0x29e   : > { %v1351_v28 = vpop.permute.xlu0 %1350 }
 0x29f   : > { %1423 = vst.msk [vmem:[#allocation3 + $0x180] sm:$0xff] %vm1398_vm5, %v1351_v28  ;;  %v1929_v61 = vpop.permute.xlu1 %1928  ;;  %v1849_v28 = vld [vmem:[#allocation2 + $0x1a0] sm:$0xff] }
 0x2a0   : > { %2002 = vst.msk [vmem:[#allocation3 + $0x170] sm:$0xff] %vm1978_vm8, %v1929_v61  ;;  %1362 = vrot.lane.b32.xlu0 %v4573_v36, %s3425_s11 }
 0x2a1   : > { %1171 = vrot.lane.b32.xlu1 %v4223_v5, %s3421_s29  ;;  %v2533_v9 = vpop.f32.mrb[36].mxu0 }
 0x2a2   : > { %v3250_v15 = vpop.eup %3249  ;;  %v4671_v17 = vadd.f32 %v4614_v57, %v2533_v9  ;;  %v1544_v55 = vpop.permute.xlu0 %1543  ;;  %v2312_v0 = vld [vmem:[#allocation3 + $0x160] sm:$0xff] }
 0x2a3   : > { %v2748_v22 = vadd.f32 1.0, %v3250_v15  ;;  %v2535_v62 = vpop.f32.mrb[37].mxu0  ;;  %1616 = vst.msk [vmem:[#allocation3 + $0x180] sm:$0xff] %vm1591_vm6, %v1544_v55  ;;  %v2122_v6 = vpop.permute.xlu1 %2121 }
 0x2a4   : > { %v3252_v32 = vpop.eup %3251  ;;  %v2536_v38 = vpop.f32.mrb[38].mxu0  ;;  %v2654_v35 = vsub.f32 0.0, %v4671_v17  ;;  %2195 = vst.msk [vmem:[#allocation3 + $0x170] sm:$0xff] %vm2171_vm9, %v2122_v6  ;;  %1511 = vrot.lane.b32.xlu0 %v4585_v23, %s3426_s14  ;;  %v2317_v23 = vld [vmem:[#allocation3 + $0x188] sm:$0xff] }
 0x2a5   : > { %3253 = vrcp.f32 %v2748_v22  ;;  %v2749_v3 = vadd.f32 1.0, %v3252_v32  ;;  %v4677_v47 = vadd.f32 %v4614_v57, %v2536_v38  ;;  %v2538_v5 = vpop.f32.mrb[39].mxu0  ;;  %1320 = vrot.lane.b32.xlu1 %v1247_v56, %s3425_s11  ;;  %v3380_v32 = vld [vmem:[%s3480_s27 + $0x10] sm:$0xff]  ;;  %v3381_v38 = vld [vmem:[%s3480_s27 + $0x18] sm:$0xff]  ;;  %v2042_v56 = vld [vmem:[#allocation2 + $0x1a1] sm:$0xff] }
 0x2a6   : > { %v2688_v63 = vmul.f32 1.442695, %v2654_v35  ;;  %v969_v18 = vpop.permute.xlu0 %968  ;;  %v2020_v35 = vld [vmem:[#allocation2 + $0x99] sm:$0xff] }
 0x2a7   : > { %3255 = vrcp.f32 %v2749_v3  ;;  %v2655_v36 = vsub.f32 0.0, %v4677_v47  ;;  %1039 = vst.msk [vmem:[#allocation3 + $0x1a0] sm:$0xff] %vm1012_vm3, %v969_v18  ;;  %v1353_v1 = vpop.permute.xlu1 %1352 }
 0x2a8   : > { %3257 = vpow2.f32 %v2688_v63  ;;  %1424 = vst.msk [vmem:[#allocation3 + $0x190] sm:$0xff] %vm1398_vm5, %v1353_v1  ;;  %1555 = vrot.lane.b32.xlu0 %v4600_v13, %s3426_s14 }
 0x2a9   : > { %v2690_v25 = vmul.f32 1.442695, %v2655_v36  ;;  %1364 = vrot.lane.b32.xlu1 %v4605_v60, %s3425_s11  ;;  %v2357_v60 = vpack.c.bf16 %v2319_v11, %v2317_v23  ;;  %s4705_s11 = scalar_lea.vmem %s4965_s5, %s3019_s24  ;;  %v2281_v11 = vld [vmem:[#allocation3 + $0x68] sm:$0xff] }
 0x2aa   : > { %v1737_v51 = vpop.permute.xlu0 %1736 }
 0x2ab   : > { %3259 = vpow2.f32 %v2690_v25  ;;  %1809 = vst.msk [vmem:[#allocation3 + $0x180] sm:$0xff] %vm1784_vm7, %v1737_v51  ;;  %v1546_v48 = vpop.permute.xlu1 %1545  ;;  %v2314_v8 = vld [vmem:[#allocation3 + $0x170] sm:$0xff] }
 0x2ac   : > { %2003 = vst.msk [vmem:[#allocation3 + $0x180] sm:$0xff] %vm1978_vm8, %v4597_v12  ;;  %1704 = vrot.lane.b32.xlu0 %v3864_v33, %s3427_s23  ;;  %v2354_v53 = vpack.c.bf16 %v2314_v8, %v2312_v0 }
 0x2ad   : > { %1617 = vst.msk [vmem:[#allocation3 + $0x190] sm:$0xff] %vm1591_vm6, %v1546_v48  ;;  %1513 = vrot.lane.b32.xlu1 %v4626_v4, %s3426_s14  ;;  %v2283_v48 = vld [vmem:[#allocation3 + $0x78] sm:$0xff] }
 0x2ae   : > { %2196 = vst.msk [vmem:[#allocation3 + $0x180] sm:$0xff] %vm2171_vm9, %v4618_v16  ;;  %v1162_v44 = vpop.permute.xlu0 %1161  ;;  %2612 = vmatmul.mubr.bf16.gmra.mrb[24].mxu1 %v2354_v53  ;;  %v3378_v16 = vld [vmem:[%s3480_s27] sm:$0xff] }
 0x2af   : > { %v3254_v13 = vpop.eup %3253  ;;  %1232 = vst.msk [vmem:[#allocation3 + $0x1a0] sm:$0xff] %vm1205_vm4, %v1162_v44  ;;  %3013 = vmatprep.mubr.msk.bf16.mxu1 %vm699_vm1, %v2357_v60  ;;  %v1739_v33 = vpop.permute.xlu1 %1738  ;;  %v2339_v60 = vpack.c.bf16 %v2283_v48, %v2281_v11  ;;  %v2325_v44 = vld [vmem:[#allocation3 + $0x1c8] sm:$0xff]  ;;  %v2287_v11 = vld [vmem:[#allocation3 + $0x98] sm:$0xff] }
 0x2b0   : > { %v2812_v29 = vmul.f32 %v3254_v13, %v4621_v39  ;;  %1425 = vst.msk [vmem:[#allocation3 + $0x1a0] sm:$0xff] %vm1398_vm5, %v4638_v42  ;;  %1748 = vrot.lane.b32.xlu0 %v4230_v45, %s3427_s23  ;;  %v1826_v45 = vld [vmem:[#allocation2 + $0x90] sm:$0xff] }
 0x2b1   : > { %v3256_v12 = vpop.eup %3255  ;;  %1810 = vst.msk [vmem:[#allocation3 + $0x190] sm:$0xff] %vm1784_vm7, %v1739_v33  ;;  %1557 = vrot.lane.b32.xlu1 %v4646_v41, %s3426_s14 }
 0x2b2   : > { %v2844_v14 = vadd.f32 %v3378_v16, %v2812_v29  ;;  %v2813_v39 = vmul.f32 %v3256_v12, %v4636_v37  ;;  %2004 = vst.msk [vmem:[#allocation3 + $0x190] sm:$0xff] %vm1978_vm8, %v4642_v30  ;;  %v3258_v4 = vpop.eup %3257  ;;  %v1548_v37 = vpop.permute.xlu0 %1547  ;;  %v2327_v12 = vld [vmem:[#allocation3 + $0x1d8] sm:$0xff] }
 0x2b3   : > { %2197 = vst.msk [vmem:[#allocation3 + $0x190] sm:$0xff] %vm2171_vm9, %v4651_v24  ;;  %v2750_v42 = vadd.f32 1.0, %v3258_v4  ;;  %v971_v26 = vpop.permute.xlu1 %970  ;;  %v2359_v24 = vpack.c.bf16 %v2323_v31, %v2321_v40  ;;  %v2361_v4 = vpack.c.bf16 %v2327_v12, %v2325_v44  ;;  %v2329_v44 = vld [vmem:[#allocation3 + $0x1e8] sm:$0xff]  ;;  %v2331_v12 = vld [vmem:[#allocation3 + $0x1f8] sm:$0xff] }
 0x2b4   : > { %2876 = vst.msk [vmem:[%s4705_s11] sm:$0xff] %vm297_vm0, %v2844_v14  ;;  %v2845_v2 = vadd.f32 %v3379_v34, %v2813_v39  ;;  %1898 = vrot.lane.b32.xlu0 %v1826_v45, %s3422_s7 }
 0x2b5   : > { %1618 = vst.msk [vmem:[#allocation3 + $0x1a0] sm:$0xff] %vm1591_vm6, %v1548_v37  ;;  %v3260_v49 = vpop.eup %3259  ;;  %3261 = vrcp.f32 %v2750_v42  ;;  %1706 = vrot.lane.b32.xlu1 %v3905_v52, %s3427_s23  ;;  %v2316_v7 = vld [vmem:[#allocation3 + $0x180] sm:$0xff] }
 0x2b6   : > { %2877 = vst.msk [vmem:[%s4705_s11 + $0x8] sm:$0xff] %vm297_vm0, %v2845_v2  ;;  %v2751_v30 = vadd.f32 1.0, %v3260_v49  ;;  %v1697_v58 = vpop.permute.xlu0 %1696 }
 0x2b7   : > { %1040 = vst.msk [vmem:[#allocation3 + $0x1b0] sm:$0xff] %vm1012_vm3, %v971_v26  ;;  %v1164_v41 = vpop.permute.xlu1 %1163 }
 0x2b8   : > { %3263 = vrcp.f32 %v2751_v30  ;;  %1789 = vst.msk [vmem:[#allocation3 + $0x40] sm:$0xff] %vm1784_vm7, %v1697_v58  ;;  %1942 = vrot.lane.b32.xlu0 %v1848_v54, %s3422_s7 }
 0x2b9   : > { %1233 = vst.msk [vmem:[#allocation3 + $0x1b0] sm:$0xff] %vm1205_vm4, %v1164_v41  ;;  %1750 = vrot.lane.b32.xlu1 %v4232_v43, %s3427_s23  ;;  %v2041_v43 = vld [vmem:[#allocation2 + $0x199] sm:$0xff] }
 0x2ba   : > { %1426 = vst.msk [vmem:[#allocation3 + $0x1b0] sm:$0xff] %vm1398_vm5, %v4659_v50  ;;  %v2318_v52 = vld [vmem:[#allocation3 + $0x190] sm:$0xff]  ;;  %v1741_v21 = vpop.permute.xlu0 %1740  ;;  %v1827_v50 = vld [vmem:[#allocation2 + $0x98] sm:$0xff] }
 0x2bb   : > { %v2356_v27 = vpack.c.bf16 %v2318_v52, %v2316_v7  ;;  %1811 = vst.msk [vmem:[#allocation3 + $0x1a0] sm:$0xff] %vm1784_vm7, %v1741_v21  ;;  %v1550_v59 = vpop.permute.xlu1 %1549 }
 0x2bc   : > { %1619 = vst.msk [vmem:[#allocation3 + $0x1b0] sm:$0xff] %vm1591_vm6, %v1550_v59  ;;  %2091 = vrot.lane.b32.xlu0 %v2019_v46, %s3423_s8 }
 0x2bd   : > { %2620 = vmatmul.mubr.bf16.gmra.mrb[28].mxu1 %v2356_v27  ;;  %1900 = vrot.lane.b32.xlu1 %v1827_v50, %s3422_s7 }
 0x2be   : > { %3014 = vmatprep.mubr.msk.bf16.mxu1 %vm699_vm1, %v2359_v24  ;;  %v1891_v20 = vpop.permute.xlu0 %1890 }
 0x2bf   : > { %v3262_v61 = vpop.eup %3261  ;;  %1983 = vst.msk [vmem:[#allocation3 + $0x40] sm:$0xff] %vm1978_vm8, %v1891_v20  ;;  %v1699_v15 = vpop.permute.xlu1 %1698 }
 0x2c0   : > { %v2814_v22 = vmul.f32 %v3262_v61, %v4671_v17  ;;  %1790 = vst.msk [vmem:[#allocation3 + $0x50] sm:$0xff] %vm1784_vm7, %v1699_v15  ;;  %2135 = vrot.lane.b32.xlu0 %v2041_v43, %s3423_s8 }
 0x2c1   : > { %1944 = vrot.lane.b32.xlu1 %v1849_v28, %s3422_s7 }
 0x2c2   : > { %v3264_v9 = vpop.eup %3263  ;;  %v2846_v55 = vadd.f32 %v3380_v32, %v2814_v22  ;;  %v1935_v3 = vpop.permute.xlu0 %1934 }
 0x2c3   : > { %v2815_v62 = vmul.f32 %v3264_v9, %v4677_v47  ;;  %2005 = vst.msk [vmem:[#allocation3 + $0x1a0] sm:$0xff] %vm1978_vm8, %v1935_v3  ;;  %v1743_v6 = vpop.permute.xlu1 %1742 }
 0x2c4   : > { %2878 = vst.msk [vmem:[%s4705_s11 + $0x10] sm:$0xff] %vm297_vm0, %v2846_v55 }
 0x2c5   : > { %v2847_v17 = vadd.f32 %v3381_v38, %v2815_v62  ;;  %1812 = vst.msk [vmem:[#allocation3 + $0x1b0] sm:$0xff] %vm1784_vm7, %v1743_v6  ;;  %2093 = vrot.lane.b32.xlu1 %v2020_v35, %s3423_s8 }
 0x2c6   : > { %v2084_v5 = vpop.permute.xlu0 %2083 }
 0x2c7   : > { %2879 = vst.msk [vmem:[%s4705_s11 + $0x18] sm:$0xff] %vm297_vm0, %v2847_v17  ;;  %v1893_v47 = vpop.permute.xlu1 %1892 }
 0x2c8   : > { %2176 = vst.msk [vmem:[#allocation3 + $0x40] sm:$0xff] %vm2171_vm9, %v2084_v5 }
 0x2c9   : > { %1984 = vst.msk [vmem:[#allocation3 + $0x50] sm:$0xff] %vm1978_vm8, %v1893_v47  ;;  %2137 = vrot.lane.b32.xlu1 %v2042_v56, %s3423_s8 }
 0x2ca   : > { %v2128_v63 = vpop.permute.xlu0 %2127 }
 0x2cb   : > { %2198 = vst.msk [vmem:[#allocation3 + $0x1a0] sm:$0xff] %vm2171_vm9, %v2128_v63  ;;  %v1937_v36 = vpop.permute.xlu1 %1936 }
 0x2cc   : > { %2006 = vst.msk [vmem:[#allocation3 + $0x1b0] sm:$0xff] %vm1978_vm8, %v1937_v36 }
 0x2ce   : > { %v973_v18 = vpop.permute.xlu0 %972 }
 0x2cf   : > { %1041 = vst.msk [vmem:[#allocation3 + $0x1c0] sm:$0xff] %vm1012_vm3, %v973_v18  ;;  %v2086_v1 = vpop.permute.xlu1 %2085  ;;  %v2276_v8 = vld [vmem:[#allocation3 + $0x40] sm:$0xff] }
 0x2d0   : > { %2177 = vst.msk [vmem:[#allocation3 + $0x50] sm:$0xff] %vm2171_vm9, %v2086_v1 }
 0x2d2   : > { %v1122_v25 = vpop.permute.xlu0 %1121  ;;  %v2320_v16 = vld [vmem:[#allocation3 + $0x1a0] sm:$0xff] }
 0x2d3   : > { %1212 = vst.msk [vmem:[#allocation3 + $0x60] sm:$0xff] %vm1205_vm4, %v1122_v25  ;;  %v2130_v51 = vpop.permute.xlu1 %2129 }
 0x2d4   : > { %2199 = vst.msk [vmem:[#allocation3 + $0x1b0] sm:$0xff] %vm2171_vm9, %v2130_v51 }
 0x2d6   : > { %v1166_v23 = vpop.permute.xlu0 %1165 }
 0x2d7   : > { %1234 = vst.msk [vmem:[#allocation3 + $0x1c0] sm:$0xff] %vm1205_vm4, %v1166_v23  ;;  %v975_v0 = vpop.permute.xlu1 %974  ;;  %v2278_v53 = vld [vmem:[#allocation3 + $0x50] sm:$0xff]  ;;  %v2285_v23 = vld [vmem:[#allocation3 + $0x88] sm:$0xff] }
 0x2d8   : > { %1042 = vst.msk [vmem:[#allocation3 + $0x1d0] sm:$0xff] %vm1012_vm3, %v975_v0  ;;  %v2336_v13 = vpack.c.bf16 %v2278_v53, %v2276_v8 }
 0x2da   : > { %v1315_v29 = vpop.permute.xlu0 %1314  ;;  %2540 = vmatmul.mubr.bf16.gmra.mrb[40].mxu0 %v2336_v13 }
 0x2db   : > { %1405 = vst.msk [vmem:[#allocation3 + $0x60] sm:$0xff] %vm1398_vm5, %v1315_v29  ;;  %v1124_v33 = vpop.permute.xlu1 %1123  ;;  %3004 = vmatprep.mubr.msk.bf16.mxu0 %vm699_vm1, %v2339_v60  ;;  %v2322_v14 = vld [vmem:[#allocation3 + $0x1b0] sm:$0xff] }
 0x2dc   : > { %1213 = vst.msk [vmem:[#allocation3 + $0x70] sm:$0xff] %vm1205_vm4, %v1124_v33  ;;  %v2358_v39 = vpack.c.bf16 %v2322_v14, %v2320_v16  ;;  %v2341_v14 = vpack.c.bf16 %v2287_v11, %v2285_v23 }
 0x2de   : > { %v1359_v34 = vpop.permute.xlu0 %1358  ;;  %2628 = vmatmul.mubr.bf16.gmra.mrb[32].mxu1 %v2358_v39 }
 0x2df   : > { %1427 = vst.msk [vmem:[#allocation3 + $0x1c0] sm:$0xff] %vm1398_vm5, %v1359_v34  ;;  %3015 = vmatprep.mubr.msk.bf16.mxu1 %vm699_vm1, %v2361_v4  ;;  %v1168_v2 = vpop.permute.xlu1 %1167  ;;  %v3382_v4 = vld [vmem:[%s3480_s27 + $0x50] sm:$0xff] }
 0x2e0   : > { %1235 = vst.msk [vmem:[#allocation3 + $0x1d0] sm:$0xff] %vm1205_vm4, %v1168_v2 }
 0x2e2   : > { %v1508_v37 = vpop.permute.xlu0 %1507 }
 0x2e3   : > { %1598 = vst.msk [vmem:[#allocation3 + $0x60] sm:$0xff] %vm1591_vm6, %v1508_v37  ;;  %v1317_v42 = vpop.permute.xlu1 %1316 }
 0x2e4   : > { %1406 = vst.msk [vmem:[#allocation3 + $0x70] sm:$0xff] %vm1398_vm5, %v1317_v42 }
 0x2e6   : > { %v1552_v26 = vpop.permute.xlu0 %1551 }
 0x2e7   : > { %1620 = vst.msk [vmem:[#allocation3 + $0x1c0] sm:$0xff] %vm1591_vm6, %v1552_v26  ;;  %v1361_v45 = vpop.permute.xlu1 %1360 }
 0x2e8   : > { %1428 = vst.msk [vmem:[#allocation3 + $0x1d0] sm:$0xff] %vm1398_vm5, %v1361_v45 }
 0x2ea   : > { %v1701_v49 = vpop.permute.xlu0 %1700 }
 0x2eb   : > { %1791 = vst.msk [vmem:[#allocation3 + $0x60] sm:$0xff] %vm1784_vm7, %v1701_v49  ;;  %v1510_v30 = vpop.permute.xlu1 %1509 }
 0x2ec   : > { %1599 = vst.msk [vmem:[#allocation3 + $0x70] sm:$0xff] %vm1591_vm6, %v1510_v30  ;;  %v2363_v30 = vpack.c.bf16 %v2331_v12, %v2329_v44 }
 0x2ed   : > { %v2565_v54 = vpop.f32.mrb[0].mxu1 }
 0x2ee   : > { %v4785_v58 = vadd.f32 %v4614_v57, %v2565_v54  ;;  %v1745_v41 = vpop.permute.xlu0 %1744  ;;  %v2567_v40 = vpop.f32.mrb[1].mxu1  ;;  %v3383_v54 = vld [vmem:[%s3480_s27 + $0x58] sm:$0xff] }
 0x2ef   : > { %1813 = vst.msk [vmem:[#allocation3 + $0x1c0] sm:$0xff] %vm1784_vm7, %v1745_v41  ;;  %v2568_v31 = vpop.f32.mrb[2].mxu1  ;;  %v1554_v7 = vpop.permute.xlu1 %1553 }
 0x2f0   : > { %v2662_v52 = vsub.f32 0.0, %v4785_v58  ;;  %v4790_v21 = vadd.f32 %v4614_v57, %v2568_v31  ;;  %1621 = vst.msk [vmem:[#allocation3 + $0x1d0] sm:$0xff] %vm1591_vm6, %v1554_v7  ;;  %v2570_v27 = vpop.f32.mrb[3].mxu1 }
 0x2f2   : > { %v2704_v59 = vmul.f32 1.442695, %v2662_v52  ;;  %v2663_v46 = vsub.f32 0.0, %v4790_v21  ;;  %v1895_v24 = vpop.permute.xlu0 %1894 }
 0x2f3   : > { %1985 = vst.msk [vmem:[#allocation3 + $0x60] sm:$0xff] %vm1978_vm8, %v1895_v24  ;;  %v1703_v19 = vpop.permute.xlu1 %1702 }
 0x2f4   : > { %3265 = vpow2.f32 %v2704_v59  ;;  %v2706_v10 = vmul.f32 1.442695, %v2663_v46  ;;  %1792 = vst.msk [vmem:[#allocation3 + $0x70] sm:$0xff] %vm1784_vm7, %v1703_v19  ;;  %v3384_v19 = vld [vmem:[%s3480_s27 + $0x60] sm:$0xff] }
 0x2f6   : > { %3267 = vpow2.f32 %v2706_v10  ;;  %v1939_v50 = vpop.permute.xlu0 %1938 }
 0x2f7   : > { %2007 = vst.msk [vmem:[#allocation3 + $0x1c0] sm:$0xff] %vm1978_vm8, %v1939_v50  ;;  %v1747_v43 = vpop.permute.xlu1 %1746 }
 0x2f8   : > { %1814 = vst.msk [vmem:[#allocation3 + $0x1d0] sm:$0xff] %vm1784_vm7, %v1747_v43  ;;  %v3385_v43 = vld [vmem:[%s3480_s27 + $0x68] sm:$0xff] }
 0x2fa   : > { %v2088_v20 = vpop.permute.xlu0 %2087 }
 0x2fb   : > { %2178 = vst.msk [vmem:[#allocation3 + $0x60] sm:$0xff] %vm2171_vm9, %v2088_v20  ;;  %v2573_v28 = vpop.f32.mrb[4].mxu1  ;;  %v1897_v61 = vpop.permute.xlu1 %1896 }
 0x2fc   : > { %v4800_v15 = vadd.f32 %v4614_v57, %v2573_v28  ;;  %1986 = vst.msk [vmem:[#allocation3 + $0x70] sm:$0xff] %vm1978_vm8, %v1897_v61  ;;  %v2575_v22 = vpop.f32.mrb[5].mxu1 }
 0x2fd   : > { %v2576_v9 = vpop.f32.mrb[6].mxu1 }
 0x2fe   : > { %v3266_v32 = vpop.eup %3265  ;;  %v2664_v55 = vsub.f32 0.0, %v4800_v15  ;;  %v4805_v62 = vadd.f32 %v4614_v57, %v2576_v9  ;;  %v2132_v3 = vpop.permute.xlu0 %2131 }
 0x2ff   : > { %v2578_v6 = vpop.f32.mrb[7].mxu1  ;;  %v2758_v38 = vadd.f32 1.0, %v3266_v32  ;;  %2200 = vst.msk [vmem:[#allocation3 + $0x1c0] sm:$0xff] %vm2171_vm9, %v2132_v3  ;;  %v1941_v17 = vpop.permute.xlu1 %1940 }
 0x300   : > { %v3268_v35 = vpop.eup %3267  ;;  %v2708_v5 = vmul.f32 1.442695, %v2664_v55  ;;  %v2665_v56 = vsub.f32 0.0, %v4805_v62  ;;  %2008 = vst.msk [vmem:[#allocation3 + $0x1d0] sm:$0xff] %vm1978_vm8, %v1941_v17 }
 0x301   : > { %3269 = vrcp.f32 %v2758_v38  ;;  %v2759_v47 = vadd.f32 1.0, %v3268_v35 }
 0x302   : > { %3271 = vpow2.f32 %v2708_v5  ;;  %v2710_v63 = vmul.f32 1.442695, %v2665_v56  ;;  %v977_v36 = vpop.permute.xlu0 %976  ;;  %v2280_v8 = vld [vmem:[#allocation3 + $0x60] sm:$0xff] }
 0x303   : > { %3273 = vrcp.f32 %v2759_v47  ;;  %1043 = vst.msk [vmem:[#allocation3 + $0x1e0] sm:$0xff] %vm1012_vm3, %v977_v36  ;;  %v2090_v18 = vpop.permute.xlu1 %2089 }
 0x304   : > { %3275 = vpow2.f32 %v2710_v63  ;;  %2179 = vst.msk [vmem:[#allocation3 + $0x70] sm:$0xff] %vm2171_vm9, %v2090_v18 }
 0x306   : > { %v1126_v1 = vpop.permute.xlu0 %1125  ;;  %v2324_v45 = vld [vmem:[#allocation3 + $0x1c0] sm:$0xff] }
 0x307   : > { %1214 = vst.msk [vmem:[#allocation3 + $0x80] sm:$0xff] %vm1205_vm4, %v1126_v1  ;;  %v2134_v25 = vpop.permute.xlu1 %2133 }
 0x308   : > { %2201 = vst.msk [vmem:[#allocation3 + $0x1d0] sm:$0xff] %vm2171_vm9, %v2134_v25 }
 0x30a   : > { %v1170_v51 = vpop.permute.xlu0 %1169 }
 0x30b   : > { %v3270_v48 = vpop.eup %3269  ;;  %1236 = vst.msk [vmem:[#allocation3 + $0x1e0] sm:$0xff] %vm1205_vm4, %v1170_v51  ;;  %v979_v0 = vpop.permute.xlu1 %978  ;;  %v2282_v53 = vld [vmem:[#allocation3 + $0x70] sm:$0xff] }
 0x30c   : > { %v3272_v13 = vpop.eup %3271  ;;  %v2822_v60 = vmul.f32 %v3270_v48, %v4785_v58  ;;  %1044 = vst.msk [vmem:[#allocation3 + $0x1f0] sm:$0xff] %vm1012_vm3, %v979_v0  ;;  %v2338_v29 = vpack.c.bf16 %v2282_v53, %v2280_v8 }
 0x30d   : > { %v3274_v33 = vpop.eup %3273  ;;  %v2760_v16 = vadd.f32 1.0, %v3272_v13 }
 0x30e   : > { %v3276_v39 = vpop.eup %3275  ;;  %v2854_v34 = vadd.f32 %v3382_v4, %v2822_v60  ;;  %v2823_v2 = vmul.f32 %v3274_v33, %v4790_v21  ;;  %v1319_v37 = vpop.permute.xlu0 %1318  ;;  %2548 = vmatmul.mubr.bf16.gmra.mrb[44].mxu0 %v2338_v29 }
 0x30f   : > { %3277 = vrcp.f32 %v2760_v16  ;;  %v2761_v42 = vadd.f32 1.0, %v3276_v39  ;;  %1407 = vst.msk [vmem:[#allocation3 + $0x80] sm:$0xff] %vm1398_vm5, %v1319_v37  ;;  %v1128_v26 = vpop.permute.xlu1 %1127  ;;  %3005 = vmatprep.mubr.msk.bf16.mxu0 %vm699_vm1, %v2341_v14  ;;  %v2326_v49 = vld [vmem:[#allocation3 + $0x1d0] sm:$0xff] }
 0x310   : > { %2886 = vst.msk [vmem:[%s4705_s11 + $0x50] sm:$0xff] %vm297_vm0, %v2854_v34  ;;  %v2855_v58 = vadd.f32 %v3383_v54, %v2823_v2  ;;  %v2360_v41 = vpack.c.bf16 %v2326_v49, %v2324_v45 }
 0x311   : > { %1215 = vst.msk [vmem:[#allocation3 + $0x90] sm:$0xff] %vm1205_vm4, %v1128_v26  ;;  %3279 = vrcp.f32 %v2761_v42 }
 0x312   : > { %2887 = vst.msk [vmem:[%s4705_s11 + $0x58] sm:$0xff] %vm297_vm0, %v2855_v58  ;;  %v1363_v40 = vpop.permute.xlu0 %1362  ;;  %2636 = vmatmul.mubr.bf16.gmra.mrb[36].mxu1 %v2360_v41 }
 0x313   : > { %1429 = vst.msk [vmem:[#allocation3 + $0x1e0] sm:$0xff] %vm1398_vm5, %v1363_v40  ;;  %v1172_v31 = vpop.permute.xlu1 %1171  ;;  %3016 = vmatprep.mubr.msk.bf16.mxu1 %vm699_vm1, %v2363_v30 }
 0x314   : > { %1237 = vst.msk [vmem:[#allocation3 + $0x1f0] sm:$0xff] %vm1205_vm4, %v1172_v31  ;;  %v3386_v31 = vld [vmem:[%s3480_s27 + $0x70] sm:$0xff] }
 0x316   : > { %v1512_v7 = vpop.permute.xlu0 %1511 }
 0x317   : > { %1600 = vst.msk [vmem:[#allocation3 + $0x80] sm:$0xff] %vm1591_vm6, %v1512_v7  ;;  %v1321_v52 = vpop.permute.xlu1 %1320 }
 0x318   : > { %1408 = vst.msk [vmem:[#allocation3 + $0x90] sm:$0xff] %vm1398_vm5, %v1321_v52 }
 0x319   : > { %v3278_v21 = vpop.eup %3277 }
 0x31a   : > { %v2824_v27 = vmul.f32 %v3278_v21, %v4800_v15  ;;  %v1556_v59 = vpop.permute.xlu0 %1555 }
 0x31b   : > { %v3280_v46 = vpop.eup %3279  ;;  %1622 = vst.msk [vmem:[#allocation3 + $0x1e0] sm:$0xff] %vm1591_vm6, %v1556_v59  ;;  %v1365_v24 = vpop.permute.xlu1 %1364 }
 0x31c   : > { %v2856_v10 = vadd.f32 %v3384_v19, %v2824_v27  ;;  %v2825_v50 = vmul.f32 %v3280_v46, %v4805_v62  ;;  %1430 = vst.msk [vmem:[#allocation3 + $0x1f0] sm:$0xff] %vm1398_vm5, %v1365_v24  ;;  %v3387_v27 = vld [vmem:[%s3480_s27 + $0x78] sm:$0xff] }
 0x31e   : > { %2888 = vst.msk [vmem:[%s4705_s11 + $0x60] sm:$0xff] %vm297_vm0, %v2856_v10  ;;  %v2857_v20 = vadd.f32 %v3385_v43, %v2825_v50  ;;  %v1705_v28 = vpop.permute.xlu0 %1704  ;;  %v3388_v10 = vld [vmem:[%s3480_s27 + $0x80] sm:$0xff] }
 0x31f   : > { %1793 = vst.msk [vmem:[#allocation3 + $0x80] sm:$0xff] %vm1784_vm7, %v1705_v28  ;;  %v1514_v61 = vpop.permute.xlu1 %1513 }
 0x320   : > { %2889 = vst.msk [vmem:[%s4705_s11 + $0x68] sm:$0xff] %vm297_vm0, %v2857_v20  ;;  %v3389_v20 = vld [vmem:[%s3480_s27 + $0x88] sm:$0xff] }
 0x321   : > { %1601 = vst.msk [vmem:[#allocation3 + $0x90] sm:$0xff] %vm1591_vm6, %v1514_v61 }
 0x322   : > { %v1749_v15 = vpop.permute.xlu0 %1748 }
 0x323   : > { %1815 = vst.msk [vmem:[#allocation3 + $0x1e0] sm:$0xff] %vm1784_vm7, %v1749_v15  ;;  %v1558_v22 = vpop.permute.xlu1 %1557 }
 0x324   : > { %1623 = vst.msk [vmem:[#allocation3 + $0x1f0] sm:$0xff] %vm1591_vm6, %v1558_v22 }
 0x325   : > { %v2581_v9 = vpop.f32.mrb[8].mxu1 }
 0x326   : > { %v2582_v32 = vadd.f32 %v4614_v57, %v2581_v9  ;;  %v1899_v55 = vpop.permute.xlu0 %1898  ;;  %v2583_v62 = vpop.f32.mrb[9].mxu1 }
 0x327   : > { %1987 = vst.msk [vmem:[#allocation3 + $0x80] sm:$0xff] %vm1978_vm8, %v1899_v55  ;;  %v2584_v3 = vpop.f32.mrb[10].mxu1  ;;  %v1707_v6 = vpop.permute.xlu1 %1706 }
 0x328   : > { %v2666_v38 = vsub.f32 0.0, %v2582_v32  ;;  %v2585_v17 = vadd.f32 %v4614_v57, %v2584_v3  ;;  %1794 = vst.msk [vmem:[#allocation3 + $0x90] sm:$0xff] %vm1784_vm7, %v1707_v6  ;;  %v2586_v35 = vpop.f32.mrb[11].mxu1 }
 0x32a   : > { %v2712_v5 = vmul.f32 1.442695, %v2666_v38  ;;  %v2667_v56 = vsub.f32 0.0, %v2585_v17  ;;  %v1943_v47 = vpop.permute.xlu0 %1942 }
 0x32b   : > { %2009 = vst.msk [vmem:[#allocation3 + $0x1e0] sm:$0xff] %vm1978_vm8, %v1943_v47  ;;  %v1751_v63 = vpop.permute.xlu1 %1750 }
 0x32c   : > { %3281 = vpow2.f32 %v2712_v5  ;;  %v2714_v36 = vmul.f32 1.442695, %v2667_v56  ;;  %1816 = vst.msk [vmem:[#allocation3 + $0x1f0] sm:$0xff] %vm1784_vm7, %v1751_v63 }
 0x32e   : > { %3283 = vpow2.f32 %v2714_v36  ;;  %v2092_v18 = vpop.permute.xlu0 %2091 }
 0x32f   : > { %2180 = vst.msk [vmem:[#allocation3 + $0x80] sm:$0xff] %vm2171_vm9, %v2092_v18  ;;  %v1901_v1 = vpop.permute.xlu1 %1900 }
 0x330   : > { %1988 = vst.msk [vmem:[#allocation3 + $0x90] sm:$0xff] %vm1978_vm8, %v1901_v1 }
 0x332   : > { %v2136_v25 = vpop.permute.xlu0 %2135 }
 0x333   : > { %v2589_v51 = vpop.f32.mrb[12].mxu1  ;;  %v1945_v23 = vpop.permute.xlu1 %1944  ;;  %2202 = vst.msk [vmem:[#allocation3 + $0x1e0] sm:$0xff] %vm2171_vm9, %v2136_v25 }
 0x334   : > { %v2590_v11 = vadd.f32 %v4614_v57, %v2589_v51  ;;  %2010 = vst.msk [vmem:[#allocation3 + $0x1f0] sm:$0xff] %vm1978_vm8, %v1945_v23  ;;  %v2591_v48 = vpop.f32.mrb[13].mxu1 }
 0x335   : > { %v2592_v0 = vpop.f32.mrb[14].mxu1 }
 0x336   : > { %v3282_v8 = vpop.eup %3281  ;;  %v2668_v53 = vsub.f32 0.0, %v2590_v11  ;;  %v2593_v13 = vadd.f32 %v4614_v57, %v2592_v0  ;;  %v2594_v60 = vpop.f32.mrb[15].mxu1  ;;  %v2284_v34 = vld [vmem:[#allocation3 + $0x80] sm:$0xff] }
 0x337   : > { %v2762_v29 = vadd.f32 1.0, %v3282_v8  ;;  %v2094_v44 = vpop.permute.xlu1 %2093 }
 0x338   : > { %v3284_v12 = vpop.eup %3283  ;;  %v2716_v33 = vmul.f32 1.442695, %v2668_v53  ;;  %v2669_v16 = vsub.f32 0.0, %v2593_v13  ;;  %2181 = vst.msk [vmem:[#allocation3 + $0x90] sm:$0xff] %vm2171_vm9, %v2094_v44  ;;  %v3390_v44 = vld [vmem:[%s3480_s27 + $0x90] sm:$0xff] }
 0x339   : > { %3285 = vrcp.f32 %v2762_v29  ;;  %v2763_v14 = vadd.f32 1.0, %v3284_v12 }
 0x33a   : > { %3287 = vpow2.f32 %v2716_v33  ;;  %v2718_v39 = vmul.f32 1.442695, %v2669_v16  ;;  %v2328_v42 = vld [vmem:[#allocation3 + $0x1e0] sm:$0xff] }
 0x33b   : > { %3289 = vrcp.f32 %v2763_v14  ;;  %v2138_v4 = vpop.permute.xlu1 %2137  ;;  %v3391_v14 = vld [vmem:[%s3480_s27 + $0x98] sm:$0xff] }
 0x33c   : > { %3291 = vpow2.f32 %v2718_v39  ;;  %2203 = vst.msk [vmem:[#allocation3 + $0x1f0] sm:$0xff] %vm2171_vm9, %v2138_v4 }
 0x33f   : > { %v2286_v2 = vld [vmem:[#allocation3 + $0x90] sm:$0xff] }
 0x340   : > { %v2340_v37 = vpack.c.bf16 %v2286_v2, %v2284_v34 }
 0x342   : > { %2556 = vmatmul.mubr.bf16.gmra.mrb[48].mxu0 %v2340_v37 }
 0x343   : > { %v3286_v26 = vpop.eup %3285  ;;  %v2330_v45 = vld [vmem:[#allocation3 + $0x1f0] sm:$0xff] }
 0x344   : > { %v3288_v49 = vpop.eup %3287  ;;  %v2826_v30 = vmul.f32 %v3286_v26, %v2582_v32  ;;  %v2362_v54 = vpack.c.bf16 %v2330_v45, %v2328_v42 }
 0x345   : > { %v3290_v58 = vpop.eup %3289  ;;  %v2764_v41 = vadd.f32 1.0, %v3288_v49 }
 0x346   : > { %v3292_v40 = vpop.eup %3291  ;;  %v2858_v7 = vadd.f32 %v3386_v31, %v2826_v30  ;;  %v2827_v52 = vmul.f32 %v3290_v58, %v2585_v17  ;;  %2644 = vmatmul.mubr.bf16.gmra.mrb[40].mxu1 %v2362_v54  ;;  %v3392_v31 = vld [vmem:[%s3480_s27 + $0xa0] sm:$0xff] }
 0x347   : > { %3293 = vrcp.f32 %v2764_v41  ;;  %v2765_v21 = vadd.f32 1.0, %v3292_v40 }
 0x348   : > { %2890 = vst.msk [vmem:[%s4705_s11 + $0x70] sm:$0xff] %vm297_vm0, %v2858_v7  ;;  %v2859_v59 = vadd.f32 %v3387_v27, %v2827_v52 }
 0x349   : > { %3295 = vrcp.f32 %v2765_v21  ;;  %v3393_v21 = vld [vmem:[%s3480_s27 + $0xa8] sm:$0xff] }
 0x34a   : > { %2891 = vst.msk [vmem:[%s4705_s11 + $0x78] sm:$0xff] %vm297_vm0, %v2859_v59 }
 0x351   : > { %v3294_v46 = vpop.eup %3293 }
 0x352   : > { %v2828_v24 = vmul.f32 %v3294_v46, %v2590_v11 }
 0x353   : > { %v3296_v19 = vpop.eup %3295 }
 0x354   : > { %v2860_v50 = vadd.f32 %v3388_v10, %v2828_v24  ;;  %v2829_v43 = vmul.f32 %v3296_v19, %v2593_v13 }
 0x356   : > { %2892 = vst.msk [vmem:[%s4705_s11 + $0x80] sm:$0xff] %vm297_vm0, %v2860_v50  ;;  %v2861_v28 = vadd.f32 %v3389_v20, %v2829_v43  ;;  %v4894_v43 = vld [vmem:[%s4964_s4] ss:$0 sm:$0xff] }
 0x358   : > { %2893 = vst.msk [vmem:[%s4705_s11 + $0x88] sm:$0xff] %vm297_vm0, %v2861_v28 }
 0x35d   : > { %v2597_v61 = vpop.f32.mrb[16].mxu1 }
 0x35e   : > { %v2598_v15 = vadd.f32 %v4614_v57, %v2597_v61  ;;  %v2599_v22 = vpop.f32.mrb[17].mxu1 }
 0x35f   : > { %v2600_v9 = vpop.f32.mrb[18].mxu1 }
 0x360   : > { %v2670_v32 = vsub.f32 0.0, %v2598_v15  ;;  %v2601_v55 = vadd.f32 %v4614_v57, %v2600_v9  ;;  %v2602_v62 = vpop.f32.mrb[19].mxu1 }
 0x362   : > { %v2720_v3 = vmul.f32 1.442695, %v2670_v32  ;;  %v2671_v6 = vsub.f32 0.0, %v2601_v55 }
 0x364   : > { %3297 = vpow2.f32 %v2720_v3  ;;  %v2722_v38 = vmul.f32 1.442695, %v2671_v6 }
 0x366   : > { %3299 = vpow2.f32 %v2722_v38 }
 0x36b   : > { %v2605_v17 = vpop.f32.mrb[20].mxu1 }
 0x36c   : > { %v2606_v35 = vadd.f32 %v4614_v57, %v2605_v17  ;;  %v2607_v5 = vpop.f32.mrb[21].mxu1 }
 0x36d   : > { %v2608_v56 = vpop.f32.mrb[22].mxu1 }
 0x36e   : > { %v3298_v47 = vpop.eup %3297  ;;  %v2672_v63 = vsub.f32 0.0, %v2606_v35  ;;  %v2609_v36 = vadd.f32 %v4614_v57, %v2608_v56  ;;  %v2610_v18 = vpop.f32.mrb[23].mxu1 }
 0x36f   : > { %v2766_v1 = vadd.f32 1.0, %v3298_v47 }
 0x370   : > { %v3300_v25 = vpop.eup %3299  ;;  %v2724_v51 = vmul.f32 1.442695, %v2672_v63  ;;  %v2673_v23 = vsub.f32 0.0, %v2609_v36  ;;  %v3396_v63 = vld [vmem:[%s3480_s27 + $0xb8] sm:$0xff] }
 0x371   : > { %3301 = vrcp.f32 %v2766_v1  ;;  %v2767_v11 = vadd.f32 1.0, %v3300_v25 }
 0x372   : > { %3303 = vpow2.f32 %v2724_v51  ;;  %v2726_v48 = vmul.f32 1.442695, %v2673_v23 }
 0x373   : > { %3305 = vrcp.f32 %v2767_v11 }
 0x374   : > { %3307 = vpow2.f32 %v2726_v48 }
 0x37b   : > { %v3302_v0 = vpop.eup %3301 }
 0x37c   : > { %v3304_v8 = vpop.eup %3303  ;;  %v2830_v53 = vmul.f32 %v3302_v0, %v2598_v15  ;;  %v3397_v0 = vld [vmem:[%s3480_s27 + $0xc0] sm:$0xff] }
 0x37d   : > { %v3306_v13 = vpop.eup %3305  ;;  %v2768_v60 = vadd.f32 1.0, %v3304_v8 }
 0x37e   : > { %v3308_v29 = vpop.eup %3307  ;;  %v2862_v12 = vadd.f32 %v3390_v44, %v2830_v53  ;;  %v2831_v33 = vmul.f32 %v3306_v13, %v2601_v55 }
 0x37f   : > { %3309 = vrcp.f32 %v2768_v60  ;;  %v2769_v16 = vadd.f32 1.0, %v3308_v29 }
 0x380   : > { %2894 = vst.msk [vmem:[%s4705_s11 + $0x90] sm:$0xff] %vm297_vm0, %v2862_v12  ;;  %v2863_v39 = vadd.f32 %v3391_v14, %v2831_v33  ;;  %v3398_v12 = vld [vmem:[%s3480_s27 + $0xc8] sm:$0xff] }
 0x381   : > { %3311 = vrcp.f32 %v2769_v16  ;;  %v2613_v4 = vpop.f32.mrb[24].mxu1 }
 0x382   : > { %2895 = vst.msk [vmem:[%s4705_s11 + $0x98] sm:$0xff] %vm297_vm0, %v2863_v39  ;;  %v2614_v34 = vadd.f32 %v4614_v57, %v2613_v4  ;;  %v2615_v2 = vpop.f32.mrb[25].mxu1 }
 0x383   : > { %v2616_v37 = vpop.f32.mrb[26].mxu1 }
 0x384   : > { %v2674_v42 = vsub.f32 0.0, %v2614_v34  ;;  %v2617_v26 = vadd.f32 %v4614_v57, %v2616_v37  ;;  %v2618_v45 = vpop.f32.mrb[27].mxu1 }
 0x386   : > { %v2728_v49 = vmul.f32 1.442695, %v2674_v42  ;;  %v2675_v30 = vsub.f32 0.0, %v2617_v26 }
 0x388   : > { %3313 = vpow2.f32 %v2728_v49  ;;  %v2730_v54 = vmul.f32 1.442695, %v2675_v30 }
 0x389   : > { %v3310_v58 = vpop.eup %3309 }
 0x38a   : > { %v2832_v41 = vmul.f32 %v3310_v58, %v2606_v35  ;;  %3315 = vpow2.f32 %v2730_v54  ;;  %v3395_v35 = vld [vmem:[%s3480_s27 + $0xb0] sm:$0xff] }
 0x38b   : > { %v3312_v40 = vpop.eup %3311 }
 0x38c   : > { %v2864_v7 = vadd.f32 %v3392_v31, %v2832_v41  ;;  %v2833_v52 = vmul.f32 %v3312_v40, %v2609_v36 }
 0x38e   : > { %2896 = vst.msk [vmem:[%s4705_s11 + $0xa0] sm:$0xff] %vm297_vm0, %v2864_v7  ;;  %v2865_v27 = vadd.f32 %v3393_v21, %v2833_v52 }
 0x390   : > { %v2621_v59 = vpop.f32.mrb[28].mxu1  ;;  %2897 = vst.msk [vmem:[%s4705_s11 + $0xa8] sm:$0xff] %vm297_vm0, %v2865_v27 }
 0x391   : > { %v2622_v46 = vadd.f32 %v4614_v57, %v2621_v59  ;;  %v2623_v24 = vpop.f32.mrb[29].mxu1 }
 0x392   : > { %v2624_v19 = vpop.f32.mrb[30].mxu1  ;;  %v3314_v10 = vpop.eup %3313  ;;  %v3399_v24 = vld [vmem:[%s3480_s27 + $0x20] sm:$0xff] }
 0x393   : > { %v2676_v50 = vsub.f32 0.0, %v2622_v46  ;;  %v2625_v20 = vadd.f32 %v4894_v43, %v2624_v19  ;;  %v2626_v28 = vpop.f32.mrb[31].mxu1  ;;  %v2770_v61 = vadd.f32 1.0, %v3314_v10 }
 0x394   : > { %v3316_v15 = vpop.eup %3315 }
 0x395   : > { %v2732_v22 = vmul.f32 1.442695, %v2676_v50  ;;  %v2677_v9 = vsub.f32 0.0, %v2625_v20  ;;  %3317 = vrcp.f32 %v2770_v61  ;;  %v2771_v32 = vadd.f32 1.0, %v3316_v15 }
 0x397   : > { %3319 = vpow2.f32 %v2732_v22  ;;  %v2734_v57 = vmul.f32 1.442695, %v2677_v9  ;;  %v3401_v22 = vld [vmem:[%s3480_s27 + $0xd0] sm:$0xff] }
 0x398   : > { %3321 = vrcp.f32 %v2771_v32 }
 0x399   : > { %3323 = vpow2.f32 %v2734_v57  ;;  %v3402_v57 = vld [vmem:[%s3480_s27 + $0xd8] sm:$0xff] }
 0x39f   : > { %v3318_v55 = vpop.eup %3317 }
 0x3a0   : > { %v2834_v3 = vmul.f32 %v3318_v55, %v2614_v34 }
 0x3a1   : > { %v3320_v62 = vpop.eup %3319 }
 0x3a2   : > { %v3322_v6 = vpop.eup %3321  ;;  %v2772_v38 = vadd.f32 1.0, %v3320_v62  ;;  %v2866_v5 = vadd.f32 %v3395_v35, %v2834_v3 }
 0x3a3   : > { %v3324_v17 = vpop.eup %3323  ;;  %v2835_v56 = vmul.f32 %v3322_v6, %v2617_v26 }
 0x3a4   : > { %3325 = vrcp.f32 %v2772_v38  ;;  %v2773_v47 = vadd.f32 1.0, %v3324_v17  ;;  %2898 = vst.msk [vmem:[%s4705_s11 + $0xb0] sm:$0xff] %vm297_vm0, %v2866_v5 }
 0x3a5   : > { %v2867_v36 = vadd.f32 %v3396_v63, %v2835_v56 }
 0x3a6   : > { %3327 = vrcp.f32 %v2773_v47 }
 0x3a7   : > { %2899 = vst.msk [vmem:[%s4705_s11 + $0xb8] sm:$0xff] %vm297_vm0, %v2867_v36 }
 0x3ad   : > { %v2541_v1 = vpop.f32.mrb[40].mxu0 }
 0x3ae   : > { %v3326_v18 = vpop.eup %3325  ;;  %v2542_v51 = vadd.f32 %v4894_v43, %v2541_v1  ;;  %v2543_v23 = vpop.f32.mrb[41].mxu0 }
 0x3af   : > { %v2836_v25 = vmul.f32 %v3326_v18, %v2622_v46  ;;  %v2544_v48 = vpop.f32.mrb[42].mxu0 }
 0x3b0   : > { %v3328_v11 = vpop.eup %3327  ;;  %v2656_v13 = vsub.f32 0.0, %v2542_v51  ;;  %v2545_v60 = vadd.f32 %v4894_v43, %v2544_v48  ;;  %v2546_v29 = vpop.f32.mrb[43].mxu0 }
 0x3b1   : > { %v2868_v8 = vadd.f32 %v3397_v0, %v2836_v25  ;;  %v2837_v53 = vmul.f32 %v3328_v11, %v2625_v20  ;;  %v2629_v44 = vpop.f32.mrb[32].mxu1  ;;  %v3400_v20 = vld [vmem:[%s3480_s27 + $0x28] sm:$0xff] }
 0x3b2   : > { %v2692_v16 = vmul.f32 1.442695, %v2656_v13  ;;  %v2657_v14 = vsub.f32 0.0, %v2545_v60  ;;  %v2630_v39 = vadd.f32 %v4894_v43, %v2629_v44  ;;  %v2631_v4 = vpop.f32.mrb[33].mxu1 }
 0x3b3   : > { %2900 = vst.msk [vmem:[%s4705_s11 + $0xc0] sm:$0xff] %vm297_vm0, %v2868_v8  ;;  %v2869_v33 = vadd.f32 %v3398_v12, %v2837_v53  ;;  %v2632_v34 = vpop.f32.mrb[34].mxu1 }
 0x3b4   : > { %3329 = vpow2.f32 %v2692_v16  ;;  %v2694_v2 = vmul.f32 1.442695, %v2657_v14  ;;  %v2678_v37 = vsub.f32 0.0, %v2630_v39  ;;  %v2633_v42 = vadd.f32 %v4894_v43, %v2632_v34  ;;  %v2634_v26 = vpop.f32.mrb[35].mxu1  ;;  %v3403_v34 = vld [vmem:[%s3480_s27 + $0x30] sm:$0xff] }
 0x3b5   : > { %2901 = vst.msk [vmem:[%s4705_s11 + $0xc8] sm:$0xff] %vm297_vm0, %v2869_v33  ;;  %v3404_v26 = vld [vmem:[%s3480_s27 + $0x38] sm:$0xff] }
 0x3b6   : > { %3331 = vpow2.f32 %v2694_v2  ;;  %v2736_v45 = vmul.f32 1.442695, %v2678_v37  ;;  %v2679_v49 = vsub.f32 0.0, %v2633_v42 }
 0x3b8   : > { %3333 = vpow2.f32 %v2736_v45  ;;  %v2738_v30 = vmul.f32 1.442695, %v2679_v49 }
 0x3ba   : > { %3335 = vpow2.f32 %v2738_v30 }
 0x3be   : > { %v3330_v54 = vpop.eup %3329 }
 0x3bf   : > { %v2752_v58 = vadd.f32 1.0, %v3330_v54  ;;  %v3405_v54 = vld [vmem:[%s3480_s27 + $0xe0] sm:$0xff] }
 0x3c0   : > { %v3332_v41 = vpop.eup %3331 }
 0x3c1   : > { %3337 = vrcp.f32 %v2752_v58  ;;  %v2753_v40 = vadd.f32 1.0, %v3332_v41 }
 0x3c2   : > { %v3334_v31 = vpop.eup %3333 }
 0x3c3   : > { %3339 = vrcp.f32 %v2753_v40  ;;  %v2774_v7 = vadd.f32 1.0, %v3334_v31  ;;  %v3406_v40 = vld [vmem:[%s3480_s27 + $0xe8] sm:$0xff] }
 0x3c4   : > { %v3336_v52 = vpop.eup %3335 }
 0x3c5   : > { %3341 = vrcp.f32 %v2774_v7  ;;  %v2775_v21 = vadd.f32 1.0, %v3336_v52 }
 0x3c7   : > { %3343 = vrcp.f32 %v2775_v21 }
 0x3cb   : > { %v3338_v27 = vpop.eup %3337 }
 0x3cc   : > { %v2816_v59 = vmul.f32 %v3338_v27, %v2542_v51 }
 0x3cd   : > { %v3340_v46 = vpop.eup %3339 }
 0x3ce   : > { %v2848_v19 = vadd.f32 %v3399_v24, %v2816_v59  ;;  %v2817_v10 = vmul.f32 %v3340_v46, %v2545_v60 }
 0x3cf   : > { %v3342_v50 = vpop.eup %3341 }
 0x3d0   : > { %2880 = vst.msk [vmem:[%s4705_s11 + $0x20] sm:$0xff] %vm297_vm0, %v2848_v19  ;;  %v2849_v28 = vadd.f32 %v3400_v20, %v2817_v10  ;;  %v2838_v61 = vmul.f32 %v3342_v50, %v2630_v39 }
 0x3d1   : > { %v3344_v15 = vpop.eup %3343 }
 0x3d2   : > { %2881 = vst.msk [vmem:[%s4705_s11 + $0x28] sm:$0xff] %vm297_vm0, %v2849_v28  ;;  %v2870_v9 = vadd.f32 %v3401_v22, %v2838_v61  ;;  %v2839_v32 = vmul.f32 %v3344_v15, %v2633_v42 }
 0x3d4   : > { %2902 = vst.msk [vmem:[%s4705_s11 + $0xd0] sm:$0xff] %vm297_vm0, %v2870_v9  ;;  %v2871_v55 = vadd.f32 %v3402_v57, %v2839_v32 }
 0x3d6   : > { %2903 = vst.msk [vmem:[%s4705_s11 + $0xd8] sm:$0xff] %vm297_vm0, %v2871_v55 }
 0x3e1   : > { %v2549_v62 = vpop.f32.mrb[44].mxu0 }
 0x3e2   : > { %v2550_v3 = vadd.f32 %v4894_v43, %v2549_v62  ;;  %v2551_v6 = vpop.f32.mrb[45].mxu0 }
 0x3e3   : > { %v2552_v38 = vpop.f32.mrb[46].mxu0 }
 0x3e4   : > { %v2658_v17 = vsub.f32 0.0, %v2550_v3  ;;  %v2553_v35 = vadd.f32 %v4894_v43, %v2552_v38  ;;  %v2554_v5 = vpop.f32.mrb[47].mxu0 }
 0x3e5   : > { %v2637_v56 = vpop.f32.mrb[36].mxu1 }
 0x3e6   : > { %v2696_v47 = vmul.f32 1.442695, %v2658_v17  ;;  %v2659_v63 = vsub.f32 0.0, %v2553_v35  ;;  %v2638_v36 = vadd.f32 %v4894_v43, %v2637_v56  ;;  %v2639_v18 = vpop.f32.mrb[37].mxu1 }
 0x3e7   : > { %v2640_v1 = vpop.f32.mrb[38].mxu1  ;;  %v3407_v18 = vld [vmem:[%s3480_s27 + $0x40] sm:$0xff] }
 0x3e8   : > { %3345 = vpow2.f32 %v2696_v47  ;;  %v2698_v25 = vmul.f32 1.442695, %v2659_v63  ;;  %v2680_v51 = vsub.f32 0.0, %v2638_v36  ;;  %v2641_v23 = vadd.f32 %v4894_v43, %v2640_v1  ;;  %v2642_v11 = vpop.f32.mrb[39].mxu1 }
 0x3ea   : > { %3347 = vpow2.f32 %v2698_v25  ;;  %v2740_v48 = vmul.f32 1.442695, %v2680_v51  ;;  %v2681_v0 = vsub.f32 0.0, %v2641_v23 }
 0x3ec   : > { %3349 = vpow2.f32 %v2740_v48  ;;  %v2742_v8 = vmul.f32 1.442695, %v2681_v0 }
 0x3ee   : > { %3351 = vpow2.f32 %v2742_v8  ;;  %v3409_v8 = vld [vmem:[%s3480_s27 + $0xf0] sm:$0xff] }
 0x3f2   : > { %v3346_v53 = vpop.eup %3345 }
 0x3f3   : > { %v2754_v13 = vadd.f32 1.0, %v3346_v53 }
 0x3f4   : > { %v3348_v60 = vpop.eup %3347 }
 0x3f5   : > { %3353 = vrcp.f32 %v2754_v13  ;;  %v2755_v29 = vadd.f32 1.0, %v3348_v60  ;;  %v3410_v60 = vld [vmem:[%s3480_s27 + $0xf8] sm:$0xff] }
 0x3f6   : > { %v3350_v44 = vpop.eup %3349 }
 0x3f7   : > { %3355 = vrcp.f32 %v2755_v29  ;;  %v2776_v12 = vadd.f32 1.0, %v3350_v44 }
 0x3f8   : > { %v3352_v33 = vpop.eup %3351 }
 0x3f9   : > { %3357 = vrcp.f32 %v2776_v12  ;;  %v2777_v16 = vadd.f32 1.0, %v3352_v33 }
 0x3fb   : > { %3359 = vrcp.f32 %v2777_v16 }
 0x3ff   : > { %v3354_v14 = vpop.eup %3353 }
 0x400   : > { %v2818_v39 = vmul.f32 %v3354_v14, %v2550_v3 }
 0x401   : > { %v3356_v4 = vpop.eup %3355 }
 0x402   : > { %v2850_v2 = vadd.f32 %v3403_v34, %v2818_v39  ;;  %v2819_v37 = vmul.f32 %v3356_v4, %v2553_v35 }
 0x403   : > { %v3358_v42 = vpop.eup %3357 }
 0x404   : > { %2882 = vst.msk [vmem:[%s4705_s11 + $0x30] sm:$0xff] %vm297_vm0, %v2850_v2  ;;  %v2851_v45 = vadd.f32 %v3404_v26, %v2819_v37  ;;  %v2840_v49 = vmul.f32 %v3358_v42, %v2638_v36 }
 0x405   : > { %v3360_v30 = vpop.eup %3359 }
 0x406   : > { %2883 = vst.msk [vmem:[%s4705_s11 + $0x38] sm:$0xff] %vm297_vm0, %v2851_v45  ;;  %v2872_v58 = vadd.f32 %v3405_v54, %v2840_v49  ;;  %v2841_v41 = vmul.f32 %v3360_v30, %v2641_v23  ;;  %v3408_v23 = vld [vmem:[%s3480_s27 + $0x48] sm:$0xff] }
 0x408   : > { %2904 = vst.msk [vmem:[%s4705_s11 + $0xe0] sm:$0xff] %vm297_vm0, %v2872_v58  ;;  %v2873_v31 = vadd.f32 %v3406_v40, %v2841_v41 }
 0x40a   : > { %2905 = vst.msk [vmem:[%s4705_s11 + $0xe8] sm:$0xff] %vm297_vm0, %v2873_v31 }
 0x415   : > { %v2557_v7 = vpop.f32.mrb[48].mxu0 }
 0x416   : > { %v2558_v52 = vadd.f32 %v4894_v43, %v2557_v7  ;;  %v2559_v21 = vpop.f32.mrb[49].mxu0 }
 0x417   : > { %v2560_v27 = vpop.f32.mrb[50].mxu0 }
 0x418   : > { %v2660_v59 = vsub.f32 0.0, %v2558_v52  ;;  %v2561_v46 = vadd.f32 %v4894_v43, %v2560_v27  ;;  %v2562_v24 = vpop.f32.mrb[51].mxu0 }
 0x419   : > { %v2645_v19 = vpop.f32.mrb[40].mxu1 }
 0x41a   : > { %v2700_v10 = vmul.f32 1.442695, %v2660_v59  ;;  %v2661_v50 = vsub.f32 0.0, %v2561_v46  ;;  %v2646_v20 = vadd.f32 %v4894_v43, %v2645_v19  ;;  %v2647_v28 = vpop.f32.mrb[41].mxu1 }
 0x41b   : > { %v2648_v61 = vpop.f32.mrb[42].mxu1 }
 0x41c   : > { %3361 = vpow2.f32 %v2700_v10  ;;  %v2702_v15 = vmul.f32 1.442695, %v2661_v50  ;;  %v2682_v22 = vsub.f32 0.0, %v2646_v20  ;;  %v2649_v9 = vadd.f32 %v4894_v43, %v2648_v61  ;;  %v2650_v32 = vpop.f32.mrb[43].mxu1 }
 0x41e   : > { %3363 = vpow2.f32 %v2702_v15  ;;  %v2744_v57 = vmul.f32 1.442695, %v2682_v22  ;;  %v2683_v55 = vsub.f32 0.0, %v2649_v9 }
 0x420   : > { %3365 = vpow2.f32 %v2744_v57  ;;  %v2746_v62 = vmul.f32 1.442695, %v2683_v55 }
 0x422   : > { %3367 = vpow2.f32 %v2746_v62 }
 0x426   : > { %v3362_v3 = vpop.eup %3361 }
 0x427   : > { %v2756_v6 = vadd.f32 1.0, %v3362_v3 }
 0x428   : > { %v3364_v38 = vpop.eup %3363 }
 0x429   : > { %3369 = vrcp.f32 %v2756_v6  ;;  %v2757_v17 = vadd.f32 1.0, %v3364_v38 }
 0x42a   : > { %v3366_v35 = vpop.eup %3365 }
 0x42b   : > { %3371 = vrcp.f32 %v2757_v17  ;;  %v2778_v5 = vadd.f32 1.0, %v3366_v35 }
 0x42c   : > { %v3368_v56 = vpop.eup %3367 }
 0x42d   : > { %3373 = vrcp.f32 %v2778_v5  ;;  %v2779_v43 = vadd.f32 1.0, %v3368_v56 }
 0x42f   : > { %3375 = vrcp.f32 %v2779_v43 }
 0x433   : > { %v3370_v47 = vpop.eup %3369 }
 0x434   : > { %v2820_v63 = vmul.f32 %v3370_v47, %v2558_v52 }
 0x435   : > { %v3372_v36 = vpop.eup %3371 }
 0x436   : > { %v2852_v1 = vadd.f32 %v3407_v18, %v2820_v63  ;;  %v2821_v25 = vmul.f32 %v3372_v36, %v2561_v46 }
 0x437   : > { %v3374_v51 = vpop.eup %3373 }
 0x438   : > { %2884 = vst.msk [vmem:[%s4705_s11 + $0x40] sm:$0xff] %vm297_vm0, %v2852_v1  ;;  %v2853_v11 = vadd.f32 %v3408_v23, %v2821_v25  ;;  %v2842_v48 = vmul.f32 %v3374_v51, %v2646_v20 }
 0x439   : > { %v3376_v0 = vpop.eup %3375 }
 0x43a   : > { %2885 = vst.msk [vmem:[%s4705_s11 + $0x48] sm:$0xff] %vm297_vm0, %v2853_v11  ;;  %v2874_v53 = vadd.f32 %v3409_v8, %v2842_v48  ;;  %v2843_v13 = vmul.f32 %v3376_v0, %v2649_v9 }
 0x43c   : > { %2906 = vst.msk [vmem:[%s4705_s11 + $0xf0] sm:$0xff] %vm297_vm0, %v2874_v53  ;;  %v2875_v29 = vadd.f32 %v3410_v60, %v2843_v13 }
 0x43e   : > { %2907 = vst.msk [vmem:[%s4705_s11 + $0xf8] sm:$0xff] %vm297_vm0, %v2875_v29 }
 0x43f PF: > { %s15_s18 = sadd.s32 1, %s3417_s18  }
 0x440   : > { %p12_p4 = scmp.ge.s32.totalorder %s15_s18, 4  }
 0x442   :  { %14 = sbr.rel (!%p12_p4) target bundleno = 1 (0x1), region = 72 }

</bundles_post_ra>
